<compile_context>
chip_gen: v7x
topology: tpu7x:2x2x1
jax: 0.10.0
libtpu: 0.0.40
codegen_flags: <defaults>
</compile_context>

<pallas_src>
import functools

import numpy as np

import jax
import jax.numpy as jnp
from jax.experimental import pallas as pl
from jax.experimental.pallas import tpu as pltpu


# ---------------------------------------------------------------------------
# Host-side parameter preparation (plain JAX / numpy, done once per weights).
# ---------------------------------------------------------------------------
def spectral_normalize(w_hwio, key, n_iter=30):
    """Divide weights by their largest singular value (power iteration)."""
    kh, kw, cin, cout = w_hwio.shape
    wm = jnp.transpose(w_hwio, (3, 2, 0, 1)).reshape(cout, cin * kh * kw)
    u = jax.random.normal(key, (cout,), jnp.float32)
    u = u / (jnp.linalg.norm(u) + 1e-12)
    for _ in range(n_iter):
        v = wm.T @ u
        v = v / (jnp.linalg.norm(v) + 1e-12)
        u = wm @ v
        u = u / (jnp.linalg.norm(u) + 1e-12)
    sigma = u @ (wm @ v)
    return w_hwio / sigma


def init_generator_params(key, latent_dim, base_depth):
    chans = [latent_dim, base_depth * 8, base_depth * 4,
             base_depth * 2, base_depth, 3]
    params = []
    for i in range(5):
        key, wk, sk = jax.random.split(key, 3)
        cin, cout = chans[i], chans[i + 1]
        # Conv weight in HWIO layout (5, 5, Cin, Cout); deterministic init.
        w = 0.1 * jax.random.normal(wk, (5, 5, cin, cout), jnp.float32)
        w = spectral_normalize(w, sk)
        gamma = jnp.ones((cout,), jnp.float32)   # BatchNorm2d default init
        beta = jnp.zeros((cout,), jnp.float32)
        params.append((w, gamma, beta))
    return params


def _row_select_matrices(batch, h_prev, scale):
    """P[kh, b*H+h, b*H_prev+h'] = 1 iff conv row-tap kh of output row h reads
    source row h' of the nearest-upsampled(scale), zero-padded(2) input."""
    h_out = scale * h_prev
    p = np.zeros((5, batch * h_out, batch * h_prev), np.float32)
    for kh in range(5):
        for h in range(h_out):
            y = h + kh                       # row in the padded/upsampled map
            if 2 <= y < h_out + 2:
                src = (y - 2) // scale
                for b in range(batch):
                    p[kh, b * h_out + h, b * h_prev + src] = 1.0
    return p


def _fold_width_taps_into_weight(w_hwio, w_prev, scale):
    """Fold nearest-upsample(scale) + zero-pad(2) along W plus the 5 kw taps
    into dense per-kh matrices of shape (5, W_prev*Cin, W*Cout)."""
    kh_size, kw_size, cin, cout = w_hwio.shape
    w_out = scale * w_prev
    m = np.zeros((kw_size, w_out, w_prev), np.float32)
    for kw in range(kw_size):
        for w in range(w_out):
            x = w + kw                       # column in padded/upsampled map
            if 2 <= x < w_out + 2:
                m[kw, w, (x - 2) // scale] = 1.0
    # wf[kh, wp, ci, w, co] = sum_kw m[kw, w, wp] * weight[kh, kw, ci, co]
    wf = jnp.einsum('kwp,hkio->hpiwo', jnp.asarray(m), w_hwio)
    return wf.reshape(kh_size, w_prev * cin, w_out * cout)


def _bn_selectors(lanes, cout):
    """red[l, c] = 1 iff lane l holds channel c (l % cout == c); bcast = red.T."""
    l = np.arange(lanes)[:, None]
    c = np.arange(cout)[None, :]
    red = (l % cout == c).astype(np.float32)             # (L, C) reduce
    bct = np.ascontiguousarray(red.T)                    # (C, L) broadcast
    return jnp.asarray(red), jnp.asarray(bct)


def prepare_generator_operands(params, batch):
    """Build the flat operand list for the fused kernel.

    Per layer: bf16 (5, B*H, B*H_prev) row-selection stack, bf16
    (W_prev*Cin, 5*W*Cout) concatenated folded conv weights, and, for BN
    layers, a (2, Cout) f32 [gamma; beta], a (L, Cout) f32 reduce selector
    and a (Cout, L) f32 broadcast selector.  Returns (operands, hbm_flags,
    (H_out, W_out)); hbm_flags marks the layer-3..5 weights that stay in
    HBM and are prefetched inside the kernel."""
    scales = [4, 2, 2, 2, 2]
    operands, hbm_flags = [], []
    h_prev = w_prev = 1
    for i, (w, gamma, beta) in enumerate(params):
        s = scales[i]
        last = i == len(params) - 1
        if last:
            # Pad Cout 3 -> 4 so the output is 64*4 = 256 lanes (lane-dense
            # stores, full MXU column); dummy channel sliced off outside.
            w = jnp.pad(w, ((0, 0), (0, 0), (0, 0), (0, 1)))
        cin, cout = w.shape[2], w.shape[3]
        h_out, w_out = s * h_prev, s * w_prev
        lanes_out = w_out * cout

        p = jnp.asarray(_row_select_matrices(batch, h_prev, s), jnp.bfloat16)
        wf = _fold_width_taps_into_weight(w, w_prev, s)      # (5, Li, Lo)
        wf_cat = (jnp.transpose(wf, (1, 0, 2))
                  .reshape(w_prev * cin, 5 * lanes_out)
                  .astype(jnp.bfloat16))

        operands.append(p);       hbm_flags.append(False)
        operands.append(wf_cat);  hbm_flags.append(i >= 2)   # prefetch L3..L5
        if not last:
            operands.append(jnp.stack([gamma, beta]).astype(jnp.float32))
            hbm_flags.append(False)
            red, bct = _bn_selectors(lanes_out, cout)
            operands.append(red); hbm_flags.append(False)
            operands.append(bct); hbm_flags.append(False)
        h_prev, w_prev = h_out, w_out
    return operands, hbm_flags, (h_prev, w_prev)


# ---------------------------------------------------------------------------
# Single fused Pallas kernel: 5 x (upsample + pad + conv + BN + act).
# ---------------------------------------------------------------------------
def _generator_kernel(
    x_ref,
    p1, w1, bn1, rd1, bc1,
    p2, w2, bn2, rd2, bc2,
    p3, w3_hbm, bn3, rd3, bc3,
    p4, w4_hbm, bn4, rd4, bc4,
    p5, w5_hbm,
    o_ref,
    w3_v, w4_v, w5_v, sems,
):
    # Prefetch layer-3..5 folded weights HBM -> VMEM; DMAs overlap with the
    # layer-1/2 compute and are waited on just before their layer.
    cp3 = pltpu.make_async_copy(w3_hbm, w3_v, sems.at[0])
    cp4 = pltpu.make_async_copy(w4_hbm, w4_v, sems.at[1])
    cp5 = pltpu.make_async_copy(w5_hbm, w5_v, sems.at[2])
    cp3.start()
    cp4.start()
    cp5.start()

    def conv(x, p_ref, wf):
        """Fused nearest-upsample + zero-pad + 5x5 conv.

        One wide matmul applies the width-folded weights for all 5 row taps,
        then 5 exact 0/1 row-selection matmuls implement the H upsample+pad
        and accumulate the taps (kept as `acc + dot` so v7x accumulates in
        the MRB)."""
        lanes_out = wf.shape[1] // 5
        z = jnp.dot(x, wf, preferred_element_type=jnp.float32)
        z = z.astype(jnp.bfloat16)
        acc = jnp.dot(p_ref[0], z[:, 0:lanes_out],
                      preferred_element_type=jnp.float32)
        for kh in range(1, 5):
            acc = acc + jnp.dot(
                p_ref[kh], z[:, kh * lanes_out:(kh + 1) * lanes_out],
                preferred_element_type=jnp.float32)
        return acc

    def bn_lrelu(acc, bn_ref, rd_ref, bc_ref):
        """BatchNorm2d (training-mode biased batch stats) + LeakyReLU(0.2)."""
        rows, lanes = acc.shape
        cout = rd_ref.shape[1]
        inv_n = 1.0 / float(rows * (lanes // cout))          # 1 / (B*H*W)
        moments = jnp.concatenate(
            [jnp.sum(acc, axis=0, keepdims=True),
             jnp.sum(acc * acc, axis=0, keepdims=True)], axis=0)    # (2, L)
        stats = jnp.dot(moments, rd_ref[...],
                        preferred_element_type=jnp.float32) * inv_n  # (2, C)
        mean, ex2 = stats[0:1, :], stats[1:2, :]
        var = ex2 - mean * mean
        bn = bn_ref[...]
        scale = bn[0:1, :] * jax.lax.rsqrt(var + 1e-5)               # (1, C)
        shift = bn[1:2, :] - mean * scale                            # (1, C)
        sl = jnp.dot(jnp.concatenate([scale, shift], axis=0), bc_ref[...],
                     preferred_element_type=jnp.float32)             # (2, L)
        y = acc * sl[0:1, :] + sl[1:2, :]
        return jnp.where(y >= 0.0, y, 0.2 * y)                       # LeakyReLU

    x = x_ref[...]                                                   # bf16
    x = bn_lrelu(conv(x, p1, w1[...]), bn1, rd1, bc1).astype(jnp.bfloat16)
    x = bn_lrelu(conv(x, p2, w2[...]), bn2, rd2, bc2).astype(jnp.bfloat16)
    cp3.wait()
    x = bn_lrelu(conv(x, p3, w3_v[...]), bn3, rd3, bc3).astype(jnp.bfloat16)
    cp4.wait()
    x = bn_lrelu(conv(x, p4, w4_v[...]), bn4, rd4, bc4).astype(jnp.bfloat16)
    cp5.wait()
    o_ref[...] = jnp.tanh(conv(x, p5, w5_v[...])).astype(o_ref.dtype)


def generator_forward(latent_nchw, operands, *, hbm_flags, out_hw):
    assert latent_nchw.ndim == 4, "Expected shape: (B, C, 1, 1)"
    b, c = latent_nchw.shape[0], latent_nchw.shape[1]
    out_h, out_w = out_hw
    x0 = latent_nchw.reshape(b, c).astype(jnp.bfloat16)

    vmem = pl.BlockSpec(memory_space=pltpu.MemorySpace.VMEM)
    hbm = pl.BlockSpec(memory_space=pl.ANY)
    in_specs = [vmem] + [hbm if f else vmem for f in hbm_flags]

    # One VMEM scratch buffer + one DMA semaphore per HBM-resident weight.
    wf_scratch = [pltpu.VMEM(op.shape, op.dtype)
                  for op, f in zip(operands, hbm_flags) if f]
    scratch_shapes = wf_scratch + [pltpu.SemaphoreType.DMA((len(wf_scratch),))]

    out2d = pl.pallas_call(
        _generator_kernel,
        out_shape=jax.ShapeDtypeStruct((b * out_h, out_w * 4), jnp.float32),
        in_specs=in_specs,
        out_specs=vmem,
        scratch_shapes=scratch_shapes,
        compiler_params=pltpu.CompilerParams(
            vmem_limit_bytes=32 * 1024 * 1024),
    )(x0, *operands)

    # (B*H, W*4) rows=(b,h), lanes=(w,c) -> drop the padded channel -> NCHW.
    return (out2d.reshape(b, out_h, out_w, 4)[..., :3]
            .transpose(0, 3, 1, 2))


# ---------------------------------------------------------------------------
# Plain-JAX reference (mirrors the bf16 quantization of the matmul operands).
# ---------------------------------------------------------------------------
def reference_forward(latent_nchw, params):
    scales = [4, 2, 2, 2, 2]
    x = jnp.transpose(latent_nchw, (0, 2, 3, 1))
    x = x.astype(jnp.bfloat16).astype(jnp.float32)
    for i, (w, gamma, beta) in enumerate(params):
        s = scales[i]
        x = jnp.repeat(jnp.repeat(x, s, axis=1), s, axis=2)
        wq = w.astype(jnp.bfloat16).astype(jnp.float32)
        x = jax.lax.conv_general_dilated(
            x, wq, window_strides=(1, 1), padding=[(2, 2), (2, 2)],
            dimension_numbers=("NHWC", "HWIO", "NHWC"))
        if i < len(params) - 1:
            mean = jnp.mean(x, axis=(0, 1, 2), keepdims=True)
            var = jnp.mean(jnp.square(x - mean), axis=(0, 1, 2), keepdims=True)
            x = (x - mean) * jax.lax.rsqrt(var + 1e-5) * gamma + beta
            x = jnp.where(x >= 0.0, x, 0.2 * x)
            x = x.astype(jnp.bfloat16).astype(jnp.float32)
        else:
            x = jnp.tanh(x)
    return jnp.transpose(x, (0, 3, 1, 2))


if __name__ == "__main__":
    LATENT_DIM = 16
    BASE_DEPTH = 8
    BATCH = 2

    key = jax.random.PRNGKey(0)
    pkey, zkey = jax.random.split(key)
    params = init_generator_params(pkey, LATENT_DIM, BASE_DEPTH)
    operands, hbm_flags, out_hw = prepare_generator_operands(params, BATCH)
    latent = jax.random.normal(zkey, (BATCH, LATENT_DIM, 1, 1), jnp.float32)

    fwd = jax.jit(functools.partial(generator_forward,
                                    hbm_flags=tuple(hbm_flags),
                                    out_hw=out_hw))
    out = jax.block_until_ready(fwd(latent, operands))

    assert out.shape == (BATCH, 3, 64, 64), out.shape
    assert bool(jnp.all(jnp.isfinite(out)))
    assert bool(jnp.all(jnp.abs(out) <= 1.0))  # tanh output range

    ref = reference_forward(latent, params)
    max_err = float(jnp.max(jnp.abs(out - ref)))
    assert max_err < 0.1, f"mismatch vs plain-JAX reference: {max_err}"

    print("KERNEL_OK")
</pallas_src>

<mosaic_0001>
module attributes {stable_mosaic.version = 11 : i64} {
  func.func @_generator_kernel(%arg0: memref<2x16xbf16, #tpu.memory_space<vmem>>, %arg1: memref<5x8x2xbf16, #tpu.memory_space<vmem>>, %arg2: memref<16x1280xbf16, #tpu.memory_space<vmem>>, %arg3: memref<2x64xf32, #tpu.memory_space<vmem>>, %arg4: memref<256x64xf32, #tpu.memory_space<vmem>>, %arg5: memref<64x256xf32, #tpu.memory_space<vmem>>, %arg6: memref<5x16x8xbf16, #tpu.memory_space<vmem>>, %arg7: memref<256x1280xbf16, #tpu.memory_space<vmem>>, %arg8: memref<2x32xf32, #tpu.memory_space<vmem>>, %arg9: memref<256x32xf32, #tpu.memory_space<vmem>>, %arg10: memref<32x256xf32, #tpu.memory_space<vmem>>, %arg11: memref<5x32x16xbf16, #tpu.memory_space<vmem>>, %arg12: memref<256x1280xbf16, #tpu.memory_space<any>>, %arg13: memref<2x16xf32, #tpu.memory_space<vmem>>, %arg14: memref<256x16xf32, #tpu.memory_space<vmem>>, %arg15: memref<16x256xf32, #tpu.memory_space<vmem>>, %arg16: memref<5x64x32xbf16, #tpu.memory_space<vmem>>, %arg17: memref<256x1280xbf16, #tpu.memory_space<any>>, %arg18: memref<2x8xf32, #tpu.memory_space<vmem>>, %arg19: memref<256x8xf32, #tpu.memory_space<vmem>>, %arg20: memref<8x256xf32, #tpu.memory_space<vmem>>, %arg21: memref<5x128x64xbf16, #tpu.memory_space<vmem>>, %arg22: memref<256x1280xbf16, #tpu.memory_space<any>>, %arg23: memref<128x256xf32, #tpu.memory_space<vmem>>, %arg24: memref<256x1280xbf16, #tpu.memory_space<vmem>>, %arg25: memref<256x1280xbf16, #tpu.memory_space<vmem>>, %arg26: memref<256x1280xbf16, #tpu.memory_space<vmem>>, %arg27: memref<3x!tpu.dma_semaphore, #tpu.memory_space<semaphore_mem>>) attributes {dimension_semantics = [], scalar_prefetch = 0 : i64, scratch_operands = 4 : i64, tpu.core_type = #tpu.core_type<tc>} {
    %c0_i32 = arith.constant 0 : i32
    %0 = tpu.memref_slice %arg27[%c0_i32] : memref<3x!tpu.dma_semaphore, #tpu.memory_space<semaphore_mem>> -> memref<1x!tpu.dma_semaphore, #tpu.memory_space<semaphore_mem>>
    %1 = tpu.memref_squeeze %0 : memref<1x!tpu.dma_semaphore, #tpu.memory_space<semaphore_mem>> -> memref<!tpu.dma_semaphore, #tpu.memory_space<semaphore_mem>>
    tpu.enqueue_dma source(%arg12 : memref<256x1280xbf16, #tpu.memory_space<any>>) target(%arg24 : memref<256x1280xbf16, #tpu.memory_space<vmem>>) target_semaphore(%1 : memref<!tpu.dma_semaphore, #tpu.memory_space<semaphore_mem>>)
    %c1_i32 = arith.constant 1 : i32
    %2 = tpu.memref_slice %arg27[%c1_i32] : memref<3x!tpu.dma_semaphore, #tpu.memory_space<semaphore_mem>> -> memref<1x!tpu.dma_semaphore, #tpu.memory_space<semaphore_mem>>
    %3 = tpu.memref_squeeze %2 : memref<1x!tpu.dma_semaphore, #tpu.memory_space<semaphore_mem>> -> memref<!tpu.dma_semaphore, #tpu.memory_space<semaphore_mem>>
    tpu.enqueue_dma source(%arg17 : memref<256x1280xbf16, #tpu.memory_space<any>>) target(%arg25 : memref<256x1280xbf16, #tpu.memory_space<vmem>>) target_semaphore(%3 : memref<!tpu.dma_semaphore, #tpu.memory_space<semaphore_mem>>)
    %c2_i32 = arith.constant 2 : i32
    %4 = tpu.memref_slice %arg27[%c2_i32] : memref<3x!tpu.dma_semaphore, #tpu.memory_space<semaphore_mem>> -> memref<1x!tpu.dma_semaphore, #tpu.memory_space<semaphore_mem>>
    %5 = tpu.memref_squeeze %4 : memref<1x!tpu.dma_semaphore, #tpu.memory_space<semaphore_mem>> -> memref<!tpu.dma_semaphore, #tpu.memory_space<semaphore_mem>>
    tpu.enqueue_dma source(%arg22 : memref<256x1280xbf16, #tpu.memory_space<any>>) target(%arg26 : memref<256x1280xbf16, #tpu.memory_space<vmem>>) target_semaphore(%5 : memref<!tpu.dma_semaphore, #tpu.memory_space<semaphore_mem>>)
    %c0 = arith.constant 0 : index
    %c0_0 = arith.constant 0 : index
    %6 = vector.load %arg0[%c0, %c0_0] : memref<2x16xbf16, #tpu.memory_space<vmem>>, vector<2x16xbf16>
    %c0_1 = arith.constant 0 : index
    %c0_2 = arith.constant 0 : index
    %7 = vector.load %arg2[%c0_1, %c0_2] : memref<16x1280xbf16, #tpu.memory_space<vmem>>, vector<16x1280xbf16>
    %cst = arith.constant dense<0.000000e+00> : vector<2x1280xf32>
    %8 = tpu.matmul %6, %7, %cst {dimension_numbers = #tpu.dot_dimension_numbers<[1], [0], [0], [1], [0, 0, 1, 1], [], []>} : vector<2x16xbf16>, vector<16x1280xbf16>, vector<2x1280xf32> -> vector<2x1280xf32>
    %9 = arith.truncf %8 : vector<2x1280xf32> to vector<2x1280xbf16>
    %c0_3 = arith.constant 0 : index
    %c0_4 = arith.constant 0 : index
    %c0_5 = arith.constant 0 : index
    %10 = vector.load %arg1[%c0_3, %c0_4, %c0_5] : memref<5x8x2xbf16, #tpu.memory_space<vmem>>, vector<1x8x2xbf16>
    %11 = vector.shape_cast %10 : vector<1x8x2xbf16> to vector<8x2xbf16>
    %12 = vector.extract_strided_slice %9 {offsets = [0, 0], sizes = [2, 256], strides = [1, 1]} : vector<2x1280xbf16> to vector<2x256xbf16>
    %cst_6 = arith.constant dense<0.000000e+00> : vector<8x256xf32>
    %13 = tpu.matmul %11, %12, %cst_6 {dimension_numbers = #tpu.dot_dimension_numbers<[1], [0], [0], [1], [0, 0, 1, 1], [], []>} : vector<8x2xbf16>, vector<2x256xbf16>, vector<8x256xf32> -> vector<8x256xf32>
    %c1 = arith.constant 1 : index
    %c0_7 = arith.constant 0 : index
    %c0_8 = arith.constant 0 : index
    %14 = vector.load %arg1[%c1, %c0_7, %c0_8] : memref<5x8x2xbf16, #tpu.memory_space<vmem>>, vector<1x8x2xbf16>
    %15 = vector.shape_cast %14 : vector<1x8x2xbf16> to vector<8x2xbf16>
    %16 = vector.extract_strided_slice %9 {offsets = [0, 256], sizes = [2, 256], strides = [1, 1]} : vector<2x1280xbf16> to vector<2x256xbf16>
    %cst_9 = arith.constant dense<0.000000e+00> : vector<8x256xf32>
    %17 = tpu.matmul %15, %16, %cst_9 {dimension_numbers = #tpu.dot_dimension_numbers<[1], [0], [0], [1], [0, 0, 1, 1], [], []>} : vector<8x2xbf16>, vector<2x256xbf16>, vector<8x256xf32> -> vector<8x256xf32>
    %18 = arith.addf %13, %17 : vector<8x256xf32>
    %c2 = arith.constant 2 : index
    %c0_10 = arith.constant 0 : index
    %c0_11 = arith.constant 0 : index
    %19 = vector.load %arg1[%c2, %c0_10, %c0_11] : memref<5x8x2xbf16, #tpu.memory_space<vmem>>, vector<1x8x2xbf16>
    %20 = vector.shape_cast %19 : vector<1x8x2xbf16> to vector<8x2xbf16>
    %21 = vector.extract_strided_slice %9 {offsets = [0, 512], sizes = [2, 256], strides = [1, 1]} : vector<2x1280xbf16> to vector<2x256xbf16>
    %cst_12 = arith.constant dense<0.000000e+00> : vector<8x256xf32>
    %22 = tpu.matmul %20, %21, %cst_12 {dimension_numbers = #tpu.dot_dimension_numbers<[1], [0], [0], [1], [0, 0, 1, 1], [], []>} : vector<8x2xbf16>, vector<2x256xbf16>, vector<8x256xf32> -> vector<8x256xf32>
    %23 = arith.addf %18, %22 : vector<8x256xf32>
    %c3 = arith.constant 3 : index
    %c0_13 = arith.constant 0 : index
    %c0_14 = arith.constant 0 : index
    %24 = vector.load %arg1[%c3, %c0_13, %c0_14] : memref<5x8x2xbf16, #tpu.memory_space<vmem>>, vector<1x8x2xbf16>
    %25 = vector.shape_cast %24 : vector<1x8x2xbf16> to vector<8x2xbf16>
    %26 = vector.extract_strided_slice %9 {offsets = [0, 768], sizes = [2, 256], strides = [1, 1]} : vector<2x1280xbf16> to vector<2x256xbf16>
    %cst_15 = arith.constant dense<0.000000e+00> : vector<8x256xf32>
    %27 = tpu.matmul %25, %26, %cst_15 {dimension_numbers = #tpu.dot_dimension_numbers<[1], [0], [0], [1], [0, 0, 1, 1], [], []>} : vector<8x2xbf16>, vector<2x256xbf16>, vector<8x256xf32> -> vector<8x256xf32>
    %28 = arith.addf %23, %27 : vector<8x256xf32>
    %c4 = arith.constant 4 : index
    %c0_16 = arith.constant 0 : index
    %c0_17 = arith.constant 0 : index
    %29 = vector.load %arg1[%c4, %c0_16, %c0_17] : memref<5x8x2xbf16, #tpu.memory_space<vmem>>, vector<1x8x2xbf16>
    %30 = vector.shape_cast %29 : vector<1x8x2xbf16> to vector<8x2xbf16>
    %31 = vector.extract_strided_slice %9 {offsets = [0, 1024], sizes = [2, 256], strides = [1, 1]} : vector<2x1280xbf16> to vector<2x256xbf16>
    %cst_18 = arith.constant dense<0.000000e+00> : vector<8x256xf32>
    %32 = tpu.matmul %30, %31, %cst_18 {dimension_numbers = #tpu.dot_dimension_numbers<[1], [0], [0], [1], [0, 0, 1, 1], [], []>} : vector<8x2xbf16>, vector<2x256xbf16>, vector<8x256xf32> -> vector<8x256xf32>
    %33 = arith.addf %28, %32 : vector<8x256xf32>
    %cst_19 = arith.constant dense<0.000000e+00> : vector<256xf32>
    %34 = vector.multi_reduction <add>, %33, %cst_19 [0] : vector<8x256xf32> to vector<256xf32>
    %35 = vector.shape_cast %34 : vector<256xf32> to vector<1x256xf32>
    %36 = arith.mulf %33, %33 : vector<8x256xf32>
    %cst_20 = arith.constant dense<0.000000e+00> : vector<256xf32>
    %37 = vector.multi_reduction <add>, %36, %cst_20 [0] : vector<8x256xf32> to vector<256xf32>
    %38 = vector.shape_cast %37 : vector<256xf32> to vector<1x256xf32>
    %39 = tpu.concatenate %35, %38 in 0 : vector<1x256xf32>, vector<1x256xf32> -> vector<2x256xf32>
    %c0_21 = arith.constant 0 : index
    %c0_22 = arith.constant 0 : index
    %40 = vector.load %arg4[%c0_21, %c0_22] : memref<256x64xf32, #tpu.memory_space<vmem>>, vector<256x64xf32>
    %cst_23 = arith.constant dense<0.000000e+00> : vector<2x64xf32>
    %41 = tpu.matmul %39, %40, %cst_23 {dimension_numbers = #tpu.dot_dimension_numbers<[1], [0], [0], [1], [0, 0, 1, 1], [], []>} : vector<2x256xf32>, vector<256x64xf32>, vector<2x64xf32> -> vector<2x64xf32>
    %cst_24 = arith.constant 3.125000e-02 : f32
    %42 = vector.broadcast %cst_24 : f32 to vector<2x64xf32>
    %43 = arith.mulf %41, %42 : vector<2x64xf32>
    %44 = vector.extract_strided_slice %43 {offsets = [0, 0], sizes = [1, 64], strides = [1, 1]} : vector<2x64xf32> to vector<1x64xf32>
    %45 = vector.extract_strided_slice %43 {offsets = [1, 0], sizes = [1, 64], strides = [1, 1]} : vector<2x64xf32> to vector<1x64xf32>
    %46 = arith.mulf %44, %44 : vector<1x64xf32>
    %47 = arith.subf %45, %46 : vector<1x64xf32>
    %c0_25 = arith.constant 0 : index
    %c0_26 = arith.constant 0 : index
    %48 = vector.load %arg3[%c0_25, %c0_26] : memref<2x64xf32, #tpu.memory_space<vmem>>, vector<2x64xf32>
    %49 = vector.extract_strided_slice %48 {offsets = [0, 0], sizes = [1, 64], strides = [1, 1]} : vector<2x64xf32> to vector<1x64xf32>
    %cst_27 = arith.constant 9.99999974E-6 : f32
    %50 = vector.broadcast %cst_27 : f32 to vector<1x64xf32>
    %51 = arith.addf %47, %50 : vector<1x64xf32>
    %52 = math.rsqrt %51 : vector<1x64xf32>
    %53 = arith.mulf %49, %52 : vector<1x64xf32>
    %54 = vector.extract_strided_slice %48 {offsets = [1, 0], sizes = [1, 64], strides = [1, 1]} : vector<2x64xf32> to vector<1x64xf32>
    %55 = arith.mulf %44, %53 : vector<1x64xf32>
    %56 = arith.subf %54, %55 : vector<1x64xf32>
    %57 = tpu.concatenate %53, %56 in 0 : vector<1x64xf32>, vector<1x64xf32> -> vector<2x64xf32>
    %c0_28 = arith.constant 0 : index
    %c0_29 = arith.constant 0 : index
    %58 = vector.load %arg5[%c0_28, %c0_29] : memref<64x256xf32, #tpu.memory_space<vmem>>, vector<64x256xf32>
    %cst_30 = arith.constant dense<0.000000e+00> : vector<2x256xf32>
    %59 = tpu.matmul %57, %58, %cst_30 {dimension_numbers = #tpu.dot_dimension_numbers<[1], [0], [0], [1], [0, 0, 1, 1], [], []>} : vector<2x64xf32>, vector<64x256xf32>, vector<2x256xf32> -> vector<2x256xf32>
    %60 = vector.extract_strided_slice %59 {offsets = [0, 0], sizes = [1, 256], strides = [1, 1]} : vector<2x256xf32> to vector<1x256xf32>
    %61 = vector.broadcast %60 : vector<1x256xf32> to vector<8x256xf32>
    %62 = arith.mulf %33, %61 : vector<8x256xf32>
    %63 = vector.extract_strided_slice %59 {offsets = [1, 0], sizes = [1, 256], strides = [1, 1]} : vector<2x256xf32> to vector<1x256xf32>
    %64 = vector.broadcast %63 : vector<1x256xf32> to vector<8x256xf32>
    %65 = arith.addf %62, %64 : vector<8x256xf32>
    %cst_31 = arith.constant 0.000000e+00 : f32
    %66 = vector.broadcast %cst_31 : f32 to vector<8x256xf32>
    %67 = arith.cmpf oge, %65, %66 : vector<8x256xf32>
    %cst_32 = arith.constant 2.000000e-01 : f32
    %68 = vector.broadcast %cst_32 : f32 to vector<8x256xf32>
    %69 = arith.mulf %68, %65 : vector<8x256xf32>
    %70 = arith.select %67, %65, %69 : vector<8x256xi1>, vector<8x256xf32>
    %71 = arith.truncf %70 : vector<8x256xf32> to vector<8x256xbf16>
    %c0_33 = arith.constant 0 : index
    %c0_34 = arith.constant 0 : index
    %72 = vector.load %arg7[%c0_33, %c0_34] : memref<256x1280xbf16, #tpu.memory_space<vmem>>, vector<256x1280xbf16>
    %cst_35 = arith.constant dense<0.000000e+00> : vector<8x1280xf32>
    %73 = tpu.matmul %71, %72, %cst_35 {dimension_numbers = #tpu.dot_dimension_numbers<[1], [0], [0], [1], [0, 0, 1, 1], [], []>} : vector<8x256xbf16>, vector<256x1280xbf16>, vector<8x1280xf32> -> vector<8x1280xf32>
    %74 = arith.truncf %73 : vector<8x1280xf32> to vector<8x1280xbf16>
    %c0_36 = arith.constant 0 : index
    %c0_37 = arith.constant 0 : index
    %c0_38 = arith.constant 0 : index
    %75 = vector.load %arg6[%c0_36, %c0_37, %c0_38] : memref<5x16x8xbf16, #tpu.memory_space<vmem>>, vector<1x16x8xbf16>
    %76 = vector.shape_cast %75 : vector<1x16x8xbf16> to vector<16x8xbf16>
    %77 = vector.extract_strided_slice %74 {offsets = [0, 0], sizes = [8, 256], strides = [1, 1]} : vector<8x1280xbf16> to vector<8x256xbf16>
    %cst_39 = arith.constant dense<0.000000e+00> : vector<16x256xf32>
    %78 = tpu.matmul %76, %77, %cst_39 {dimension_numbers = #tpu.dot_dimension_numbers<[1], [0], [0], [1], [0, 0, 1, 1], [], []>} : vector<16x8xbf16>, vector<8x256xbf16>, vector<16x256xf32> -> vector<16x256xf32>
    %c1_40 = arith.constant 1 : index
    %c0_41 = arith.constant 0 : index
    %c0_42 = arith.constant 0 : index
    %79 = vector.load %arg6[%c1_40, %c0_41, %c0_42] : memref<5x16x8xbf16, #tpu.memory_space<vmem>>, vector<1x16x8xbf16>
    %80 = vector.shape_cast %79 : vector<1x16x8xbf16> to vector<16x8xbf16>
    %81 = vector.extract_strided_slice %74 {offsets = [0, 256], sizes = [8, 256], strides = [1, 1]} : vector<8x1280xbf16> to vector<8x256xbf16>
    %cst_43 = arith.constant dense<0.000000e+00> : vector<16x256xf32>
    %82 = tpu.matmul %80, %81, %cst_43 {dimension_numbers = #tpu.dot_dimension_numbers<[1], [0], [0], [1], [0, 0, 1, 1], [], []>} : vector<16x8xbf16>, vector<8x256xbf16>, vector<16x256xf32> -> vector<16x256xf32>
    %83 = arith.addf %78, %82 : vector<16x256xf32>
    %c2_44 = arith.constant 2 : index
    %c0_45 = arith.constant 0 : index
    %c0_46 = arith.constant 0 : index
    %84 = vector.load %arg6[%c2_44, %c0_45, %c0_46] : memref<5x16x8xbf16, #tpu.memory_space<vmem>>, vector<1x16x8xbf16>
    %85 = vector.shape_cast %84 : vector<1x16x8xbf16> to vector<16x8xbf16>
    %86 = vector.extract_strided_slice %74 {offsets = [0, 512], sizes = [8, 256], strides = [1, 1]} : vector<8x1280xbf16> to vector<8x256xbf16>
    %cst_47 = arith.constant dense<0.000000e+00> : vector<16x256xf32>
    %87 = tpu.matmul %85, %86, %cst_47 {dimension_numbers = #tpu.dot_dimension_numbers<[1], [0], [0], [1], [0, 0, 1, 1], [], []>} : vector<16x8xbf16>, vector<8x256xbf16>, vector<16x256xf32> -> vector<16x256xf32>
    %88 = arith.addf %83, %87 : vector<16x256xf32>
    %c3_48 = arith.constant 3 : index
    %c0_49 = arith.constant 0 : index
    %c0_50 = arith.constant 0 : index
    %89 = vector.load %arg6[%c3_48, %c0_49, %c0_50] : memref<5x16x8xbf16, #tpu.memory_space<vmem>>, vector<1x16x8xbf16>
    %90 = vector.shape_cast %89 : vector<1x16x8xbf16> to vector<16x8xbf16>
    %91 = vector.extract_strided_slice %74 {offsets = [0, 768], sizes = [8, 256], strides = [1, 1]} : vector<8x1280xbf16> to vector<8x256xbf16>
    %cst_51 = arith.constant dense<0.000000e+00> : vector<16x256xf32>
    %92 = tpu.matmul %90, %91, %cst_51 {dimension_numbers = #tpu.dot_dimension_numbers<[1], [0], [0], [1], [0, 0, 1, 1], [], []>} : vector<16x8xbf16>, vector<8x256xbf16>, vector<16x256xf32> -> vector<16x256xf32>
    %93 = arith.addf %88, %92 : vector<16x256xf32>
    %c4_52 = arith.constant 4 : index
    %c0_53 = arith.constant 0 : index
    %c0_54 = arith.constant 0 : index
    %94 = vector.load %arg6[%c4_52, %c0_53, %c0_54] : memref<5x16x8xbf16, #tpu.memory_space<vmem>>, vector<1x16x8xbf16>
    %95 = vector.shape_cast %94 : vector<1x16x8xbf16> to vector<16x8xbf16>
    %96 = vector.extract_strided_slice %74 {offsets = [0, 1024], sizes = [8, 256], strides = [1, 1]} : vector<8x1280xbf16> to vector<8x256xbf16>
    %cst_55 = arith.constant dense<0.000000e+00> : vector<16x256xf32>
    %97 = tpu.matmul %95, %96, %cst_55 {dimension_numbers = #tpu.dot_dimension_numbers<[1], [0], [0], [1], [0, 0, 1, 1], [], []>} : vector<16x8xbf16>, vector<8x256xbf16>, vector<16x256xf32> -> vector<16x256xf32>
    %98 = arith.addf %93, %97 : vector<16x256xf32>
    %cst_56 = arith.constant dense<0.000000e+00> : vector<256xf32>
    %99 = vector.multi_reduction <add>, %98, %cst_56 [0] : vector<16x256xf32> to vector<256xf32>
    %100 = vector.shape_cast %99 : vector<256xf32> to vector<1x256xf32>
    %101 = arith.mulf %98, %98 : vector<16x256xf32>
    %cst_57 = arith.constant dense<0.000000e+00> : vector<256xf32>
    %102 = vector.multi_reduction <add>, %101, %cst_57 [0] : vector<16x256xf32> to vector<256xf32>
    %103 = vector.shape_cast %102 : vector<256xf32> to vector<1x256xf32>
    %104 = tpu.concatenate %100, %103 in 0 : vector<1x256xf32>, vector<1x256xf32> -> vector<2x256xf32>
    %c0_58 = arith.constant 0 : index
    %c0_59 = arith.constant 0 : index
    %105 = vector.load %arg9[%c0_58, %c0_59] : memref<256x32xf32, #tpu.memory_space<vmem>>, vector<256x32xf32>
    %cst_60 = arith.constant dense<0.000000e+00> : vector<2x32xf32>
    %106 = tpu.matmul %104, %105, %cst_60 {dimension_numbers = #tpu.dot_dimension_numbers<[1], [0], [0], [1], [0, 0, 1, 1], [], []>} : vector<2x256xf32>, vector<256x32xf32>, vector<2x32xf32> -> vector<2x32xf32>
    %cst_61 = arith.constant 7.812500e-03 : f32
    %107 = vector.broadcast %cst_61 : f32 to vector<2x32xf32>
    %108 = arith.mulf %106, %107 : vector<2x32xf32>
    %109 = vector.extract_strided_slice %108 {offsets = [0, 0], sizes = [1, 32], strides = [1, 1]} : vector<2x32xf32> to vector<1x32xf32>
    %110 = vector.extract_strided_slice %108 {offsets = [1, 0], sizes = [1, 32], strides = [1, 1]} : vector<2x32xf32> to vector<1x32xf32>
    %111 = arith.mulf %109, %109 : vector<1x32xf32>
    %112 = arith.subf %110, %111 : vector<1x32xf32>
    %c0_62 = arith.constant 0 : index
    %c0_63 = arith.constant 0 : index
    %113 = vector.load %arg8[%c0_62, %c0_63] : memref<2x32xf32, #tpu.memory_space<vmem>>, vector<2x32xf32>
    %114 = vector.extract_strided_slice %113 {offsets = [0, 0], sizes = [1, 32], strides = [1, 1]} : vector<2x32xf32> to vector<1x32xf32>
    %cst_64 = arith.constant 9.99999974E-6 : f32
    %115 = vector.broadcast %cst_64 : f32 to vector<1x32xf32>
    %116 = arith.addf %112, %115 : vector<1x32xf32>
    %117 = math.rsqrt %116 : vector<1x32xf32>
    %118 = arith.mulf %114, %117 : vector<1x32xf32>
    %119 = vector.extract_strided_slice %113 {offsets = [1, 0], sizes = [1, 32], strides = [1, 1]} : vector<2x32xf32> to vector<1x32xf32>
    %120 = arith.mulf %109, %118 : vector<1x32xf32>
    %121 = arith.subf %119, %120 : vector<1x32xf32>
    %122 = tpu.concatenate %118, %121 in 0 : vector<1x32xf32>, vector<1x32xf32> -> vector<2x32xf32>
    %c0_65 = arith.constant 0 : index
    %c0_66 = arith.constant 0 : index
    %123 = vector.load %arg10[%c0_65, %c0_66] : memref<32x256xf32, #tpu.memory_space<vmem>>, vector<32x256xf32>
    %cst_67 = arith.constant dense<0.000000e+00> : vector<2x256xf32>
    %124 = tpu.matmul %122, %123, %cst_67 {dimension_numbers = #tpu.dot_dimension_numbers<[1], [0], [0], [1], [0, 0, 1, 1], [], []>} : vector<2x32xf32>, vector<32x256xf32>, vector<2x256xf32> -> vector<2x256xf32>
    %125 = vector.extract_strided_slice %124 {offsets = [0, 0], sizes = [1, 256], strides = [1, 1]} : vector<2x256xf32> to vector<1x256xf32>
    %126 = vector.broadcast %125 : vector<1x256xf32> to vector<16x256xf32>
    %127 = arith.mulf %98, %126 : vector<16x256xf32>
    %128 = vector.extract_strided_slice %124 {offsets = [1, 0], sizes = [1, 256], strides = [1, 1]} : vector<2x256xf32> to vector<1x256xf32>
    %129 = vector.broadcast %128 : vector<1x256xf32> to vector<16x256xf32>
    %130 = arith.addf %127, %129 : vector<16x256xf32>
    %cst_68 = arith.constant 0.000000e+00 : f32
    %131 = vector.broadcast %cst_68 : f32 to vector<16x256xf32>
    %132 = arith.cmpf oge, %130, %131 : vector<16x256xf32>
    %cst_69 = arith.constant 2.000000e-01 : f32
    %133 = vector.broadcast %cst_69 : f32 to vector<16x256xf32>
    %134 = arith.mulf %133, %130 : vector<16x256xf32>
    %135 = arith.select %132, %130, %134 : vector<16x256xi1>, vector<16x256xf32>
    %136 = arith.truncf %135 : vector<16x256xf32> to vector<16x256xbf16>
    %c0_i32_70 = arith.constant 0 : i32
    %137 = tpu.memref_slice %arg27[%c0_i32_70] : memref<3x!tpu.dma_semaphore, #tpu.memory_space<semaphore_mem>> -> memref<1x!tpu.dma_semaphore, #tpu.memory_space<semaphore_mem>>
    %138 = tpu.memref_squeeze %137 : memref<1x!tpu.dma_semaphore, #tpu.memory_space<semaphore_mem>> -> memref<!tpu.dma_semaphore, #tpu.memory_space<semaphore_mem>>
    tpu.wait_dma2 semaphore(%138 : memref<!tpu.dma_semaphore, #tpu.memory_space<semaphore_mem>>) src(%arg12 : memref<256x1280xbf16, #tpu.memory_space<any>>) dst(%arg24 : memref<256x1280xbf16, #tpu.memory_space<vmem>>)
    %c0_71 = arith.constant 0 : index
    %c0_72 = arith.constant 0 : index
    %139 = vector.load %arg24[%c0_71, %c0_72] : memref<256x1280xbf16, #tpu.memory_space<vmem>>, vector<256x1280xbf16>
    %cst_73 = arith.constant dense<0.000000e+00> : vector<16x1280xf32>
    %140 = tpu.matmul %136, %139, %cst_73 {dimension_numbers = #tpu.dot_dimension_numbers<[1], [0], [0], [1], [0, 0, 1, 1], [], []>} : vector<16x256xbf16>, vector<256x1280xbf16>, vector<16x1280xf32> -> vector<16x1280xf32>
    %141 = arith.truncf %140 : vector<16x1280xf32> to vector<16x1280xbf16>
    %c0_74 = arith.constant 0 : index
    %c0_75 = arith.constant 0 : index
    %c0_76 = arith.constant 0 : index
    %142 = vector.load %arg11[%c0_74, %c0_75, %c0_76] : memref<5x32x16xbf16, #tpu.memory_space<vmem>>, vector<1x32x16xbf16>
    %143 = vector.shape_cast %142 : vector<1x32x16xbf16> to vector<32x16xbf16>
    %144 = vector.extract_strided_slice %141 {offsets = [0, 0], sizes = [16, 256], strides = [1, 1]} : vector<16x1280xbf16> to vector<16x256xbf16>
    %cst_77 = arith.constant dense<0.000000e+00> : vector<32x256xf32>
    %145 = tpu.matmul %143, %144, %cst_77 {dimension_numbers = #tpu.dot_dimension_numbers<[1], [0], [0], [1], [0, 0, 1, 1], [], []>} : vector<32x16xbf16>, vector<16x256xbf16>, vector<32x256xf32> -> vector<32x256xf32>
    %c1_78 = arith.constant 1 : index
    %c0_79 = arith.constant 0 : index
    %c0_80 = arith.constant 0 : index
    %146 = vector.load %arg11[%c1_78, %c0_79, %c0_80] : memref<5x32x16xbf16, #tpu.memory_space<vmem>>, vector<1x32x16xbf16>
    %147 = vector.shape_cast %146 : vector<1x32x16xbf16> to vector<32x16xbf16>
    %148 = vector.extract_strided_slice %141 {offsets = [0, 256], sizes = [16, 256], strides = [1, 1]} : vector<16x1280xbf16> to vector<16x256xbf16>
    %cst_81 = arith.constant dense<0.000000e+00> : vector<32x256xf32>
    %149 = tpu.matmul %147, %148, %cst_81 {dimension_numbers = #tpu.dot_dimension_numbers<[1], [0], [0], [1], [0, 0, 1, 1], [], []>} : vector<32x16xbf16>, vector<16x256xbf16>, vector<32x256xf32> -> vector<32x256xf32>
    %150 = arith.addf %145, %149 : vector<32x256xf32>
    %c2_82 = arith.constant 2 : index
    %c0_83 = arith.constant 0 : index
    %c0_84 = arith.constant 0 : index
    %151 = vector.load %arg11[%c2_82, %c0_83, %c0_84] : memref<5x32x16xbf16, #tpu.memory_space<vmem>>, vector<1x32x16xbf16>
    %152 = vector.shape_cast %151 : vector<1x32x16xbf16> to vector<32x16xbf16>
    %153 = vector.extract_strided_slice %141 {offsets = [0, 512], sizes = [16, 256], strides = [1, 1]} : vector<16x1280xbf16> to vector<16x256xbf16>
    %cst_85 = arith.constant dense<0.000000e+00> : vector<32x256xf32>
    %154 = tpu.matmul %152, %153, %cst_85 {dimension_numbers = #tpu.dot_dimension_numbers<[1], [0], [0], [1], [0, 0, 1, 1], [], []>} : vector<32x16xbf16>, vector<16x256xbf16>, vector<32x256xf32> -> vector<32x256xf32>
    %155 = arith.addf %150, %154 : vector<32x256xf32>
    %c3_86 = arith.constant 3 : index
    %c0_87 = arith.constant 0 : index
    %c0_88 = arith.constant 0 : index
    %156 = vector.load %arg11[%c3_86, %c0_87, %c0_88] : memref<5x32x16xbf16, #tpu.memory_space<vmem>>, vector<1x32x16xbf16>
    %157 = vector.shape_cast %156 : vector<1x32x16xbf16> to vector<32x16xbf16>
    %158 = vector.extract_strided_slice %141 {offsets = [0, 768], sizes = [16, 256], strides = [1, 1]} : vector<16x1280xbf16> to vector<16x256xbf16>
    %cst_89 = arith.constant dense<0.000000e+00> : vector<32x256xf32>
    %159 = tpu.matmul %157, %158, %cst_89 {dimension_numbers = #tpu.dot_dimension_numbers<[1], [0], [0], [1], [0, 0, 1, 1], [], []>} : vector<32x16xbf16>, vector<16x256xbf16>, vector<32x256xf32> -> vector<32x256xf32>
    %160 = arith.addf %155, %159 : vector<32x256xf32>
    %c4_90 = arith.constant 4 : index
    %c0_91 = arith.constant 0 : index
    %c0_92 = arith.constant 0 : index
    %161 = vector.load %arg11[%c4_90, %c0_91, %c0_92] : memref<5x32x16xbf16, #tpu.memory_space<vmem>>, vector<1x32x16xbf16>
    %162 = vector.shape_cast %161 : vector<1x32x16xbf16> to vector<32x16xbf16>
    %163 = vector.extract_strided_slice %141 {offsets = [0, 1024], sizes = [16, 256], strides = [1, 1]} : vector<16x1280xbf16> to vector<16x256xbf16>
    %cst_93 = arith.constant dense<0.000000e+00> : vector<32x256xf32>
    %164 = tpu.matmul %162, %163, %cst_93 {dimension_numbers = #tpu.dot_dimension_numbers<[1], [0], [0], [1], [0, 0, 1, 1], [], []>} : vector<32x16xbf16>, vector<16x256xbf16>, vector<32x256xf32> -> vector<32x256xf32>
    %165 = arith.addf %160, %164 : vector<32x256xf32>
    %cst_94 = arith.constant dense<0.000000e+00> : vector<256xf32>
    %166 = vector.multi_reduction <add>, %165, %cst_94 [0] : vector<32x256xf32> to vector<256xf32>
    %167 = vector.shape_cast %166 : vector<256xf32> to vector<1x256xf32>
    %168 = arith.mulf %165, %165 : vector<32x256xf32>
    %cst_95 = arith.constant dense<0.000000e+00> : vector<256xf32>
    %169 = vector.multi_reduction <add>, %168, %cst_95 [0] : vector<32x256xf32> to vector<256xf32>
    %170 = vector.shape_cast %169 : vector<256xf32> to vector<1x256xf32>
    %171 = tpu.concatenate %167, %170 in 0 : vector<1x256xf32>, vector<1x256xf32> -> vector<2x256xf32>
    %c0_96 = arith.constant 0 : index
    %c0_97 = arith.constant 0 : index
    %172 = vector.load %arg14[%c0_96, %c0_97] : memref<256x16xf32, #tpu.memory_space<vmem>>, vector<256x16xf32>
    %cst_98 = arith.constant dense<0.000000e+00> : vector<2x16xf32>
    %173 = tpu.matmul %171, %172, %cst_98 {dimension_numbers = #tpu.dot_dimension_numbers<[1], [0], [0], [1], [0, 0, 1, 1], [], []>} : vector<2x256xf32>, vector<256x16xf32>, vector<2x16xf32> -> vector<2x16xf32>
    %cst_99 = arith.constant 0.001953125 : f32
    %174 = vector.broadcast %cst_99 : f32 to vector<2x16xf32>
    %175 = arith.mulf %173, %174 : vector<2x16xf32>
    %176 = vector.extract_strided_slice %175 {offsets = [0, 0], sizes = [1, 16], strides = [1, 1]} : vector<2x16xf32> to vector<1x16xf32>
    %177 = vector.extract_strided_slice %175 {offsets = [1, 0], sizes = [1, 16], strides = [1, 1]} : vector<2x16xf32> to vector<1x16xf32>
    %178 = arith.mulf %176, %176 : vector<1x16xf32>
    %179 = arith.subf %177, %178 : vector<1x16xf32>
    %c0_100 = arith.constant 0 : index
    %c0_101 = arith.constant 0 : index
    %180 = vector.load %arg13[%c0_100, %c0_101] : memref<2x16xf32, #tpu.memory_space<vmem>>, vector<2x16xf32>
    %181 = vector.extract_strided_slice %180 {offsets = [0, 0], sizes = [1, 16], strides = [1, 1]} : vector<2x16xf32> to vector<1x16xf32>
    %cst_102 = arith.constant 9.99999974E-6 : f32
    %182 = vector.broadcast %cst_102 : f32 to vector<1x16xf32>
    %183 = arith.addf %179, %182 : vector<1x16xf32>
    %184 = math.rsqrt %183 : vector<1x16xf32>
    %185 = arith.mulf %181, %184 : vector<1x16xf32>
    %186 = vector.extract_strided_slice %180 {offsets = [1, 0], sizes = [1, 16], strides = [1, 1]} : vector<2x16xf32> to vector<1x16xf32>
    %187 = arith.mulf %176, %185 : vector<1x16xf32>
    %188 = arith.subf %186, %187 : vector<1x16xf32>
    %189 = tpu.concatenate %185, %188 in 0 : vector<1x16xf32>, vector<1x16xf32> -> vector<2x16xf32>
    %c0_103 = arith.constant 0 : index
    %c0_104 = arith.constant 0 : index
    %190 = vector.load %arg15[%c0_103, %c0_104] : memref<16x256xf32, #tpu.memory_space<vmem>>, vector<16x256xf32>
    %cst_105 = arith.constant dense<0.000000e+00> : vector<2x256xf32>
    %191 = tpu.matmul %189, %190, %cst_105 {dimension_numbers = #tpu.dot_dimension_numbers<[1], [0], [0], [1], [0, 0, 1, 1], [], []>} : vector<2x16xf32>, vector<16x256xf32>, vector<2x256xf32> -> vector<2x256xf32>
    %192 = vector.extract_strided_slice %191 {offsets = [0, 0], sizes = [1, 256], strides = [1, 1]} : vector<2x256xf32> to vector<1x256xf32>
    %193 = vector.broadcast %192 : vector<1x256xf32> to vector<32x256xf32>
    %194 = arith.mulf %165, %193 : vector<32x256xf32>
    %195 = vector.extract_strided_slice %191 {offsets = [1, 0], sizes = [1, 256], strides = [1, 1]} : vector<2x256xf32> to vector<1x256xf32>
    %196 = vector.broadcast %195 : vector<1x256xf32> to vector<32x256xf32>
    %197 = arith.addf %194, %196 : vector<32x256xf32>
    %cst_106 = arith.constant 0.000000e+00 : f32
    %198 = vector.broadcast %cst_106 : f32 to vector<32x256xf32>
    %199 = arith.cmpf oge, %197, %198 : vector<32x256xf32>
    %cst_107 = arith.constant 2.000000e-01 : f32
    %200 = vector.broadcast %cst_107 : f32 to vector<32x256xf32>
    %201 = arith.mulf %200, %197 : vector<32x256xf32>
    %202 = arith.select %199, %197, %201 : vector<32x256xi1>, vector<32x256xf32>
    %203 = arith.truncf %202 : vector<32x256xf32> to vector<32x256xbf16>
    %c1_i32_108 = arith.constant 1 : i32
    %204 = tpu.memref_slice %arg27[%c1_i32_108] : memref<3x!tpu.dma_semaphore, #tpu.memory_space<semaphore_mem>> -> memref<1x!tpu.dma_semaphore, #tpu.memory_space<semaphore_mem>>
    %205 = tpu.memref_squeeze %204 : memref<1x!tpu.dma_semaphore, #tpu.memory_space<semaphore_mem>> -> memref<!tpu.dma_semaphore, #tpu.memory_space<semaphore_mem>>
    tpu.wait_dma2 semaphore(%205 : memref<!tpu.dma_semaphore, #tpu.memory_space<semaphore_mem>>) src(%arg17 : memref<256x1280xbf16, #tpu.memory_space<any>>) dst(%arg25 : memref<256x1280xbf16, #tpu.memory_space<vmem>>)
    %c0_109 = arith.constant 0 : index
    %c0_110 = arith.constant 0 : index
    %206 = vector.load %arg25[%c0_109, %c0_110] : memref<256x1280xbf16, #tpu.memory_space<vmem>>, vector<256x1280xbf16>
    %cst_111 = arith.constant dense<0.000000e+00> : vector<32x1280xf32>
    %207 = tpu.matmul %203, %206, %cst_111 {dimension_numbers = #tpu.dot_dimension_numbers<[1], [0], [0], [1], [0, 0, 1, 1], [], []>} : vector<32x256xbf16>, vector<256x1280xbf16>, vector<32x1280xf32> -> vector<32x1280xf32>
    %208 = arith.truncf %207 : vector<32x1280xf32> to vector<32x1280xbf16>
    %c0_112 = arith.constant 0 : index
    %c0_113 = arith.constant 0 : index
    %c0_114 = arith.constant 0 : index
    %209 = vector.load %arg16[%c0_112, %c0_113, %c0_114] : memref<5x64x32xbf16, #tpu.memory_space<vmem>>, vector<1x64x32xbf16>
    %210 = vector.shape_cast %209 : vector<1x64x32xbf16> to vector<64x32xbf16>
    %211 = vector.extract_strided_slice %208 {offsets = [0, 0], sizes = [32, 256], strides = [1, 1]} : vector<32x1280xbf16> to vector<32x256xbf16>
    %cst_115 = arith.constant dense<0.000000e+00> : vector<64x256xf32>
    %212 = tpu.matmul %210, %211, %cst_115 {dimension_numbers = #tpu.dot_dimension_numbers<[1], [0], [0], [1], [0, 0, 1, 1], [], []>} : vector<64x32xbf16>, vector<32x256xbf16>, vector<64x256xf32> -> vector<64x256xf32>
    %c1_116 = arith.constant 1 : index
    %c0_117 = arith.constant 0 : index
    %c0_118 = arith.constant 0 : index
    %213 = vector.load %arg16[%c1_116, %c0_117, %c0_118] : memref<5x64x32xbf16, #tpu.memory_space<vmem>>, vector<1x64x32xbf16>
    %214 = vector.shape_cast %213 : vector<1x64x32xbf16> to vector<64x32xbf16>
    %215 = vector.extract_strided_slice %208 {offsets = [0, 256], sizes = [32, 256], strides = [1, 1]} : vector<32x1280xbf16> to vector<32x256xbf16>
    %cst_119 = arith.constant dense<0.000000e+00> : vector<64x256xf32>
    %216 = tpu.matmul %214, %215, %cst_119 {dimension_numbers = #tpu.dot_dimension_numbers<[1], [0], [0], [1], [0, 0, 1, 1], [], []>} : vector<64x32xbf16>, vector<32x256xbf16>, vector<64x256xf32> -> vector<64x256xf32>
    %217 = arith.addf %212, %216 : vector<64x256xf32>
    %c2_120 = arith.constant 2 : index
    %c0_121 = arith.constant 0 : index
    %c0_122 = arith.constant 0 : index
    %218 = vector.load %arg16[%c2_120, %c0_121, %c0_122] : memref<5x64x32xbf16, #tpu.memory_space<vmem>>, vector<1x64x32xbf16>
    %219 = vector.shape_cast %218 : vector<1x64x32xbf16> to vector<64x32xbf16>
    %220 = vector.extract_strided_slice %208 {offsets = [0, 512], sizes = [32, 256], strides = [1, 1]} : vector<32x1280xbf16> to vector<32x256xbf16>
    %cst_123 = arith.constant dense<0.000000e+00> : vector<64x256xf32>
    %221 = tpu.matmul %219, %220, %cst_123 {dimension_numbers = #tpu.dot_dimension_numbers<[1], [0], [0], [1], [0, 0, 1, 1], [], []>} : vector<64x32xbf16>, vector<32x256xbf16>, vector<64x256xf32> -> vector<64x256xf32>
    %222 = arith.addf %217, %221 : vector<64x256xf32>
    %c3_124 = arith.constant 3 : index
    %c0_125 = arith.constant 0 : index
    %c0_126 = arith.constant 0 : index
    %223 = vector.load %arg16[%c3_124, %c0_125, %c0_126] : memref<5x64x32xbf16, #tpu.memory_space<vmem>>, vector<1x64x32xbf16>
    %224 = vector.shape_cast %223 : vector<1x64x32xbf16> to vector<64x32xbf16>
    %225 = vector.extract_strided_slice %208 {offsets = [0, 768], sizes = [32, 256], strides = [1, 1]} : vector<32x1280xbf16> to vector<32x256xbf16>
    %cst_127 = arith.constant dense<0.000000e+00> : vector<64x256xf32>
    %226 = tpu.matmul %224, %225, %cst_127 {dimension_numbers = #tpu.dot_dimension_numbers<[1], [0], [0], [1], [0, 0, 1, 1], [], []>} : vector<64x32xbf16>, vector<32x256xbf16>, vector<64x256xf32> -> vector<64x256xf32>
    %227 = arith.addf %222, %226 : vector<64x256xf32>
    %c4_128 = arith.constant 4 : index
    %c0_129 = arith.constant 0 : index
    %c0_130 = arith.constant 0 : index
    %228 = vector.load %arg16[%c4_128, %c0_129, %c0_130] : memref<5x64x32xbf16, #tpu.memory_space<vmem>>, vector<1x64x32xbf16>
    %229 = vector.shape_cast %228 : vector<1x64x32xbf16> to vector<64x32xbf16>
    %230 = vector.extract_strided_slice %208 {offsets = [0, 1024], sizes = [32, 256], strides = [1, 1]} : vector<32x1280xbf16> to vector<32x256xbf16>
    %cst_131 = arith.constant dense<0.000000e+00> : vector<64x256xf32>
    %231 = tpu.matmul %229, %230, %cst_131 {dimension_numbers = #tpu.dot_dimension_numbers<[1], [0], [0], [1], [0, 0, 1, 1], [], []>} : vector<64x32xbf16>, vector<32x256xbf16>, vector<64x256xf32> -> vector<64x256xf32>
    %232 = arith.addf %227, %231 : vector<64x256xf32>
    %cst_132 = arith.constant dense<0.000000e+00> : vector<256xf32>
    %233 = vector.multi_reduction <add>, %232, %cst_132 [0] : vector<64x256xf32> to vector<256xf32>
    %234 = vector.shape_cast %233 : vector<256xf32> to vector<1x256xf32>
    %235 = arith.mulf %232, %232 : vector<64x256xf32>
    %cst_133 = arith.constant dense<0.000000e+00> : vector<256xf32>
    %236 = vector.multi_reduction <add>, %235, %cst_133 [0] : vector<64x256xf32> to vector<256xf32>
    %237 = vector.shape_cast %236 : vector<256xf32> to vector<1x256xf32>
    %238 = tpu.concatenate %234, %237 in 0 : vector<1x256xf32>, vector<1x256xf32> -> vector<2x256xf32>
    %c0_134 = arith.constant 0 : index
    %c0_135 = arith.constant 0 : index
    %239 = vector.load %arg19[%c0_134, %c0_135] : memref<256x8xf32, #tpu.memory_space<vmem>>, vector<256x8xf32>
    %cst_136 = arith.constant dense<0.000000e+00> : vector<2x8xf32>
    %240 = tpu.matmul %238, %239, %cst_136 {dimension_numbers = #tpu.dot_dimension_numbers<[1], [0], [0], [1], [0, 0, 1, 1], [], []>} : vector<2x256xf32>, vector<256x8xf32>, vector<2x8xf32> -> vector<2x8xf32>
    %cst_137 = arith.constant 4.8828125E-4 : f32
    %241 = vector.broadcast %cst_137 : f32 to vector<2x8xf32>
    %242 = arith.mulf %240, %241 : vector<2x8xf32>
    %243 = vector.extract_strided_slice %242 {offsets = [0, 0], sizes = [1, 8], strides = [1, 1]} : vector<2x8xf32> to vector<1x8xf32>
    %244 = vector.extract_strided_slice %242 {offsets = [1, 0], sizes = [1, 8], strides = [1, 1]} : vector<2x8xf32> to vector<1x8xf32>
    %245 = arith.mulf %243, %243 : vector<1x8xf32>
    %246 = arith.subf %244, %245 : vector<1x8xf32>
    %c0_138 = arith.constant 0 : index
    %c0_139 = arith.constant 0 : index
    %247 = vector.load %arg18[%c0_138, %c0_139] : memref<2x8xf32, #tpu.memory_space<vmem>>, vector<2x8xf32>
    %248 = vector.extract_strided_slice %247 {offsets = [0, 0], sizes = [1, 8], strides = [1, 1]} : vector<2x8xf32> to vector<1x8xf32>
    %cst_140 = arith.constant 9.99999974E-6 : f32
    %249 = vector.broadcast %cst_140 : f32 to vector<1x8xf32>
    %250 = arith.addf %246, %249 : vector<1x8xf32>
    %251 = math.rsqrt %250 : vector<1x8xf32>
    %252 = arith.mulf %248, %251 : vector<1x8xf32>
    %253 = vector.extract_strided_slice %247 {offsets = [1, 0], sizes = [1, 8], strides = [1, 1]} : vector<2x8xf32> to vector<1x8xf32>
    %254 = arith.mulf %243, %252 : vector<1x8xf32>
    %255 = arith.subf %253, %254 : vector<1x8xf32>
    %256 = tpu.concatenate %252, %255 in 0 : vector<1x8xf32>, vector<1x8xf32> -> vector<2x8xf32>
    %c0_141 = arith.constant 0 : index
    %c0_142 = arith.constant 0 : index
    %257 = vector.load %arg20[%c0_141, %c0_142] : memref<8x256xf32, #tpu.memory_space<vmem>>, vector<8x256xf32>
    %cst_143 = arith.constant dense<0.000000e+00> : vector<2x256xf32>
    %258 = tpu.matmul %256, %257, %cst_143 {dimension_numbers = #tpu.dot_dimension_numbers<[1], [0], [0], [1], [0, 0, 1, 1], [], []>} : vector<2x8xf32>, vector<8x256xf32>, vector<2x256xf32> -> vector<2x256xf32>
    %259 = vector.extract_strided_slice %258 {offsets = [0, 0], sizes = [1, 256], strides = [1, 1]} : vector<2x256xf32> to vector<1x256xf32>
    %260 = vector.broadcast %259 : vector<1x256xf32> to vector<64x256xf32>
    %261 = arith.mulf %232, %260 : vector<64x256xf32>
    %262 = vector.extract_strided_slice %258 {offsets = [1, 0], sizes = [1, 256], strides = [1, 1]} : vector<2x256xf32> to vector<1x256xf32>
    %263 = vector.broadcast %262 : vector<1x256xf32> to vector<64x256xf32>
    %264 = arith.addf %261, %263 : vector<64x256xf32>
    %cst_144 = arith.constant 0.000000e+00 : f32
    %265 = vector.broadcast %cst_144 : f32 to vector<64x256xf32>
    %266 = arith.cmpf oge, %264, %265 : vector<64x256xf32>
    %cst_145 = arith.constant 2.000000e-01 : f32
    %267 = vector.broadcast %cst_145 : f32 to vector<64x256xf32>
    %268 = arith.mulf %267, %264 : vector<64x256xf32>
    %269 = arith.select %266, %264, %268 : vector<64x256xi1>, vector<64x256xf32>
    %270 = arith.truncf %269 : vector<64x256xf32> to vector<64x256xbf16>
    %c2_i32_146 = arith.constant 2 : i32
    %271 = tpu.memref_slice %arg27[%c2_i32_146] : memref<3x!tpu.dma_semaphore, #tpu.memory_space<semaphore_mem>> -> memref<1x!tpu.dma_semaphore, #tpu.memory_space<semaphore_mem>>
    %272 = tpu.memref_squeeze %271 : memref<1x!tpu.dma_semaphore, #tpu.memory_space<semaphore_mem>> -> memref<!tpu.dma_semaphore, #tpu.memory_space<semaphore_mem>>
    tpu.wait_dma2 semaphore(%272 : memref<!tpu.dma_semaphore, #tpu.memory_space<semaphore_mem>>) src(%arg22 : memref<256x1280xbf16, #tpu.memory_space<any>>) dst(%arg26 : memref<256x1280xbf16, #tpu.memory_space<vmem>>)
    %c0_147 = arith.constant 0 : index
    %c0_148 = arith.constant 0 : index
    %273 = vector.load %arg26[%c0_147, %c0_148] : memref<256x1280xbf16, #tpu.memory_space<vmem>>, vector<256x1280xbf16>
    %cst_149 = arith.constant dense<0.000000e+00> : vector<64x1280xf32>
    %274 = tpu.matmul %270, %273, %cst_149 {dimension_numbers = #tpu.dot_dimension_numbers<[1], [0], [0], [1], [0, 0, 1, 1], [], []>} : vector<64x256xbf16>, vector<256x1280xbf16>, vector<64x1280xf32> -> vector<64x1280xf32>
    %275 = arith.truncf %274 : vector<64x1280xf32> to vector<64x1280xbf16>
    %c0_150 = arith.constant 0 : index
    %c0_151 = arith.constant 0 : index
    %c0_152 = arith.constant 0 : index
    %276 = vector.load %arg21[%c0_150, %c0_151, %c0_152] : memref<5x128x64xbf16, #tpu.memory_space<vmem>>, vector<1x128x64xbf16>
    %277 = vector.shape_cast %276 : vector<1x128x64xbf16> to vector<128x64xbf16>
    %278 = vector.extract_strided_slice %275 {offsets = [0, 0], sizes = [64, 256], strides = [1, 1]} : vector<64x1280xbf16> to vector<64x256xbf16>
    %cst_153 = arith.constant dense<0.000000e+00> : vector<128x256xf32>
    %279 = tpu.matmul %277, %278, %cst_153 {dimension_numbers = #tpu.dot_dimension_numbers<[1], [0], [0], [1], [0, 0, 1, 1], [], []>} : vector<128x64xbf16>, vector<64x256xbf16>, vector<128x256xf32> -> vector<128x256xf32>
    %c1_154 = arith.constant 1 : index
    %c0_155 = arith.constant 0 : index
    %c0_156 = arith.constant 0 : index
    %280 = vector.load %arg21[%c1_154, %c0_155, %c0_156] : memref<5x128x64xbf16, #tpu.memory_space<vmem>>, vector<1x128x64xbf16>
    %281 = vector.shape_cast %280 : vector<1x128x64xbf16> to vector<128x64xbf16>
    %282 = vector.extract_strided_slice %275 {offsets = [0, 256], sizes = [64, 256], strides = [1, 1]} : vector<64x1280xbf16> to vector<64x256xbf16>
    %cst_157 = arith.constant dense<0.000000e+00> : vector<128x256xf32>
    %283 = tpu.matmul %281, %282, %cst_157 {dimension_numbers = #tpu.dot_dimension_numbers<[1], [0], [0], [1], [0, 0, 1, 1], [], []>} : vector<128x64xbf16>, vector<64x256xbf16>, vector<128x256xf32> -> vector<128x256xf32>
    %284 = arith.addf %279, %283 : vector<128x256xf32>
    %c2_158 = arith.constant 2 : index
    %c0_159 = arith.constant 0 : index
    %c0_160 = arith.constant 0 : index
    %285 = vector.load %arg21[%c2_158, %c0_159, %c0_160] : memref<5x128x64xbf16, #tpu.memory_space<vmem>>, vector<1x128x64xbf16>
    %286 = vector.shape_cast %285 : vector<1x128x64xbf16> to vector<128x64xbf16>
    %287 = vector.extract_strided_slice %275 {offsets = [0, 512], sizes = [64, 256], strides = [1, 1]} : vector<64x1280xbf16> to vector<64x256xbf16>
    %cst_161 = arith.constant dense<0.000000e+00> : vector<128x256xf32>
    %288 = tpu.matmul %286, %287, %cst_161 {dimension_numbers = #tpu.dot_dimension_numbers<[1], [0], [0], [1], [0, 0, 1, 1], [], []>} : vector<128x64xbf16>, vector<64x256xbf16>, vector<128x256xf32> -> vector<128x256xf32>
    %289 = arith.addf %284, %288 : vector<128x256xf32>
    %c3_162 = arith.constant 3 : index
    %c0_163 = arith.constant 0 : index
    %c0_164 = arith.constant 0 : index
    %290 = vector.load %arg21[%c3_162, %c0_163, %c0_164] : memref<5x128x64xbf16, #tpu.memory_space<vmem>>, vector<1x128x64xbf16>
    %291 = vector.shape_cast %290 : vector<1x128x64xbf16> to vector<128x64xbf16>
    %292 = vector.extract_strided_slice %275 {offsets = [0, 768], sizes = [64, 256], strides = [1, 1]} : vector<64x1280xbf16> to vector<64x256xbf16>
    %cst_165 = arith.constant dense<0.000000e+00> : vector<128x256xf32>
    %293 = tpu.matmul %291, %292, %cst_165 {dimension_numbers = #tpu.dot_dimension_numbers<[1], [0], [0], [1], [0, 0, 1, 1], [], []>} : vector<128x64xbf16>, vector<64x256xbf16>, vector<128x256xf32> -> vector<128x256xf32>
    %294 = arith.addf %289, %293 : vector<128x256xf32>
    %c4_166 = arith.constant 4 : index
    %c0_167 = arith.constant 0 : index
    %c0_168 = arith.constant 0 : index
    %295 = vector.load %arg21[%c4_166, %c0_167, %c0_168] : memref<5x128x64xbf16, #tpu.memory_space<vmem>>, vector<1x128x64xbf16>
    %296 = vector.shape_cast %295 : vector<1x128x64xbf16> to vector<128x64xbf16>
    %297 = vector.extract_strided_slice %275 {offsets = [0, 1024], sizes = [64, 256], strides = [1, 1]} : vector<64x1280xbf16> to vector<64x256xbf16>
    %cst_169 = arith.constant dense<0.000000e+00> : vector<128x256xf32>
    %298 = tpu.matmul %296, %297, %cst_169 {dimension_numbers = #tpu.dot_dimension_numbers<[1], [0], [0], [1], [0, 0, 1, 1], [], []>} : vector<128x64xbf16>, vector<64x256xbf16>, vector<128x256xf32> -> vector<128x256xf32>
    %299 = arith.addf %294, %298 : vector<128x256xf32>
    %300 = math.tanh %299 : vector<128x256xf32>
    %c0_170 = arith.constant 0 : index
    %c0_171 = arith.constant 0 : index
    %301 = vector.load %arg23[%c0_170, %c0_171] : memref<128x256xf32, #tpu.memory_space<vmem>>, vector<128x256xf32>
    tpu.vector_store %arg23[%c0_170, %c0_171], %300 {strides = array<i32>} : memref<128x256xf32, #tpu.memory_space<vmem>>, vector<128x256xf32>,
    return
  }
}

</mosaic_0001>

<bundles_post_ra>
// kernel: generator_forward.1
= control target key start
LH: loop header
LB: loop body
LE: loop exit
PB: predicated region body
PF: predicated region fallthrough
CT: control target
= control target key end

     0   :  { %s10636_s0 = inlined_call_operand.vmem [shape: bf16[2,16], index: 0, kind: input, shape index: {}]   ;;  %s10637_s1 = inlined_call_operand.vmem [shape: bf16[5,8,2], index: 1, kind: input, shape index: {}]   ;;  %s10638_s2 = inlined_call_operand.vmem [shape: bf16[16,1280], index: 2, kind: input, shape index: {}]   ;;  %s10639_s3 = inlined_call_operand.vmem [shape: f32[2,64], index: 3, kind: input, shape index: {}]   ;;  %s10640_s4 = inlined_call_operand.vmem [shape: f32[256,64], index: 4, kind: input, shape index: {}]   ;;  %s10641_s5 = inlined_call_operand.vmem [shape: f32[64,256], index: 5, kind: input, shape index: {}]   ;;  %s10642_s6 = inlined_call_operand.vmem [shape: bf16[5,16,8], index: 6, kind: input, shape index: {}]   ;;  %s10643_s7 = inlined_call_operand.vmem [shape: bf16[256,1280], index: 7, kind: input, shape index: {}]   ;;  %s10644_s8 = inlined_call_operand.vmem [shape: f32[2,32], index: 8, kind: input, shape index: {}]   ;;  %s10645_s9 = inlined_call_operand.vmem [shape: f32[256,32], index: 9, kind: input, shape index: {}]   ;;  %s10646_s10 = inlined_call_operand.vmem [shape: f32[32,256], index: 10, kind: input, shape index: {}]   ;;  %s10647_s11 = inlined_call_operand.vmem [shape: bf16[5,32,16], index: 11, kind: input, shape index: {}]   ;;  %s10648_s12 = inlined_call_operand.hbm [shape: bf16[256,1280], index: 12, kind: input, shape index: {}]   ;;  %s10649_s13 = inlined_call_operand.vmem [shape: f32[2,16], index: 13, kind: input, shape index: {}]   ;;  %s10650_s14 = inlined_call_operand.vmem [shape: f32[256,16], index: 14, kind: input, shape index: {}]   ;;  %s10651_s15 = inlined_call_operand.vmem [shape: f32[16,256], index: 15, kind: input, shape index: {}]   ;;  %s10652_s16 = inlined_call_operand.vmem [shape: bf16[5,64,32], index: 16, kind: input, shape index: {}]   ;;  %s10653_s17 = inlined_call_operand.hbm [shape: bf16[256,1280], index: 17, kind: input, shape index: {}]   ;;  %s10654_s18 = inlined_call_operand.vmem [shape: f32[2,8], index: 18, kind: input, shape index: {}]   ;;  %s10655_s19 = inlined_call_operand.vmem [shape: f32[256,8], index: 19, kind: input, shape index: {}]   ;;  %s10656_s20 = inlined_call_operand.vmem [shape: f32[8,256], index: 20, kind: input, shape index: {}]   ;;  %s10657_s21 = inlined_call_operand.vmem [shape: bf16[5,128,64], index: 21, kind: input, shape index: {}]   ;;  %s10658_s22 = inlined_call_operand.hbm [shape: bf16[256,1280], index: 22, kind: input, shape index: {}]   ;;  %s10659_s23 = inlined_call_operand.vmem [shape: f32[128,256], index: 23, kind: output, shape index: {}]  }
   0x1   :  { %10666 = sst [smem:[#allocation15_spill]] %s10636_s0 }
   0x2   :  { %10667 = sst [smem:[#allocation16_spill]] %s10637_s1 }
   0x3   :  { %10668 = sst [smem:[#allocation17_spill]] %s10638_s2 }
   0x4   :  { %10669 = sst [smem:[#allocation18_spill]] %s10639_s3 }
   0x5   :  { %10670 = sst [smem:[#allocation19_spill]] %s10640_s4 }
   0x6   :  { %10671 = sst [smem:[#allocation20_spill]] %s10641_s5 }
   0x7   :  { %10672 = sst [smem:[#allocation21_spill]] %s10642_s6 }
   0x8   :  { %10673 = sst [smem:[#allocation22_spill]] %s10643_s7 }
   0x9   :  { %s73_s4 = sld [smem:[#allocation0]]   ;;  %s8450_s30 = smov [#allocation2]   ;;  %v8451_v0 = vmov 0   ;;  %vm235_vm0 = vcmask 130048   ;;  %vm461_vm1 = vcmask 1040384   ;;  %vm457_vm2 = vcmask 15360  }
   0xa   :  { %s8588_s24 = sshll.u32 %s8450_s30, 4  ;;  %312 = vmatprep.mubr.bf16.mxu1 %v8451_v0  ;;  %271 = vmatprep.mubr.bf16.mxu0 %v8451_v0  ;;  %s8452_s25 = smov 1280   ;;  %vm886_vm3 = vcmask 523264   ;;  %vm2178_vm6 = vcmask 1043456   ;;  %vm2174_vm7 = vcmask 64512   ;;  %vm2640_vm8 = vcmask 261120   ;;  %s82_s24 = int_to_ptr.vmem [resolvable:$true] %s8588_s24 }
   0xb   :  { %85 = sst [smem:[#allocation7]] %s8452_s25  ;;  %s8453_s5 = smov 10  }
   0xc   :  { %87 = sst [smem:[#allocation7 + $0x1]] %s8452_s25  ;;  %s8454_s1 = smov 64  }
   0xd   :  { %89 = sst [smem:[#allocation7 + $0x2]] %s8453_s5  ;;  %s8455_s2 = smov 128  }
   0xe   :  { %91 = sst [smem:[#allocation7 + $0x3]] %s8454_s1  ;;  %s8456_s27 = smov 2  }
   0xf   :  { %s6995_s26 = sshll.u32 %s73_s4, 26  ;;  %93 = sst [smem:[#allocation7 + $0x4]] %s8455_s2 }
  0x10   :  { %s8598_s6 = sadd.s32 134217728, %s6995_s26  ;;  %95 = sst [smem:[#allocation7 + $0x5]] %s8456_s27 }
  0x11   :  { %s8457_s7 = smov 640   ;;  %99 = sst [smem:[#allocation7 + $0x7]] %s8454_s1 }
  0x12   :  { %97 = sst [smem:[#allocation7 + $0x6]] %s8457_s7  ;;  %s8458_s28 = smov 4  }
  0x13   :  { %101 = sst [smem:[#allocation7 + $0x8]] %s8458_s28  ;;  %s8459_s29 = smov [#allocation5]  }
  0x14   :  { %s8460_s3 = smov [#allocation6]   ;;  %s8461_s30 = smov [#allocation3]  }
  0x15   :  { %103 = dma.general %s10648_s12, 20480, %s82_s24, %s8459_s29, %s8460_s3, [#allocation7], %s8598_s6, 0  }
  0x16   :  { %120 = sst [smem:[#allocation9]] %s8452_s25  ;;  %s116_s26 = sshll.u32 %s8461_s30, 4  ;;  %s117_s26 = int_to_ptr.vmem [resolvable:$true] %s116_s26 }
  0x17   :  { %122 = sst [smem:[#allocation9 + $0x1]] %s8452_s25  ;;  %s8462_s12 = smov [#allocation5 + $0x1]  }
  0x18   :  { %124 = sst [smem:[#allocation9 + $0x2]] %s8453_s5  ;;  %s8463_s24 = smov [#allocation8]  }
  0x19   :  { %126 = sst [smem:[#allocation9 + $0x3]] %s8454_s1  ;;  %s8464_s0 = smov [#allocation4]  }
  0x1a   :  { %128 = sst [smem:[#allocation9 + $0x4]] %s8455_s2  ;;  %s151_s4 = sshll.u32 %s8464_s0, 4  ;;  %s152_s4 = int_to_ptr.vmem [resolvable:$true] %s151_s4 }
  0x1b   :  { %130 = sst [smem:[#allocation9 + $0x5]] %s8456_s27  ;;  %s8466_s30 = smov [#allocation10]  }
  0x1c   :  { %132 = sst [smem:[#allocation9 + $0x6]] %s8457_s7 }
  0x1d   :  { %134 = sst [smem:[#allocation9 + $0x7]] %s8454_s1 }
  0x1e   :  { %136 = sst [smem:[#allocation9 + $0x8]] %s8458_s28 }
  0x1f   :  { %138 = dma.general %s10653_s17, 20480, %s117_s26, %s8462_s12, %s8463_s24, [#allocation9], %s8598_s6, 0  }
  0x20   :  { %155 = sst [smem:[#allocation11]] %s8452_s25  ;;  %s8465_s17 = smov [#allocation5 + $0x2]  }
  0x21   :  { %157 = sst [smem:[#allocation11 + $0x1]] %s8452_s25 }
  0x22   :  { %159 = sst [smem:[#allocation11 + $0x2]] %s8453_s5 }
  0x23   :  { %161 = sst [smem:[#allocation11 + $0x3]] %s8454_s1 }
  0x24   :  { %163 = sst [smem:[#allocation11 + $0x4]] %s8455_s2 }
  0x25   :  { %165 = sst [smem:[#allocation11 + $0x5]] %s8456_s27 }
  0x26   :  { %167 = sst [smem:[#allocation11 + $0x6]] %s8457_s7 }
  0x27   :  { %169 = sst [smem:[#allocation11 + $0x7]] %s8454_s1 }
  0x28   :  { %171 = sst [smem:[#allocation11 + $0x8]] %s8458_s28 }
  0x29   :  { %173 = dma.general %s10658_s22, 20480, %s152_s4, %s8465_s17, %s8466_s30, [#allocation11], %s8598_s6, 0  }
  0x2a   :  { %s10674_s24 = sld [smem:[#allocation17_spill]]  ;;  %s10675_s3 = sld [smem:[#allocation15_spill]] }
  0x2b   :  { %s10676_s28 = sld [smem:[#allocation19_spill]]  ;;  %s10678_s17 = sld [smem:[#allocation20_spill]] }
  0x2c   :  { %s10680_s5 = sld [smem:[#allocation18_spill]]  ;;  %s10681_s6 = sld [smem:[#allocation21_spill]] }
  0x30   :  { %v8042_v1 = vld [vmem:[%s10674_s24 + $0xc] ss:$40 sps:$4 sm:$0xff]   ;;  %v8044_v2 = vld [vmem:[%s10674_s24 + $0x8] ss:$40 sps:$4 sm:$0xff]   ;;  %v174_v3 = vld [vmem:[%s10675_s3] sm:$0x1] }
  0x31   :  { %280 = vmatprep.subr.bf16.mxu1 %v8042_v1  ;;  %v8045_v4 = vld [vmem:[%s10674_s24 + $0x4] ss:$40 sps:$4 sm:$0xff]   ;;  %v8047_v5 = vld [vmem:[%s10674_s24] ss:$40 sps:$4 sm:$0xff]   ;;  %v8048_v6 = vld [vmem:[%s10674_s24 + $0x10] ss:$40 sps:$4 sm:$0xff]  }
  0x32   :  { %281 = vmatpush1.bf16.msra.mxu1 %v8044_v2  ;;  %239 = vmatprep.subr.bf16.mxu0 %v8045_v4  ;;  %v8050_v7 = vld [vmem:[%s10674_s24 + $0x14] ss:$40 sps:$4 sm:$0xff]   ;;  %v8051_v8 = vld [vmem:[%s10674_s24 + $0x18] ss:$40 sps:$4 sm:$0xff]   ;;  %v8056_v10 = vld [vmem:[%s10674_s24 + $0x24] ss:$40 sps:$4 sm:$0xff]  }
  0x33   :  { %240 = vmatpush1.bf16.msra.mxu0 %v8047_v5  ;;  %v8053_v9 = vld [vmem:[%s10674_s24 + $0x1c] ss:$40 sps:$4 sm:$0xff]   ;;  %v8054_v11 = vld [vmem:[%s10674_s24 + $0x20] ss:$40 sps:$4 sm:$0xff]   ;;  %v767_v17 = vld [vmem:[%s10676_s28 + $0x90] sm:$0xff]  ;;  %s10677_s3 = sld [smem:[#allocation16_spill]] }
  0x34   :  { %321 = vmatprep.subr.bf16.mxu0 %v8050_v7  ;;  %362 = vmatprep.subr.bf16.mxu1 %v8053_v9  ;;  %v765_v12 = vld [vmem:[%s10676_s28 + $0x80] sm:$0xff]  ;;  %v766_v13 = vld [vmem:[%s10676_s28 + $0x88] sm:$0xff]  ;;  %v768_v18 = vld [vmem:[%s10676_s28 + $0x98] sm:$0xff] }
  0x35   :  { %7012 = vmatmul.mubr.msk.bf16.vlgmr.msra.gmra.mrb[0].mxu1 %vm235_vm0, %v174_v3  ;;  %v749_v14 = vld [vmem:[%s10676_s28] sm:$0xff]  ;;  %v7612_v15 = vpack.c.bf16 %v766_v13, %v765_v12  ;;  %v750_v16 = vld [vmem:[%s10676_s28 + $0x8] sm:$0xff]  ;;  %v7616_v20 = vpack.c.bf16 %v768_v18, %v767_v17  ;;  %v751_v21 = vld [vmem:[%s10676_s28 + $0x10] sm:$0xff] }
  0x36   :  { %394 = vmatprep.mubr.bf16.mxu1 %v8451_v0  ;;  %7011 = vmatmul.mubr.msk.bf16.vlgmr.msra.gmra.mrb[0].mxu0 %vm235_vm0, %v174_v3  ;;  %v7614_v19 = vpack.c.bf16 %v750_v16, %v749_v14  ;;  %v752_v22 = vld [vmem:[%s10676_s28 + $0x18] sm:$0xff]  ;;  %v769_v23 = vld [vmem:[%s10676_s28 + $0xa0] sm:$0xff]  ;;  %v770_v24 = vld [vmem:[%s10676_s28 + $0xa8] sm:$0xff] }
  0x37   :  { %363 = vmatpush1.bf16.msra.mxu1 %v8051_v8  ;;  %322 = vmatpush1.bf16.msra.mxu0 %v8048_v6  ;;  %v7618_v25 = vpack.c.bf16 %v752_v22, %v751_v21  ;;  %v7620_v26 = vpack.c.bf16 %v770_v24, %v769_v23  ;;  %v753_v27 = vld [vmem:[%s10676_s28 + $0x20] sm:$0xff]  ;;  %v754_v28 = vld [vmem:[%s10676_s28 + $0x28] sm:$0xff]  ;;  %v771_v29 = vld [vmem:[%s10676_s28 + $0xb0] sm:$0xff] }
  0x38   :  { %353 = vmatprep.mubr.bf16.mxu0 %v8451_v0  ;;  %403 = vmatprep.subr.bf16.mxu0 %v8056_v10  ;;  %v772_v30 = vld [vmem:[%s10676_s28 + $0xb8] sm:$0xff]  ;;  %v7622_v31 = vpack.c.bf16 %v754_v28, %v753_v27  ;;  %v755_v33 = vld [vmem:[%s10676_s28 + $0x30] sm:$0xff]  ;;  %v773_v13 = vld [vmem:[%s10676_s28 + $0xc0] sm:$0xff] }
  0x39   :  { %v7624_v32 = vpack.c.bf16 %v772_v30, %v771_v29  ;;  %v756_v34 = vld [vmem:[%s10676_s28 + $0x38] sm:$0xff]  ;;  %v7016_v48 = vld [vmem:[%s10677_s3 + $0x4] sm:$0xf]  ;;  %v454_v61 = vld [vmem:[%s10677_s3] sm:$0xf] }
  0x3a   :  { %v7626_v35 = vpack.c.bf16 %v756_v34, %v755_v33  ;;  %v7021_v6 = vld [vmem:[%s10677_s3 + $0x8] sm:$0xf]  ;;  %v7024_v10 = vld [vmem:[%s10677_s3 + $0xc] sm:$0xf]  ;;  %v7027_v12 = vld [vmem:[%s10677_s3 + $0x10] sm:$0xf] }
  0x3b   :  { %v774_v14 = vld [vmem:[%s10676_s28 + $0xc8] sm:$0xff]  ;;  %v757_v16 = vld [vmem:[%s10676_s28 + $0x40] sm:$0xff]  ;;  %v759_v22 = vld [vmem:[%s10676_s28 + $0x50] sm:$0xff] }
  0x3c   :  { %v758_v17 = vld [vmem:[%s10676_s28 + $0x48] sm:$0xff]  ;;  %v760_v23 = vld [vmem:[%s10676_s28 + $0x58] sm:$0xff]  ;;  %v761_v28 = vld [vmem:[%s10676_s28 + $0x60] sm:$0xff] }
  0x3d   :  { %7014 = vmatmul.mubr.msk.bf16.vlgmr.msra.gmra.mrb[4].mxu1 %vm235_vm0, %v174_v3  ;;  %v7630_v18 = vpack.c.bf16 %v758_v17, %v757_v16  ;;  %v7634_v24 = vpack.c.bf16 %v760_v23, %v759_v22  ;;  %v762_v29 = vld [vmem:[%s10676_s28 + $0x68] sm:$0xff]  ;;  %v763_v33 = vld [vmem:[%s10676_s28 + $0x70] sm:$0xff] }
  0x3e   :  { %500 = vmatprep.mubr.bf16.mxu1 %v8451_v0  ;;  %7013 = vmatmul.mubr.msk.bf16.vlgmr.msra.gmra.mrb[4].mxu0 %vm235_vm0, %v174_v3  ;;  %v7638_v30 = vpack.c.bf16 %v762_v29, %v761_v28  ;;  %v876_v16 = vld [vmem:[%s10678_s17 + $0x30] sm:$0xff] }
  0x3f   :  { %404 = vmatpush1.bf16.msra.mxu0 %v8054_v11  ;;  %435 = vmatprep.mubr.bf16.mxu0 %v8451_v0  ;;  %v880_v22 = vld [vmem:[%s10678_s17 + $0x50] sm:$0xff] }
  0x40   :  { %7613 = vmatprep.subr.bf16.mxu0 %v7612_v15  ;;  %v7628_v15 = vpack.c.bf16 %v774_v14, %v773_v13  ;;  %v877_v13 = vld [vmem:[%s10678_s17 + $0x38] sm:$0xff]  ;;  %v884_v28 = vld [vmem:[%s10678_s17 + $0x70] sm:$0xff] }
  0x46   :  { %7015 = vmatmul.mubr.msk.bf16.vlgmr.msra.gmra.mrb[8].mxu0 %vm235_vm0, %v174_v3 }
  0x47   :  { %7615 = vmatpush3.bf16.msra.mxu0 %v7614_v19  ;;  %v775_v19 = vld [vmem:[%s10676_s28 + $0xd0] sm:$0xff] }
  0x48   :  { %7617 = vmatprep.subr.bf16.mxu0 %v7616_v20  ;;  %v776_v20 = vld [vmem:[%s10676_s28 + $0xd8] sm:$0xff] }
  0x49   :  { %v7632_v21 = vpack.c.bf16 %v776_v20, %v775_v19  ;;  %v881_v19 = vld [vmem:[%s10678_s17 + $0x58] sm:$0xff] }
  0x4b   :  { %7619 = vmatpush3.bf16.msra.mxu0 %v7618_v25  ;;  %v777_v25 = vld [vmem:[%s10676_s28 + $0xe0] sm:$0xff] }
  0x4c   :  { %7621 = vmatprep.subr.bf16.mxu0 %v7620_v26  ;;  %v778_v26 = vld [vmem:[%s10676_s28 + $0xe8] sm:$0xff] }
  0x4d   :  { %v7636_v27 = vpack.c.bf16 %v778_v26, %v777_v25  ;;  %v885_v25 = vld [vmem:[%s10678_s17 + $0x78] sm:$0xff] }
  0x4f   :  { %7623 = vmatpush3.bf16.msra.mxu0 %v7622_v31  ;;  %v779_v31 = vld [vmem:[%s10676_s28 + $0xf0] sm:$0xff] }
  0x50   :  { %7625 = vmatprep.subr.bf16.mxu0 %v7624_v32  ;;  %v780_v32 = vld [vmem:[%s10676_s28 + $0xf8] sm:$0xff] }
  0x51   :  { %v7640_v34 = vpack.c.bf16 %v780_v32, %v779_v31 }
  0x53   :  { %7627 = vmatpush3.bf16.msra.mxu0 %v7626_v35  ;;  %v764_v35 = vld [vmem:[%s10676_s28 + $0x78] sm:$0xff]  ;;  %s10679_s28 = sld [smem:[#allocation22_spill]] }
  0x54   :  { %7629 = vmatprep.subr.bf16.mxu0 %v7628_v15  ;;  %v874_v15 = vld [vmem:[%s10678_s17 + $0x20] sm:$0xff] }
  0x55   :  { %v7650_v17 = vpack.c.bf16 %v876_v16, %v874_v15 }
  0x57   :  { %7631 = vmatpush3.bf16.msra.mxu0 %v7630_v18  ;;  %v879_v18 = vld [vmem:[%s10678_s17 + $0x48] sm:$0xff] }
  0x58   :  { %7633 = vmatprep.subr.bf16.mxu0 %v7632_v21  ;;  %v7652_v20 = vpack.c.bf16 %v881_v19, %v879_v18  ;;  %v878_v21 = vld [vmem:[%s10678_s17 + $0x40] sm:$0xff] }
  0x59   :  { %v7654_v23 = vpack.c.bf16 %v880_v22, %v878_v21  ;;  %v8059_v31 = vld [vmem:[%s10679_s28 + $0x4] ss:$40 sps:$4 sm:$0xff]   ;;  %v8060_v32 = vld [vmem:[%s10679_s28 + $0x20] ss:$40 sps:$4 sm:$0xff]   ;;  %v8063_v15 = vld [vmem:[%s10679_s28 + $0x50] ss:$40 sps:$4 sm:$0xff]  }
  0x5a   :  { %v8071_v16 = vld [vmem:[%s10679_s28 + $0xa4] ss:$40 sps:$4 sm:$0xff]   ;;  %v8077_v18 = vld [vmem:[%s10679_s28 + $0xf4] ss:$40 sps:$4 sm:$0xff]   ;;  %v8075_v19 = vld [vmem:[%s10679_s28 + $0xf0] ss:$40 sps:$4 sm:$0xff]  }
  0x5b   :  { %7635 = vmatpush3.bf16.msra.mxu0 %v7634_v24  ;;  %v883_v24 = vld [vmem:[%s10678_s17 + $0x68] sm:$0xff]  ;;  %v8089_v22 = vld [vmem:[%s10679_s28 + $0x194] ss:$40 sps:$4 sm:$0xff]  }
  0x5c   :  { %7637 = vmatprep.subr.bf16.mxu0 %v7636_v27  ;;  %v7656_v26 = vpack.c.bf16 %v885_v25, %v883_v24  ;;  %v882_v27 = vld [vmem:[%s10678_s17 + $0x60] sm:$0xff] }
  0x5d   :  { %v7658_v29 = vpack.c.bf16 %v884_v28, %v882_v27  ;;  %v8081_v21 = vld [vmem:[%s10679_s28 + $0x140] ss:$40 sps:$4 sm:$0xff]   ;;  %v8095_v24 = vld [vmem:[%s10679_s28 + $0x1e4] ss:$40 sps:$4 sm:$0xff]   ;;  %v8099_v27 = vld [vmem:[%s10679_s28 + $0x230] ss:$40 sps:$4 sm:$0xff]  }
  0x5e   :  { %v8093_v25 = vld [vmem:[%s10679_s28 + $0x1e0] ss:$40 sps:$4 sm:$0xff]   ;;  %v8107_v28 = vld [vmem:[%s10679_s28 + $0x284] ss:$40 sps:$4 sm:$0xff]  }
  0x5f   :  { %7639 = vmatpush3.bf16.msra.mxu0 %v7638_v30  ;;  %v8467_v30 = vmov 0.0  }
  0x60   :  { %7641 = vmatprep.subr.bf16.mxu0 %v7640_v34  ;;  %v8066_v34 = vld [vmem:[%s10679_s28 + $0x70] ss:$40 sps:$4 sm:$0xff]  }
 0x108   :  { %v314_v36 = vpop.f32.mrb[0].mxu1 }
 0x109   :  { %v446_v37 = vpack.c.bf16 %v314_v36, %v314_v36  ;;  %v316_v38 = vpop.f32.mrb[1].mxu1  ;;  %v273_v41 = vpop.f32.mrb[0].mxu0  ;;  %v7642_v36 = vpack.c.bf16 %v764_v35, %v763_v33  ;;  %v8062_v33 = vld [vmem:[%s10679_s28 + $0x24] ss:$40 sps:$4 sm:$0xff]   ;;  %v8068_v35 = vld [vmem:[%s10679_s28 + $0x74] ss:$40 sps:$4 sm:$0xff]  }
 0x10a   :  { %v447_v39 = vpack.c.bf16 %v316_v38, %v316_v38  ;;  %v318_v40 = vpop.f32.mrb[2].mxu1  ;;  %v444_v44 = vpack.c.bf16 %v273_v41, %v273_v41  ;;  %v275_v45 = vpop.f32.mrb[1].mxu0 }
 0x10b   :  { %v463_v42 = vsel %vm461_vm1, %v446_v37, 0  ;;  %v319_v43 = vpop.f32.mrb[3].mxu1  ;;  %v445_v46 = vpack.c.bf16 %v275_v45, %v275_v45  ;;  %v277_v47 = vpop.f32.mrb[2].mxu0  ;;  %7643 = vmatpush3.bf16.msra.mxu0 %v7642_v36  ;;  %v8072_v36 = vld [vmem:[%s10679_s28 + $0xc0] ss:$40 sps:$4 sm:$0xff]  }
 0x10c   :  { %7017 = vmatprep.subr.msk.bf16.mxu1 %vm461_vm1, %v447_v39  ;;  %v278_v49 = vpop.f32.mrb[3].mxu0  ;;  %v513_v50 = vsel %vm461_vm1, %v444_v44, 0 }
 0x10d   :  { %469 = vmatpush1.bf16.msra.mxu1 %v463_v42 }
 0x10e   :  { %7019 = vmatprep.subr.msk.bf16.mxu1 %vm461_vm1, %v445_v46 }
 0x110   :  { %7018 = vmatmul.mubr.msk.bf16.vlgmr.msra.gmra.mrb[8].mxu1 %vm457_vm2, %v7016_v48  ;;  %v396_v51 = vpop.f32.mrb[4].mxu1 }
 0x111   :  { %519 = vmatpush1.bf16.msra.mxu1 %v513_v50  ;;  %550 = vmatprep.mubr.bf16.mxu1 %v8451_v0  ;;  %v398_v52 = vpop.f32.mrb[5].mxu1  ;;  %v355_v53 = vpop.f32.mrb[4].mxu0  ;;  %v450_v5 = vpack.c.bf16 %v396_v51, %v396_v51 }
 0x112   :  { %v400_v54 = vpop.f32.mrb[6].mxu1  ;;  %v357_v55 = vpop.f32.mrb[5].mxu0  ;;  %v448_v60 = vpack.c.bf16 %v355_v53, %v355_v53  ;;  %v451_v63 = vpack.c.bf16 %v398_v52, %v398_v52 }
 0x113   :  { %v401_v56 = vpop.f32.mrb[7].mxu1  ;;  %v449_v57 = vpack.c.bf16 %v357_v55, %v357_v55  ;;  %v359_v58 = vpop.f32.mrb[6].mxu0  ;;  %v619_v7 = vsel %vm461_vm1, %v450_v5, 0 }
 0x114   :  { %v360_v59 = vpop.f32.mrb[7].mxu0  ;;  %v565_v62 = vsel %vm461_vm1, %v448_v60, 0 }
 0x115   :  { %7022 = vmatprep.subr.msk.bf16.mxu1 %vm461_vm1, %v449_v57 }
 0x119   :  { %v437_v1 = vpop.f32.mrb[8].mxu0 }
 0x11a   :  { %v439_v2 = vpop.f32.mrb[9].mxu0  ;;  %v452_v9 = vpack.c.bf16 %v437_v1, %v437_v1 }
 0x11b   :  { %v441_v3 = vpop.f32.mrb[10].mxu0  ;;  %v453_v8 = vpack.c.bf16 %v439_v2, %v439_v2 }
 0x11c   :  { %7020 = vmatmul.mubr.msk.bf16.vlgmr.msra.gmra.mrb[8].mxu1 %vm457_vm2, %v454_v61  ;;  %v442_v4 = vpop.f32.mrb[11].mxu0  ;;  %v673_v11 = vsel %vm461_vm1, %v452_v9, 0  ;;  %v870_v9 = vld [vmem:[%s10678_s17] sm:$0xff] }
 0x11d   :  { %571 = vmatpush1.bf16.msra.mxu1 %v565_v62  ;;  %602 = vmatprep.mubr.bf16.mxu1 %v8451_v0 }
 0x11e   :  { %7025 = vmatprep.subr.msk.bf16.mxu1 %vm461_vm1, %v451_v63 }
 0x128   :  { %7023 = vmatmul.mubr.msk.bf16.vlgmr.msra.gmra.mrb[8].mxu1 %vm457_vm2, %v7021_v6  ;;  %v871_v6 = vld [vmem:[%s10678_s17 + $0x8] sm:$0xff] }
 0x129   :  { %625 = vmatpush1.bf16.msra.mxu1 %v619_v7  ;;  %656 = vmatprep.mubr.bf16.mxu1 %v8451_v0  ;;  %v873_v7 = vld [vmem:[%s10678_s17 + $0x18] sm:$0xff] }
 0x12a   :  { %7028 = vmatprep.subr.msk.bf16.mxu1 %vm461_vm1, %v453_v8  ;;  %v7644_v8 = vpack.c.bf16 %v873_v7, %v871_v6  ;;  %v857_v6 = vld [vmem:[%s10680_s5] sm:$0x3] }
 0x12c   :  { %7645 = vmatprep.subr.bf16.mxu0 %v7644_v8 }
 0x134   :  { %7026 = vmatmul.mubr.msk.bf16.vlgmr.msra.gmra.mrb[8].mxu1 %vm457_vm2, %v7024_v10  ;;  %v872_v10 = vld [vmem:[%s10678_s17 + $0x10] sm:$0xff] }
 0x135   :  { %679 = vmatpush1.bf16.msra.mxu1 %v673_v11  ;;  %710 = vmatprep.mubr.bf16.mxu1 %v8451_v0  ;;  %v7646_v11 = vpack.c.bf16 %v872_v10, %v870_v9 }
 0x136   :  { %2113 = vmatprep.subr.bf16.mxu1 %v8062_v33  ;;  %v8119_v33 = vld [vmem:[%s10679_s28 + $0x324] ss:$40 sps:$4 sm:$0xff]  }
 0x140   :  { %7029 = vmatmul.mubr.msk.bf16.vlgmr.msra.gmra.mrb[8].mxu1 %vm457_vm2, %v7027_v12  ;;  %v875_v12 = vld [vmem:[%s10678_s17 + $0x28] sm:$0xff] }
 0x141   :  { %v7648_v14 = vpack.c.bf16 %v877_v13, %v875_v12  ;;  %2114 = vmatpush1.bf16.msra.mxu1 %v8060_v32  ;;  %v8057_v12 = vld [vmem:[%s10679_s28] ss:$40 sps:$4 sm:$0xff]   ;;  %v8065_v13 = vld [vmem:[%s10679_s28 + $0x54] ss:$40 sps:$4 sm:$0xff]   ;;  %v8111_v32 = vld [vmem:[%s10679_s28 + $0x2d0] ss:$40 sps:$4 sm:$0xff]  }
 0x142   :  { %2115 = vmatprep.subr.bf16.mxu1 %v8068_v35  ;;  %v8125_v35 = vld [vmem:[%s10679_s28 + $0x374] ss:$40 sps:$4 sm:$0xff]  }
 0x145   :  { %2116 = vmatpush1.bf16.msra.mxu1 %v8066_v34  ;;  %v8117_v34 = vld [vmem:[%s10679_s28 + $0x320] ss:$40 sps:$4 sm:$0xff]  }
 0x213   :  { %v8806_v37 = vpop.f32.mrb[8].mxu1 }
 0x214   :  { %v721_v38 = vrot.slane %v8806_v37, 4  ;;  %v733_v39 = vmul.f32 %v8806_v37, %v8806_v37  ;;  %v8811_v40 = vpop.f32.mrb[9].mxu1 }
 0x215   :  { %v727_v41 = vrot.slane %v8811_v40, 4  ;;  %v734_v42 = vmul.f32 %v8811_v40, %v8811_v40  ;;  %v716_v43 = vpop.f32.mrb[10].mxu1 }
 0x216   :  { %v722_v44 = vadd.f32 %v721_v38, %v8806_v37  ;;  %v735_v45 = vrot.slane %v733_v39, 4  ;;  %v717_v46 = vpop.f32.mrb[11].mxu1  ;;  %v8074_v38 = vld [vmem:[%s10679_s28 + $0xc4] ss:$40 sps:$4 sm:$0xff]  }
 0x217   :  { %v728_v47 = vadd.f32 %v727_v41, %v8811_v40  ;;  %v741_v48 = vrot.slane %v734_v42, 4  ;;  %2117 = vmatprep.subr.bf16.mxu1 %v8074_v38  ;;  %v8080_v41 = vld [vmem:[%s10679_s28 + $0x114] ss:$40 sps:$4 sm:$0xff]   ;;  %v8086_v43 = vld [vmem:[%s10679_s28 + $0x164] ss:$40 sps:$4 sm:$0xff]  }
 0x218   :  { %v723_v49 = vrot.slane %v722_v44, 2  ;;  %v736_v50 = vadd.f32 %v735_v45, %v733_v39  ;;  %2118 = vmatpush1.bf16.msra.mxu1 %v8072_v36  ;;  %v8078_v39 = vld [vmem:[%s10679_s28 + $0x110] ss:$40 sps:$4 sm:$0xff]   ;;  %v8092_v45 = vld [vmem:[%s10679_s28 + $0x1b4] ss:$40 sps:$4 sm:$0xff]  }
 0x219   :  { %v729_v51 = vrot.slane %v728_v47, 2  ;;  %v742_v52 = vadd.f32 %v741_v48, %v734_v42  ;;  %2119 = vmatprep.subr.bf16.mxu1 %v8080_v41  ;;  %v8084_v42 = vld [vmem:[%s10679_s28 + $0x160] ss:$40 sps:$4 sm:$0xff]   ;;  %v8102_v48 = vld [vmem:[%s10679_s28 + $0x250] ss:$40 sps:$4 sm:$0xff]  }
 0x21a   :  { %v724_v53 = vadd.f32 %v723_v49, %v722_v44  ;;  %v737_v54 = vrot.slane %v736_v50, 2  ;;  %v8090_v44 = vld [vmem:[%s10679_s28 + $0x1b0] ss:$40 sps:$4 sm:$0xff]   ;;  %v8096_v46 = vld [vmem:[%s10679_s28 + $0x200] ss:$40 sps:$4 sm:$0xff]  }
 0x21b   :  { %v730_v55 = vadd.f32 %v729_v51, %v728_v47  ;;  %v743_v56 = vrot.slane %v742_v52, 2  ;;  %v8098_v47 = vld [vmem:[%s10679_s28 + $0x204] ss:$40 sps:$4 sm:$0xff]   ;;  %v8104_v49 = vld [vmem:[%s10679_s28 + $0x254] ss:$40 sps:$4 sm:$0xff]  }
 0x21c   :  { %v738_v57 = vadd.f32 %v737_v54, %v736_v50  ;;  %v725_v60 = vrot.slane %v724_v53, 1  ;;  %2120 = vmatpush1.bf16.msra.mxu1 %v8078_v39  ;;  %v8108_v50 = vld [vmem:[%s10679_s28 + $0x2a0] ss:$40 sps:$4 sm:$0xff]   ;;  %v8110_v51 = vld [vmem:[%s10679_s28 + $0x2a4] ss:$40 sps:$4 sm:$0xff]  }
 0x21d   :  { %v731_v58 = vrot.slane %v730_v55, 1  ;;  %v744_v59 = vadd.f32 %v743_v56, %v742_v52  ;;  %2121 = vmatprep.subr.bf16.mxu1 %v8086_v43  ;;  %v8114_v52 = vld [vmem:[%s10679_s28 + $0x2f0] ss:$40 sps:$4 sm:$0xff]   ;;  %v8120_v54 = vld [vmem:[%s10679_s28 + $0x340] ss:$40 sps:$4 sm:$0xff]  }
 0x21e   :  { %v739_v61 = vrot.slane %v738_v57, 1  ;;  %v726_v3 = vadd.f32 %v725_v60, %v724_v53  ;;  %v8116_v53 = vld [vmem:[%s10679_s28 + $0x2f4] ss:$40 sps:$4 sm:$0xff]   ;;  %v8126_v56 = vld [vmem:[%s10679_s28 + $0x390] ss:$40 sps:$4 sm:$0xff]  }
 0x21f   :  { %v745_v62 = vrot.slane %v744_v59, 1  ;;  %v732_v1 = vadd.f32 %v731_v58, %v730_v55  ;;  %v8122_v55 = vld [vmem:[%s10679_s28 + $0x344] ss:$40 sps:$4 sm:$0xff]   ;;  %v8132_v58 = vld [vmem:[%s10679_s28 + $0x3e0] ss:$40 sps:$4 sm:$0xff]  }
 0x220   :  { %v740_v63 = vadd.f32 %v739_v61, %v738_v57  ;;  %2122 = vmatpush1.bf16.msra.mxu1 %v8084_v42  ;;  %v8128_v57 = vld [vmem:[%s10679_s28 + $0x394] ss:$40 sps:$4 sm:$0xff]   ;;  %v8123_v36 = vld [vmem:[%s10679_s28 + $0x370] ss:$40 sps:$4 sm:$0xff]   ;;  %v8131_v38 = vld [vmem:[%s10679_s28 + $0x3c4] ss:$40 sps:$4 sm:$0xff]  }
 0x221   :  { %v746_v2 = vadd.f32 %v745_v62, %v744_v59  ;;  %2123 = vmatprep.subr.bf16.mxu1 %v8092_v45  ;;  %v8134_v59 = vld [vmem:[%s10679_s28 + $0x3e4] ss:$40 sps:$4 sm:$0xff]   ;;  %v8129_v39 = vld [vmem:[%s10679_s28 + $0x3c0] ss:$40 sps:$4 sm:$0xff]   ;;  %v8137_v41 = vld [vmem:[%s10679_s28 + $0x414] ss:$40 sps:$4 sm:$0xff]  }
 0x222   :  { %v747_v5 = vsel %vm461_vm1, %v726_v3, %v740_v63  ;;  %v8135_v42 = vld [vmem:[%s10679_s28 + $0x410] ss:$40 sps:$4 sm:$0xff]   ;;  %v8140_v43 = vld [vmem:[%s10679_s28 + $0x434] ss:$40 sps:$4 sm:$0xff]   ;;  %v8143_v45 = vld [vmem:[%s10679_s28 + $0x464] ss:$40 sps:$4 sm:$0xff]  }
 0x223   :  { %v748_v4 = vsel %vm461_vm1, %v732_v1, %v746_v2 }
 0x224   :  { %845 = vmatprep.mubr.f32.mxu0 %v748_v4  ;;  %2124 = vmatpush1.bf16.msra.mxu1 %v8090_v44  ;;  %v8138_v44 = vld [vmem:[%s10679_s28 + $0x430] ss:$40 sps:$4 sm:$0xff]  }
 0x225   :  { %846 = vmatmul.mubr.f32.vlgmr.msra.gmra.mrb[12].mxu0 %v747_v5  ;;  %2125 = vmatprep.subr.bf16.mxu1 %v8098_v47  ;;  %v8146_v47 = vld [vmem:[%s10679_s28 + $0x484] ss:$40 sps:$4 sm:$0xff]  }
 0x226   :  { %7647 = vmatpush1.bf16.msra.mxu0 %v7646_v11  ;;  %954 = vmatprep.mubr.f32.mxu0 %v8467_v30 }
 0x227   :  { %7649 = vmatprep.subr.bf16.mxu0 %v7648_v14 }
 0x228   :  { %2126 = vmatpush1.bf16.msra.mxu1 %v8096_v46  ;;  %v8141_v46 = vld [vmem:[%s10679_s28 + $0x460] ss:$40 sps:$4 sm:$0xff]  }
 0x229   :  { %2127 = vmatprep.subr.bf16.mxu1 %v8104_v49  ;;  %v8149_v49 = vld [vmem:[%s10679_s28 + $0x4b4] ss:$40 sps:$4 sm:$0xff]  }
 0x22a   :  { %7651 = vmatpush1.bf16.msra.mxu0 %v7650_v17  ;;  %v8069_v17 = vld [vmem:[%s10679_s28 + $0xa0] ss:$40 sps:$4 sm:$0xff]  }
 0x22b   :  { %7653 = vmatprep.subr.bf16.mxu0 %v7652_v20  ;;  %v8083_v20 = vld [vmem:[%s10679_s28 + $0x144] ss:$40 sps:$4 sm:$0xff]  }
 0x22c   :  { %2128 = vmatpush1.bf16.msra.mxu1 %v8102_v48  ;;  %v8144_v48 = vld [vmem:[%s10679_s28 + $0x480] ss:$40 sps:$4 sm:$0xff]  }
 0x22d   :  { %2129 = vmatprep.subr.bf16.mxu1 %v8110_v51  ;;  %v8152_v51 = vld [vmem:[%s10679_s28 + $0x4d4] ss:$40 sps:$4 sm:$0xff]  }
 0x22e   :  { %7655 = vmatpush1.bf16.msra.mxu0 %v7654_v23  ;;  %v8087_v23 = vld [vmem:[%s10679_s28 + $0x190] ss:$40 sps:$4 sm:$0xff]  }
 0x22f   :  { %7657 = vmatprep.subr.bf16.mxu0 %v7656_v26  ;;  %v8101_v26 = vld [vmem:[%s10679_s28 + $0x234] ss:$40 sps:$4 sm:$0xff]  }
 0x230   :  { %2130 = vmatpush1.bf16.msra.mxu1 %v8108_v50  ;;  %v8147_v50 = vld [vmem:[%s10679_s28 + $0x4b0] ss:$40 sps:$4 sm:$0xff]  }
 0x231   :  { %2131 = vmatprep.subr.bf16.mxu1 %v8116_v53  ;;  %v8155_v53 = vld [vmem:[%s10679_s28 + $0xc] ss:$40 sps:$4 sm:$0xff]  }
 0x232   :  { %7659 = vmatpush1.bf16.msra.mxu0 %v7658_v29  ;;  %v8105_v29 = vld [vmem:[%s10679_s28 + $0x280] ss:$40 sps:$4 sm:$0xff]  }
 0x233   :  { %1949 = vmatprep.subr.bf16.mxu0 %v8059_v31  ;;  %v8113_v31 = vld [vmem:[%s10679_s28 + $0x2d4] ss:$40 sps:$4 sm:$0xff]  }
 0x234   :  { %2132 = vmatpush1.bf16.msra.mxu1 %v8114_v52  ;;  %v8150_v52 = vld [vmem:[%s10679_s28 + $0x4d0] ss:$40 sps:$4 sm:$0xff]  }
 0x235   :  { %2133 = vmatprep.subr.bf16.mxu1 %v8122_v55 }
 0x238   :  { %2134 = vmatpush1.bf16.msra.mxu1 %v8120_v54  ;;  %v961_v54 = vlaneseq }
 0x239   :  { %2135 = vmatprep.subr.bf16.mxu1 %v8128_v57 }
 0x23a   :  { %v962_v55 = vshrl.u32 %v961_v54, 7  ;;  %v8216_v54 = vld [vmem:[%s10679_s28 + $0x1a0] ss:$40 sps:$4 sm:$0xff]  }
 0x23c   :  { %2136 = vmatpush1.bf16.msra.mxu1 %v8126_v56  ;;  %v9069_v56 = vsub.s32 0, %v962_v55  ;;  %v9071_v57 = vsub.s32 1, %v962_v55  ;;  %v8221_v55 = vld [vmem:[%s10679_s28 + $0x1f4] ss:$40 sps:$4 sm:$0xff]  }
 0x23d   :  { %2137 = vmatprep.subr.bf16.mxu1 %v8134_v59 }
 0x240   :  { %2138 = vmatpush1.bf16.msra.mxu1 %v8132_v58 }
 0x241   :  { %2139 = vmatprep.subr.bf16.mxu1 %v8140_v43  ;;  %v8203_v43 = vld [vmem:[%s10679_s28 + $0x14] ss:$40 sps:$4 sm:$0xff]  }
 0x244   :  { %2140 = vmatpush1.bf16.msra.mxu1 %v8138_v44  ;;  %v8201_v44 = vld [vmem:[%s10679_s28 + $0x10] ss:$40 sps:$4 sm:$0xff]  }
 0x245   :  { %2141 = vmatprep.subr.bf16.mxu1 %v8146_v47  ;;  %v8209_v47 = vld [vmem:[%s10679_s28 + $0xb4] ss:$40 sps:$4 sm:$0xff]  }
 0x248   :  { %2142 = vmatpush1.bf16.msra.mxu1 %v8144_v48  ;;  %v8207_v48 = vld [vmem:[%s10679_s28 + $0xb0] ss:$40 sps:$4 sm:$0xff]  }
 0x249   :  { %2143 = vmatprep.subr.bf16.mxu1 %v8152_v51  ;;  %v8215_v51 = vld [vmem:[%s10679_s28 + $0x154] ss:$40 sps:$4 sm:$0xff]  }
 0x24c   :  { %2144 = vmatpush1.bf16.msra.mxu1 %v8150_v52  ;;  %v8213_v52 = vld [vmem:[%s10679_s28 + $0x150] ss:$40 sps:$4 sm:$0xff]  }
 0x2f8   :  { %v7504_v60 = vpop.f32.mrb[12].mxu0 }
 0x2f9   :  { %v7505_v61 = vpop.f32.mrb[13].mxu0 }
 0x2fa   :  { %v7506_v62 = vadd.f32 %v7505_v61, %v7504_v60 }
 0x2fc   :  { %v851_v63 = vmul.f32 0.03125, %v7506_v62 }
 0x2fe   :  { %v852_v1 = vmul.f32 %v851_v63, %v851_v63 }
 0x300   :  { %v854_v2 = vrot.slane %v852_v1, 7 }
 0x302   :  { %v856_v3 = vsub.f32 %v851_v63, %v854_v2 }
 0x304   :  { %v858_v4 = vadd.f32 1e-05, %v856_v3 }
 0x306   :  { %8302 = vrsqrt.f32 %v858_v4 }
 0x310   :  { %v8303_v5 = vpop.eup %8302 }
 0x311   :  { %v861_v7 = vrot.slane %v8303_v5, 1 }
 0x313   :  { %v863_v8 = vmul.f32 %v861_v7, %v857_v6 }
 0x315   :  { %v864_v9 = vmul.f32 %v863_v8, %v851_v63 }
 0x317   :  { %v866_v10 = vrot.slane %v864_v9, 7 }
 0x319   :  { %v868_v11 = vsub.f32 %v857_v6, %v866_v10 }
 0x31b   :  { %v869_v14 = vsel %vm461_vm1, %v863_v8, %v868_v11  ;;  %v8156_v11 = vld [vmem:[%s10679_s28 + $0x58] ss:$40 sps:$4 sm:$0xff]  }
 0x31c   :  { %7030 = vmatmul.mubr.msk.f32.vlgmr.msra.gmra.mrb[14].mxu0 %vm886_vm3, %v869_v14  ;;  %v8164_v14 = vld [vmem:[%s10679_s28 + $0xfc] ss:$40 sps:$4 sm:$0xff]  }
 0x31d   :  { %1950 = vmatpush1.bf16.msra.mxu0 %v8057_v12  ;;  %v8161_v12 = vld [vmem:[%s10679_s28 + $0xac] ss:$40 sps:$4 sm:$0xff]  }
 0x31e   :  { %1951 = vmatprep.subr.bf16.mxu0 %v8065_v13  ;;  %v8159_v13 = vld [vmem:[%s10679_s28 + $0xa8] ss:$40 sps:$4 sm:$0xff]  }
 0x321   :  { %1952 = vmatpush1.bf16.msra.mxu0 %v8063_v15  ;;  %v8162_v15 = vld [vmem:[%s10679_s28 + $0xf8] ss:$40 sps:$4 sm:$0xff]  }
 0x322   :  { %1953 = vmatprep.subr.bf16.mxu0 %v8071_v16  ;;  %v8167_v16 = vld [vmem:[%s10679_s28 + $0x14c] ss:$40 sps:$4 sm:$0xff]  }
 0x325   :  { %1954 = vmatpush1.bf16.msra.mxu0 %v8069_v17  ;;  %v8165_v17 = vld [vmem:[%s10679_s28 + $0x148] ss:$40 sps:$4 sm:$0xff]  }
 0x326   :  { %1955 = vmatprep.subr.bf16.mxu0 %v8077_v18  ;;  %v8170_v18 = vld [vmem:[%s10679_s28 + $0x19c] ss:$40 sps:$4 sm:$0xff]  }
 0x329   :  { %1956 = vmatpush1.bf16.msra.mxu0 %v8075_v19  ;;  %v8168_v19 = vld [vmem:[%s10679_s28 + $0x198] ss:$40 sps:$4 sm:$0xff]  }
 0x32a   :  { %1957 = vmatprep.subr.bf16.mxu0 %v8083_v20  ;;  %v8173_v20 = vld [vmem:[%s10679_s28 + $0x1ec] ss:$40 sps:$4 sm:$0xff]  }
 0x32d   :  { %1958 = vmatpush1.bf16.msra.mxu0 %v8081_v21  ;;  %v8171_v21 = vld [vmem:[%s10679_s28 + $0x1e8] ss:$40 sps:$4 sm:$0xff]  }
 0x32e   :  { %1959 = vmatprep.subr.bf16.mxu0 %v8089_v22  ;;  %v8176_v22 = vld [vmem:[%s10679_s28 + $0x23c] ss:$40 sps:$4 sm:$0xff]  }
 0x331   :  { %1960 = vmatpush1.bf16.msra.mxu0 %v8087_v23  ;;  %v8174_v23 = vld [vmem:[%s10679_s28 + $0x238] ss:$40 sps:$4 sm:$0xff]  }
 0x332   :  { %1961 = vmatprep.subr.bf16.mxu0 %v8095_v24  ;;  %v8179_v24 = vld [vmem:[%s10679_s28 + $0x28c] ss:$40 sps:$4 sm:$0xff]  }
 0x335   :  { %1962 = vmatpush1.bf16.msra.mxu0 %v8093_v25  ;;  %v8177_v25 = vld [vmem:[%s10679_s28 + $0x288] ss:$40 sps:$4 sm:$0xff]  }
 0x336   :  { %1963 = vmatprep.subr.bf16.mxu0 %v8101_v26  ;;  %v8182_v26 = vld [vmem:[%s10679_s28 + $0x2dc] ss:$40 sps:$4 sm:$0xff]  }
 0x339   :  { %1964 = vmatpush1.bf16.msra.mxu0 %v8099_v27  ;;  %v8180_v27 = vld [vmem:[%s10679_s28 + $0x2d8] ss:$40 sps:$4 sm:$0xff]  }
 0x33a   :  { %1965 = vmatprep.subr.bf16.mxu0 %v8107_v28  ;;  %v8185_v28 = vld [vmem:[%s10679_s28 + $0x32c] ss:$40 sps:$4 sm:$0xff]  }
 0x33d   :  { %1966 = vmatpush1.bf16.msra.mxu0 %v8105_v29  ;;  %v8183_v29 = vld [vmem:[%s10679_s28 + $0x328] ss:$40 sps:$4 sm:$0xff]  }
 0x33e   :  { %1967 = vmatprep.subr.bf16.mxu0 %v8113_v31  ;;  %v8188_v31 = vld [vmem:[%s10679_s28 + $0x37c] ss:$40 sps:$4 sm:$0xff]  }
 0x341   :  { %1968 = vmatpush1.bf16.msra.mxu0 %v8111_v32  ;;  %v8186_v32 = vld [vmem:[%s10679_s28 + $0x378] ss:$40 sps:$4 sm:$0xff]  }
 0x342   :  { %1969 = vmatprep.subr.bf16.mxu0 %v8119_v33  ;;  %v8191_v33 = vld [vmem:[%s10679_s28 + $0x3cc] ss:$40 sps:$4 sm:$0xff]  }
 0x345   :  { %1970 = vmatpush1.bf16.msra.mxu0 %v8117_v34  ;;  %v8189_v34 = vld [vmem:[%s10679_s28 + $0x3c8] ss:$40 sps:$4 sm:$0xff]  }
 0x346   :  { %1971 = vmatprep.subr.bf16.mxu0 %v8125_v35  ;;  %v8194_v35 = vld [vmem:[%s10679_s28 + $0x41c] ss:$40 sps:$4 sm:$0xff]  }
 0x349   :  { %1972 = vmatpush1.bf16.msra.mxu0 %v8123_v36  ;;  %v8192_v36 = vld [vmem:[%s10679_s28 + $0x418] ss:$40 sps:$4 sm:$0xff]  }
 0x34a   :  { %1973 = vmatprep.subr.bf16.mxu0 %v8131_v38  ;;  %v8197_v38 = vld [vmem:[%s10679_s28 + $0x46c] ss:$40 sps:$4 sm:$0xff]  }
 0x34d   :  { %1974 = vmatpush1.bf16.msra.mxu0 %v8129_v39  ;;  %v8195_v39 = vld [vmem:[%s10679_s28 + $0x468] ss:$40 sps:$4 sm:$0xff]  }
 0x34e   :  { %1975 = vmatprep.subr.bf16.mxu0 %v8137_v41  ;;  %v8200_v41 = vld [vmem:[%s10679_s28 + $0x4bc] ss:$40 sps:$4 sm:$0xff]  }
 0x351   :  { %1976 = vmatpush1.bf16.msra.mxu0 %v8135_v42  ;;  %v8198_v42 = vld [vmem:[%s10679_s28 + $0x4b8] ss:$40 sps:$4 sm:$0xff]  }
 0x352   :  { %1977 = vmatprep.subr.bf16.mxu0 %v8143_v45  ;;  %v8206_v45 = vld [vmem:[%s10679_s28 + $0x64] ss:$40 sps:$4 sm:$0xff]  }
 0x355   :  { %1978 = vmatpush1.bf16.msra.mxu0 %v8141_v46  ;;  %v8204_v46 = vld [vmem:[%s10679_s28 + $0x60] ss:$40 sps:$4 sm:$0xff]  }
 0x356   :  { %1979 = vmatprep.subr.bf16.mxu0 %v8149_v49  ;;  %v8212_v49 = vld [vmem:[%s10679_s28 + $0x104] ss:$40 sps:$4 sm:$0xff]  }
 0x359   :  { %1980 = vmatpush1.bf16.msra.mxu0 %v8147_v50  ;;  %v8210_v50 = vld [vmem:[%s10679_s28 + $0x100] ss:$40 sps:$4 sm:$0xff]  }
 0x35a   :  { %1990 = vmatprep.subr.bf16.mxu0 %v8155_v53  ;;  %v8218_v53 = vld [vmem:[%s10679_s28 + $0x1a4] ss:$40 sps:$4 sm:$0xff]  }
 0x3ef   :  { %v956_v58 = vpop.f32.mrb[14].mxu0 }
 0x3f0   :  { %v964_v59 = vrot.slane %v956_v58, %v9069_v56  ;;  %v958_v60 = vpop.f32.mrb[15].mxu0  ;;  %v974_v63 = vrot.slane %v956_v58, %v9071_v57  ;;  %v8219_v58 = vld [vmem:[%s10679_s28 + $0x1f0] ss:$40 sps:$4 sm:$0xff]  }
 0x3f1   :  { %v968_v61 = vrot.slane %v958_v60, %v9069_v56  ;;  %v978_v2 = vrot.slane %v958_v60, %v9071_v57  ;;  %v8222_v60 = vld [vmem:[%s10679_s28 + $0x240] ss:$40 sps:$4 sm:$0xff]  }
 0x3f2   :  { %v969_v62 = vmul.f32 %v964_v59, %v8806_v37  ;;  %v8153_v37 = vld [vmem:[%s10679_s28 + $0x8] ss:$40 sps:$4 sm:$0xff]   ;;  %v8224_v59 = vld [vmem:[%s10679_s28 + $0x244] ss:$40 sps:$4 sm:$0xff]  }
 0x3f3   :  { %v970_v1 = vmul.f32 %v968_v61, %v8811_v40  ;;  %v8158_v40 = vld [vmem:[%s10679_s28 + $0x5c] ss:$40 sps:$4 sm:$0xff]  }
 0x3f4   :  { %v979_v3 = vadd.f32 %v974_v63, %v969_v62  ;;  %v8227_v61 = vld [vmem:[%s10679_s28 + $0x294] ss:$40 sps:$4 sm:$0xff]   ;;  %v8225_v62 = vld [vmem:[%s10679_s28 + $0x290] ss:$40 sps:$4 sm:$0xff]   ;;  %v8230_v63 = vld [vmem:[%s10679_s28 + $0x2e4] ss:$40 sps:$4 sm:$0xff]  }
 0x3f5   :  { %v980_v4 = vadd.f32 %v978_v2, %v970_v1  ;;  %v8228_v1 = vld [vmem:[%s10679_s28 + $0x2e0] ss:$40 sps:$4 sm:$0xff]   ;;  %v8233_v2 = vld [vmem:[%s10679_s28 + $0x334] ss:$40 sps:$4 sm:$0xff]  }
 0x3f6   :  { %vm981_vm4 = vcmp.ge.f32.partialorder %v979_v3, 0.0  ;;  %v983_v5 = vmul.f32 0.2, %v979_v3 }
 0x3f7   :  { %vm982_vm5 = vcmp.ge.f32.partialorder %v980_v4, 0.0  ;;  %v984_v6 = vmul.f32 0.2, %v980_v4 }
 0x3f8   :  { %v985_v7 = vsel %vm981_vm4, %v979_v3, %v983_v5  ;;  %v8231_v3 = vld [vmem:[%s10679_s28 + $0x330] ss:$40 sps:$4 sm:$0xff]   ;;  %v8234_v5 = vld [vmem:[%s10679_s28 + $0x380] ss:$40 sps:$4 sm:$0xff]  }
 0x3f9   :  { %v986_v8 = vsel %vm982_vm5, %v980_v4, %v984_v6  ;;  %v9084_v10 = vpack.c.bf16 %v985_v7, %v985_v7  ;;  %v8236_v4 = vld [vmem:[%s10679_s28 + $0x384] ss:$40 sps:$4 sm:$0xff]   ;;  %v8239_v6 = vld [vmem:[%s10679_s28 + $0x3d4] ss:$40 sps:$4 sm:$0xff]   ;;  %v8237_v7 = vld [vmem:[%s10679_s28 + $0x3d0] ss:$40 sps:$4 sm:$0xff]  }
 0x3fa   :  { %v9079_v9 = vpack.c.bf16 %v986_v8, %v986_v8  ;;  %v8242_v8 = vld [vmem:[%s10679_s28 + $0x424] ss:$40 sps:$4 sm:$0xff]  }
 0x3fc   :  { %1981 = vmatprep.mubr.bf16.mxu0 %v9079_v9  ;;  %2145 = vmatprep.mubr.bf16.mxu1 %v9079_v9 }
 0x3fd   :  { %1982 = vmatmul.mubr.bf16.vlgmr.msra.gmra.mrb[16].mxu0 %v9084_v10  ;;  %2146 = vmatmul.mubr.bf16.vlgmr.msra.gmra.mrb[12].mxu1 %v9084_v10 }
 0x3fe   :  { %1991 = vmatpush1.bf16.msra.mxu0 %v8153_v37  ;;  %2022 = vmatprep.mubr.bf16.mxu0 %v9079_v9  ;;  %v8240_v37 = vld [vmem:[%s10679_s28 + $0x420] ss:$40 sps:$4 sm:$0xff]  }
 0x3ff   :  { %1992 = vmatprep.subr.bf16.mxu0 %v8158_v40  ;;  %2708 = vmatprep.mubr.f32.mxu1 %v8467_v30  ;;  %v8245_v40 = vld [vmem:[%s10679_s28 + $0x474] ss:$40 sps:$4 sm:$0xff]  }
 0x402   :  { %1993 = vmatpush1.bf16.msra.mxu0 %v8156_v11  ;;  %v8243_v11 = vld [vmem:[%s10679_s28 + $0x470] ss:$40 sps:$4 sm:$0xff]  }
 0x403   :  { %1994 = vmatprep.subr.bf16.mxu0 %v8161_v12  ;;  %v8248_v12 = vld [vmem:[%s10679_s28 + $0x4c4] ss:$40 sps:$4 sm:$0xff]  }
 0x406   :  { %1995 = vmatpush1.bf16.msra.mxu0 %v8159_v13  ;;  %v8246_v13 = vld [vmem:[%s10679_s28 + $0x4c0] ss:$40 sps:$4 sm:$0xff]  }
 0x407   :  { %1996 = vmatprep.subr.bf16.mxu0 %v8164_v14  ;;  %v8251_v14 = vld [vmem:[%s10679_s28 + $0x1c] ss:$40 sps:$4 sm:$0xff]  }
 0x40a   :  { %1997 = vmatpush1.bf16.msra.mxu0 %v8162_v15  ;;  %v8249_v15 = vld [vmem:[%s10679_s28 + $0x18] ss:$40 sps:$4 sm:$0xff]  }
 0x40b   :  { %1998 = vmatprep.subr.bf16.mxu0 %v8167_v16  ;;  %v8254_v16 = vld [vmem:[%s10679_s28 + $0x6c] ss:$40 sps:$4 sm:$0xff]  }
 0x40e   :  { %1999 = vmatpush1.bf16.msra.mxu0 %v8165_v17  ;;  %v8252_v17 = vld [vmem:[%s10679_s28 + $0x68] ss:$40 sps:$4 sm:$0xff]  }
 0x40f   :  { %2000 = vmatprep.subr.bf16.mxu0 %v8170_v18  ;;  %v8257_v18 = vld [vmem:[%s10679_s28 + $0xbc] ss:$40 sps:$4 sm:$0xff]  }
 0x412   :  { %2001 = vmatpush1.bf16.msra.mxu0 %v8168_v19  ;;  %v8255_v19 = vld [vmem:[%s10679_s28 + $0xb8] ss:$40 sps:$4 sm:$0xff]  }
 0x413   :  { %2002 = vmatprep.subr.bf16.mxu0 %v8173_v20  ;;  %v8260_v20 = vld [vmem:[%s10679_s28 + $0x10c] ss:$40 sps:$4 sm:$0xff]  }
 0x416   :  { %2003 = vmatpush1.bf16.msra.mxu0 %v8171_v21  ;;  %v8263_v21 = vld [vmem:[%s10679_s28 + $0x15c] ss:$40 sps:$4 sm:$0xff]  }
 0x417   :  { %2004 = vmatprep.subr.bf16.mxu0 %v8176_v22  ;;  %v8261_v22 = vld [vmem:[%s10679_s28 + $0x158] ss:$40 sps:$4 sm:$0xff]  }
 0x41a   :  { %2005 = vmatpush1.bf16.msra.mxu0 %v8174_v23  ;;  %v8266_v23 = vld [vmem:[%s10679_s28 + $0x1ac] ss:$40 sps:$4 sm:$0xff]  }
 0x41b   :  { %2006 = vmatprep.subr.bf16.mxu0 %v8179_v24  ;;  %v8264_v24 = vld [vmem:[%s10679_s28 + $0x1a8] ss:$40 sps:$4 sm:$0xff]  }
 0x41e   :  { %2007 = vmatpush1.bf16.msra.mxu0 %v8177_v25  ;;  %v8269_v25 = vld [vmem:[%s10679_s28 + $0x1fc] ss:$40 sps:$4 sm:$0xff]  }
 0x41f   :  { %2008 = vmatprep.subr.bf16.mxu0 %v8182_v26  ;;  %v8267_v26 = vld [vmem:[%s10679_s28 + $0x1f8] ss:$40 sps:$4 sm:$0xff]  }
 0x422   :  { %2009 = vmatpush1.bf16.msra.mxu0 %v8180_v27  ;;  %v8272_v27 = vld [vmem:[%s10679_s28 + $0x24c] ss:$40 sps:$4 sm:$0xff]  }
 0x423   :  { %2010 = vmatprep.subr.bf16.mxu0 %v8185_v28  ;;  %v8270_v28 = vld [vmem:[%s10679_s28 + $0x248] ss:$40 sps:$4 sm:$0xff]  }
 0x426   :  { %2011 = vmatpush1.bf16.msra.mxu0 %v8183_v29  ;;  %v8275_v29 = vld [vmem:[%s10679_s28 + $0x29c] ss:$40 sps:$4 sm:$0xff]  }
 0x427   :  { %2012 = vmatprep.subr.bf16.mxu0 %v8188_v31  ;;  %v8273_v31 = vld [vmem:[%s10679_s28 + $0x298] ss:$40 sps:$4 sm:$0xff]  }
 0x42a   :  { %2013 = vmatpush1.bf16.msra.mxu0 %v8186_v32  ;;  %v8278_v32 = vld [vmem:[%s10679_s28 + $0x2ec] ss:$40 sps:$4 sm:$0xff]  }
 0x42b   :  { %2014 = vmatprep.subr.bf16.mxu0 %v8191_v33  ;;  %v8276_v33 = vld [vmem:[%s10679_s28 + $0x2e8] ss:$40 sps:$4 sm:$0xff]  }
 0x42e   :  { %2015 = vmatpush1.bf16.msra.mxu0 %v8189_v34  ;;  %v8281_v34 = vld [vmem:[%s10679_s28 + $0x33c] ss:$40 sps:$4 sm:$0xff]  }
 0x42f   :  { %2016 = vmatprep.subr.bf16.mxu0 %v8194_v35  ;;  %v8279_v35 = vld [vmem:[%s10679_s28 + $0x338] ss:$40 sps:$4 sm:$0xff]  }
 0x432   :  { %2017 = vmatpush1.bf16.msra.mxu0 %v8192_v36  ;;  %v8284_v36 = vld [vmem:[%s10679_s28 + $0x38c] ss:$40 sps:$4 sm:$0xff]  }
 0x433   :  { %2018 = vmatprep.subr.bf16.mxu0 %v8197_v38  ;;  %v8282_v38 = vld [vmem:[%s10679_s28 + $0x388] ss:$40 sps:$4 sm:$0xff]  }
 0x436   :  { %2019 = vmatpush1.bf16.msra.mxu0 %v8195_v39  ;;  %v8287_v39 = vld [vmem:[%s10679_s28 + $0x3dc] ss:$40 sps:$4 sm:$0xff]  }
 0x437   :  { %2020 = vmatprep.subr.bf16.mxu0 %v8200_v41  ;;  %v8285_v41 = vld [vmem:[%s10679_s28 + $0x3d8] ss:$40 sps:$4 sm:$0xff]  }
 0x43a   :  { %2021 = vmatpush1.bf16.msra.mxu0 %v8198_v42  ;;  %v8290_v42 = vld [vmem:[%s10679_s28 + $0x42c] ss:$40 sps:$4 sm:$0xff]  }
 0x43b   :  { %2031 = vmatprep.subr.bf16.mxu0 %v8203_v43  ;;  %v8288_v43 = vld [vmem:[%s10679_s28 + $0x428] ss:$40 sps:$4 sm:$0xff]  }
 0x43d   :  { %2023 = vmatmul.mubr.bf16.vlgmr.msra.gmra.mrb[20].mxu0 %v9084_v10 }
 0x43e   :  { %2032 = vmatpush1.bf16.msra.mxu0 %v8201_v44  ;;  %2063 = vmatprep.mubr.bf16.mxu0 %v9079_v9  ;;  %v8293_v44 = vld [vmem:[%s10679_s28 + $0x47c] ss:$40 sps:$4 sm:$0xff]  }
 0x43f   :  { %2033 = vmatprep.subr.bf16.mxu0 %v8206_v45  ;;  %v8291_v45 = vld [vmem:[%s10679_s28 + $0x478] ss:$40 sps:$4 sm:$0xff]  }
 0x442   :  { %2034 = vmatpush1.bf16.msra.mxu0 %v8204_v46  ;;  %v8296_v46 = vld [vmem:[%s10679_s28 + $0x4cc] ss:$40 sps:$4 sm:$0xff]  }
 0x443   :  { %2035 = vmatprep.subr.bf16.mxu0 %v8209_v47  ;;  %v8294_v47 = vld [vmem:[%s10679_s28 + $0x4c8] ss:$40 sps:$4 sm:$0xff]  }
 0x446   :  { %2036 = vmatpush1.bf16.msra.mxu0 %v8207_v48 }
 0x447   :  { %2037 = vmatprep.subr.bf16.mxu0 %v8212_v49 }
 0x44a   :  { %2038 = vmatpush1.bf16.msra.mxu0 %v8210_v50 }
 0x44b   :  { %2039 = vmatprep.subr.bf16.mxu0 %v8215_v51 }
 0x44e   :  { %2040 = vmatpush1.bf16.msra.mxu0 %v8213_v52 }
 0x44f   :  { %2041 = vmatprep.subr.bf16.mxu0 %v8218_v53 }
 0x452   :  { %2042 = vmatpush1.bf16.msra.mxu0 %v8216_v54 }
 0x453   :  { %2043 = vmatprep.subr.bf16.mxu0 %v8221_v55 }
 0x456   :  { %2044 = vmatpush1.bf16.msra.mxu0 %v8219_v58 }
 0x457   :  { %2045 = vmatprep.subr.bf16.mxu0 %v8224_v59 }
 0x45a   :  { %2046 = vmatpush1.bf16.msra.mxu0 %v8222_v60 }
 0x45b   :  { %2047 = vmatprep.subr.bf16.mxu0 %v8227_v61 }
 0x45e   :  { %2048 = vmatpush1.bf16.msra.mxu0 %v8225_v62 }
 0x45f   :  { %2049 = vmatprep.subr.bf16.mxu0 %v8230_v63 }
 0x462   :  { %2050 = vmatpush1.bf16.msra.mxu0 %v8228_v1 }
 0x463   :  { %2051 = vmatprep.subr.bf16.mxu0 %v8233_v2 }
 0x466   :  { %2052 = vmatpush1.bf16.msra.mxu0 %v8231_v3  ;;  %v8297_v3 = vld [vmem:[%s10681_s6 + $0x8] sm:$0xff]  }
 0x467   :  { %2053 = vmatprep.subr.bf16.mxu0 %v8236_v4 }
 0x46a   :  { %2054 = vmatpush1.bf16.msra.mxu0 %v8234_v5  ;;  %v8298_v5 = vld [vmem:[%s10681_s6] sm:$0xff]  }
 0x46b   :  { %2055 = vmatprep.subr.bf16.mxu0 %v8239_v6 }
 0x46e   :  { %2056 = vmatpush1.bf16.msra.mxu0 %v8237_v7 }
 0x46f   :  { %2057 = vmatprep.subr.bf16.mxu0 %v8242_v8 }
 0x472   :  { %2058 = vmatpush1.bf16.msra.mxu0 %v8240_v37 }
 0x473   :  { %2059 = vmatprep.subr.bf16.mxu0 %v8245_v40 }
 0x476   :  { %2060 = vmatpush1.bf16.msra.mxu0 %v8243_v11 }
 0x477   :  { %2061 = vmatprep.subr.bf16.mxu0 %v8248_v12 }
 0x47a   :  { %2062 = vmatpush1.bf16.msra.mxu0 %v8246_v13  ;;  %v8299_v13 = vld [vmem:[%s10681_s6 + $0x10] sm:$0xff]  }
 0x47b   :  { %2072 = vmatprep.subr.bf16.mxu0 %v8251_v14 }
 0x47d   :  { %2064 = vmatmul.mubr.bf16.vlgmr.msra.gmra.mrb[24].mxu0 %v9084_v10 }
 0x47e   :  { %2073 = vmatpush1.bf16.msra.mxu0 %v8249_v15  ;;  %2104 = vmatprep.mubr.bf16.mxu0 %v9079_v9  ;;  %v8258_v9 = vld [vmem:[%s10679_s28 + $0x108] ss:$40 sps:$4 sm:$0xff]  }
 0x47f   :  { %2074 = vmatprep.subr.bf16.mxu0 %v8254_v16 }
 0x482   :  { %2075 = vmatpush1.bf16.msra.mxu0 %v8252_v17 }
 0x483   :  { %2076 = vmatprep.subr.bf16.mxu0 %v8257_v18 }
 0x486   :  { %2077 = vmatpush1.bf16.msra.mxu0 %v8255_v19 }
 0x487   :  { %2078 = vmatprep.subr.bf16.mxu0 %v8260_v20 }
 0x48a   :  { %2079 = vmatpush1.bf16.msra.mxu0 %v8258_v9  ;;  %v2527_v9 = vld [vmem:[%s10645_s9 + $0x80] sm:$0xff] }
 0x48b   :  { %2080 = vmatprep.subr.bf16.mxu0 %v8263_v21  ;;  %v2528_v21 = vld [vmem:[%s10645_s9 + $0x88] sm:$0xff] }
 0x48e   :  { %2081 = vmatpush1.bf16.msra.mxu0 %v8261_v22 }
 0x48f   :  { %2082 = vmatprep.subr.bf16.mxu0 %v8266_v23 }
 0x492   :  { %2083 = vmatpush1.bf16.msra.mxu0 %v8264_v24  ;;  %v8300_v24 = vld [vmem:[%s10681_s6 + $0x18] sm:$0xff]  }
 0x493   :  { %2084 = vmatprep.subr.bf16.mxu0 %v8269_v25  ;;  %v7660_v25 = vpack.c.bf16 %v2528_v21, %v2527_v9 }
 0x496   :  { %2085 = vmatpush1.bf16.msra.mxu0 %v8267_v26 }
 0x497   :  { %2086 = vmatprep.subr.bf16.mxu0 %v8272_v27  ;;  %v2511_v27 = vld [vmem:[%s10645_s9] sm:$0xff] }
 0x49a   :  { %2087 = vmatpush1.bf16.msra.mxu0 %v8270_v28  ;;  %v2512_v28 = vld [vmem:[%s10645_s9 + $0x8] sm:$0xff] }
 0x49b   :  { %2088 = vmatprep.subr.bf16.mxu0 %v8275_v29  ;;  %v2529_v29 = vld [vmem:[%s10645_s9 + $0x90] sm:$0xff] }
 0x49e   :  { %2089 = vmatpush1.bf16.msra.mxu0 %v8273_v31  ;;  %v2530_v31 = vld [vmem:[%s10645_s9 + $0x98] sm:$0xff] }
 0x49f   :  { %2090 = vmatprep.subr.bf16.mxu0 %v8278_v32  ;;  %v8301_v32 = vld [vmem:[%s10681_s6 + $0x20] sm:$0xff]  }
 0x4a2   :  { %2091 = vmatpush1.bf16.msra.mxu0 %v8276_v33  ;;  %v7662_v33 = vpack.c.bf16 %v2512_v28, %v2511_v27 }
 0x4a3   :  { %2092 = vmatprep.subr.bf16.mxu0 %v8281_v34  ;;  %v7664_v34 = vpack.c.bf16 %v2530_v31, %v2529_v29 }
 0x4a6   :  { %2093 = vmatpush1.bf16.msra.mxu0 %v8279_v35  ;;  %v2513_v35 = vld [vmem:[%s10645_s9 + $0x10] sm:$0xff] }
 0x4a7   :  { %2094 = vmatprep.subr.bf16.mxu0 %v8284_v36  ;;  %v2514_v36 = vld [vmem:[%s10645_s9 + $0x18] sm:$0xff] }
 0x4aa   :  { %2095 = vmatpush1.bf16.msra.mxu0 %v8282_v38  ;;  %v2531_v38 = vld [vmem:[%s10645_s9 + $0xa0] sm:$0xff] }
 0x4ab   :  { %2096 = vmatprep.subr.bf16.mxu0 %v8287_v39  ;;  %v2532_v39 = vld [vmem:[%s10645_s9 + $0xa8] sm:$0xff] }
 0x4ae   :  { %2097 = vmatpush1.bf16.msra.mxu0 %v8285_v41  ;;  %v7666_v41 = vpack.c.bf16 %v2514_v36, %v2513_v35 }
 0x4af   :  { %2098 = vmatprep.subr.bf16.mxu0 %v8290_v42  ;;  %v7668_v42 = vpack.c.bf16 %v2532_v39, %v2531_v38 }
 0x4b2   :  { %2099 = vmatpush1.bf16.msra.mxu0 %v8288_v43  ;;  %v2515_v43 = vld [vmem:[%s10645_s9 + $0x20] sm:$0xff] }
 0x4b3   :  { %2100 = vmatprep.subr.bf16.mxu0 %v8293_v44  ;;  %v2516_v44 = vld [vmem:[%s10645_s9 + $0x28] sm:$0xff] }
 0x4b6   :  { %2101 = vmatpush1.bf16.msra.mxu0 %v8291_v45  ;;  %v7670_v45 = vpack.c.bf16 %v2516_v44, %v2515_v43 }
 0x4b7   :  { %2102 = vmatprep.subr.bf16.mxu0 %v8296_v46  ;;  %v2533_v46 = vld [vmem:[%s10645_s9 + $0xb0] sm:$0xff] }
 0x4ba   :  { %2103 = vmatpush1.bf16.msra.mxu0 %v8294_v47  ;;  %v2534_v47 = vld [vmem:[%s10645_s9 + $0xb8] sm:$0xff] }
 0x4bd   :  { %2105 = vmatmul.mubr.bf16.vlgmr.msra.gmra.mrb[28].mxu0 %v9084_v10 }
 0x4be   :  { %2217 = vmatprep.mubr.bf16.mxu0 %v8451_v0 }
 0x4d0   :  { %v1983_v48 = vpop.f32.mrb[16].mxu0  ;;  %v2147_v49 = vpop.f32.mrb[12].mxu1 }
 0x4d1   :  { %v1985_v50 = vpop.f32.mrb[17].mxu0  ;;  %v2149_v51 = vpop.f32.mrb[13].mxu1  ;;  %v2154_v10 = vpack.c.bf16 %v1983_v48, %v1983_v48  ;;  %v2162_v22 = vpack.c.bf16 %v2147_v49, %v2147_v49  ;;  %v7672_v48 = vpack.c.bf16 %v2534_v47, %v2533_v46  ;;  %v2517_v49 = vld [vmem:[%s10645_s9 + $0x30] sm:$0xff] }
 0x4d2   :  { %v1987_v52 = vpop.f32.mrb[18].mxu0  ;;  %v2151_v53 = vpop.f32.mrb[14].mxu1  ;;  %v2155_v2 = vpack.c.bf16 %v1985_v50, %v1985_v50  ;;  %v2163_v23 = vpack.c.bf16 %v2149_v51, %v2149_v51  ;;  %v2518_v50 = vld [vmem:[%s10645_s9 + $0x38] sm:$0xff] }
 0x4d3   :  { %v1988_v54 = vpop.f32.mrb[19].mxu0  ;;  %v2152_v55 = vpop.f32.mrb[15].mxu1  ;;  %v2237_v4 = vsel %vm2178_vm6, %v2154_v10, 0  ;;  %v2425_v26 = vsel %vm2178_vm6, %v2162_v22, 0  ;;  %v7674_v51 = vpack.c.bf16 %v2518_v50, %v2517_v49  ;;  %v2535_v52 = vld [vmem:[%s10645_s9 + $0xc0] sm:$0xff]  ;;  %v2536_v53 = vld [vmem:[%s10645_s9 + $0xc8] sm:$0xff] }
 0x4d4   :  { %v7676_v54 = vpack.c.bf16 %v2536_v53, %v2535_v52  ;;  %v2519_v55 = vld [vmem:[%s10645_s9 + $0x40] sm:$0xff] }
 0x510   :  { %v2024_v58 = vpop.f32.mrb[20].mxu0 }
 0x511   :  { %v2156_v59 = vpack.c.bf16 %v2024_v58, %v2024_v58  ;;  %v2026_v60 = vpop.f32.mrb[21].mxu0  ;;  %v2520_v58 = vld [vmem:[%s10645_s9 + $0x48] sm:$0xff] }
 0x512   :  { %v2157_v61 = vpack.c.bf16 %v2026_v60, %v2026_v60  ;;  %v2028_v62 = vpop.f32.mrb[22].mxu0  ;;  %v2537_v60 = vld [vmem:[%s10645_s9 + $0xd0] sm:$0xff] }
 0x513   :  { %v2180_v63 = vsel %vm2178_vm6, %v2156_v59, 0  ;;  %v2029_v1 = vpop.f32.mrb[23].mxu0  ;;  %v7678_v59 = vpack.c.bf16 %v2520_v58, %v2519_v55  ;;  %v2635_v55 = vld [vmem:[%s10646_s10 + $0x18] sm:$0xff] }
 0x514   :  { %7194 = vmatprep.subr.msk.bf16.mxu0 %vm2178_vm6, %v2157_v61  ;;  %v2538_v61 = vld [vmem:[%s10645_s9 + $0xd8] sm:$0xff] }
 0x515   :  { %2186 = vmatpush1.bf16.msra.mxu0 %v2180_v63  ;;  %v7680_v62 = vpack.c.bf16 %v2538_v61, %v2537_v60  ;;  %v2521_v63 = vld [vmem:[%s10645_s9 + $0x50] sm:$0xff]  ;;  %v2522_v1 = vld [vmem:[%s10645_s9 + $0x58] sm:$0xff] }
 0x516   :  { %7197 = vmatprep.subr.msk.bf16.mxu0 %vm2178_vm6, %v2155_v2  ;;  %v7682_v10 = vpack.c.bf16 %v2522_v1, %v2521_v63  ;;  %v2539_v2 = vld [vmem:[%s10645_s9 + $0xe0] sm:$0xff]  ;;  %v2634_v60 = vld [vmem:[%s10646_s10 + $0x10] sm:$0xff]  ;;  %v2639_v63 = vld [vmem:[%s10646_s10 + $0x38] sm:$0xff] }
 0x518   :  { %7195 = vmatmul.mubr.msk.bf16.vlgmr.msra.gmra.mrb[32].mxu0 %vm2174_vm7, %v8297_v3  ;;  %v2540_v3 = vld [vmem:[%s10645_s9 + $0xe8] sm:$0xff] }
 0x519   :  { %2243 = vmatpush1.bf16.msra.mxu0 %v2237_v4  ;;  %2274 = vmatprep.mubr.bf16.mxu0 %v8451_v0  ;;  %v7684_v4 = vpack.c.bf16 %v2540_v3, %v2539_v2  ;;  %v2638_v2 = vld [vmem:[%s10646_s10 + $0x30] sm:$0xff] }
 0x524   :  { %7198 = vmatmul.mubr.msk.bf16.vlgmr.msra.gmra.mrb[32].mxu0 %vm2174_vm7, %v8298_v5  ;;  %v2523_v5 = vld [vmem:[%s10645_s9 + $0x60] sm:$0xff] }
 0x525   :  { %2334 = vmatprep.mubr.bf16.mxu0 %v8451_v0 }
 0x550   :  { %v2065_v6 = vpop.f32.mrb[24].mxu0 }
 0x551   :  { %v2158_v7 = vpack.c.bf16 %v2065_v6, %v2065_v6  ;;  %v2067_v8 = vpop.f32.mrb[25].mxu0  ;;  %v2524_v6 = vld [vmem:[%s10645_s9 + $0x68] sm:$0xff] }
 0x552   :  { %v2159_v37 = vpack.c.bf16 %v2067_v8, %v2067_v8  ;;  %v2069_v40 = vpop.f32.mrb[26].mxu0  ;;  %v2541_v8 = vld [vmem:[%s10645_s9 + $0xf0] sm:$0xff] }
 0x553   :  { %v2297_v11 = vsel %vm2178_vm6, %v2158_v7, 0  ;;  %v2070_v12 = vpop.f32.mrb[27].mxu0  ;;  %v7686_v7 = vpack.c.bf16 %v2524_v6, %v2523_v5  ;;  %v2525_v40 = vld [vmem:[%s10645_s9 + $0x70] sm:$0xff] }
 0x554   :  { %7202 = vmatprep.subr.msk.bf16.mxu0 %vm2178_vm6, %v2159_v37  ;;  %v2542_v37 = vld [vmem:[%s10645_s9 + $0xf8] sm:$0xff] }
 0x555   :  { %2303 = vmatpush1.bf16.msra.mxu0 %v2297_v11  ;;  %v7688_v11 = vpack.c.bf16 %v2542_v37, %v2541_v8  ;;  %v2526_v12 = vld [vmem:[%s10645_s9 + $0x78] sm:$0xff] }
 0x558   :  { %7203 = vmatmul.mubr.msk.bf16.vlgmr.msra.gmra.mrb[32].mxu0 %vm2174_vm7, %v8299_v13  ;;  %v7690_v13 = vpack.c.bf16 %v2526_v12, %v2525_v40 }
 0x559   :  { %2398 = vmatprep.mubr.bf16.mxu0 %v8451_v0 }
 0x590   :  { %v2106_v14 = vpop.f32.mrb[28].mxu0 }
 0x591   :  { %v2160_v15 = vpack.c.bf16 %v2106_v14, %v2106_v14  ;;  %v2108_v16 = vpop.f32.mrb[29].mxu0 }
 0x592   :  { %v2161_v17 = vpack.c.bf16 %v2108_v16, %v2108_v16  ;;  %v2110_v18 = vpop.f32.mrb[30].mxu0 }
 0x593   :  { %v2361_v19 = vsel %vm2178_vm6, %v2160_v15, 0  ;;  %v2111_v20 = vpop.f32.mrb[31].mxu0 }
 0x594   :  { %7207 = vmatprep.subr.msk.bf16.mxu0 %vm2178_vm6, %v2161_v17 }
 0x595   :  { %2367 = vmatpush1.bf16.msra.mxu0 %v2361_v19 }
 0x596   :  { %7212 = vmatprep.subr.msk.bf16.mxu0 %vm2178_vm6, %v2163_v23 }
 0x598   :  { %7208 = vmatmul.mubr.msk.bf16.vlgmr.msra.gmra.mrb[32].mxu0 %vm2174_vm7, %v8300_v24 }
 0x599   :  { %2431 = vmatpush1.bf16.msra.mxu0 %v2425_v26  ;;  %2462 = vmatprep.mubr.bf16.mxu0 %v8451_v0 }
 0x59a   :  { %7661 = vmatprep.subr.bf16.mxu0 %v7660_v25 }
 0x5a4   :  { %7213 = vmatmul.mubr.msk.bf16.vlgmr.msra.gmra.mrb[32].mxu0 %vm2174_vm7, %v8301_v32 }
 0x5a5   :  { %7663 = vmatpush3.bf16.msra.mxu0 %v7662_v33 }
 0x5a6   :  { %7665 = vmatprep.subr.bf16.mxu0 %v7664_v34 }
 0x5a9   :  { %7667 = vmatpush3.bf16.msra.mxu0 %v7666_v41 }
 0x5aa   :  { %7669 = vmatprep.subr.bf16.mxu0 %v7668_v42 }
 0x5ad   :  { %7671 = vmatpush3.bf16.msra.mxu0 %v7670_v45 }
 0x5ae   :  { %7673 = vmatprep.subr.bf16.mxu0 %v7672_v48 }
 0x5b1   :  { %7675 = vmatpush3.bf16.msra.mxu0 %v7674_v51 }
 0x5b2   :  { %7677 = vmatprep.subr.bf16.mxu0 %v7676_v54  ;;  %v2633_v54 = vld [vmem:[%s10646_s10 + $0x8] sm:$0xff] }
 0x5b3   :  { %v7692_v58 = vpack.c.bf16 %v2635_v55, %v2633_v54 }
 0x5b5   :  { %7679 = vmatpush3.bf16.msra.mxu0 %v7678_v59  ;;  %v2632_v59 = vld [vmem:[%s10646_s10] sm:$0xff]  ;;  %7693 = vmatprep.subr.bf16.mxu1 %v7692_v58 }
 0x5b6   :  { %7681 = vmatprep.subr.bf16.mxu0 %v7680_v62  ;;  %v7694_v61 = vpack.c.bf16 %v2634_v60, %v2632_v59  ;;  %v2637_v62 = vld [vmem:[%s10646_s10 + $0x28] sm:$0xff] }
 0x5b7   :  { %v7696_v1 = vpack.c.bf16 %v2639_v63, %v2637_v62 }
 0x5b8   :  { %7695 = vmatpush1.bf16.msra.mxu1 %v7694_v61 }
 0x5b9   :  { %7683 = vmatpush3.bf16.msra.mxu0 %v7682_v10  ;;  %v2636_v10 = vld [vmem:[%s10646_s10 + $0x20] sm:$0xff]  ;;  %7697 = vmatprep.subr.bf16.mxu1 %v7696_v1 }
 0x5ba   :  { %7685 = vmatprep.subr.bf16.mxu0 %v7684_v4  ;;  %v7698_v3 = vpack.c.bf16 %v2638_v2, %v2636_v10 }
 0x5bc   :  { %7699 = vmatpush1.bf16.msra.mxu1 %v7698_v3 }
 0x5bd   :  { %7687 = vmatpush3.bf16.msra.mxu0 %v7686_v7 }
 0x5be   :  { %7689 = vmatprep.subr.bf16.mxu0 %v7688_v11 }
 0x5c1   :  { %7691 = vmatpush3.bf16.msra.mxu0 %v7690_v13  ;;  %v2619_v13 = vld [vmem:[%s10644_s8] sm:$0x3] }
 0x677   :  { %v9510_v14 = vpop.f32.mrb[32].mxu0 }
 0x678   :  { %v9512_v15 = vpop.f32.mrb[33].mxu0  ;;  %v2491_v17 = vmul.f32 %v9510_v14, %v9510_v14 }
 0x679   :  { %v9514_v16 = vpop.f32.mrb[34].mxu0  ;;  %v2492_v9 = vmul.f32 %v9512_v15, %v9512_v15 }
 0x67a   :  { %v2477_v18 = vadd.f32 %v9514_v16, %v9510_v14  ;;  %v2493_v19 = vmul.f32 %v9514_v16, %v9514_v16  ;;  %v9522_v20 = vpop.f32.mrb[35].mxu0 }
 0x67b   :  { %v2484_v21 = vadd.f32 %v9522_v20, %v9512_v15  ;;  %v2494_v22 = vmul.f32 %v9522_v20, %v9522_v20 }
 0x67c   :  { %v2478_v23 = vrot.slane %v2477_v18, 4  ;;  %v2495_v24 = vadd.f32 %v2493_v19, %v2491_v17 }
 0x67d   :  { %v2485_v25 = vrot.slane %v2484_v21, 4  ;;  %v2502_v26 = vadd.f32 %v2494_v22, %v2492_v9 }
 0x67e   :  { %v2479_v27 = vadd.f32 %v2478_v23, %v2477_v18  ;;  %v2496_v28 = vrot.slane %v2495_v24, 4 }
 0x67f   :  { %v2486_v29 = vadd.f32 %v2485_v25, %v2484_v21  ;;  %v2503_v31 = vrot.slane %v2502_v26, 4 }
 0x680   :  { %v2480_v32 = vrot.slane %v2479_v27, 2  ;;  %v2497_v33 = vadd.f32 %v2496_v28, %v2495_v24 }
 0x681   :  { %v2487_v34 = vrot.slane %v2486_v29, 2  ;;  %v2504_v35 = vadd.f32 %v2503_v31, %v2502_v26 }
 0x682   :  { %v2481_v36 = vadd.f32 %v2480_v32, %v2479_v27  ;;  %v2498_v38 = vrot.slane %v2497_v33, 2 }
 0x683   :  { %v2488_v39 = vadd.f32 %v2487_v34, %v2486_v29  ;;  %v2505_v41 = vrot.slane %v2504_v35, 2 }
 0x684   :  { %v2482_v42 = vrot.slane %v2481_v36, 1  ;;  %v2499_v43 = vadd.f32 %v2498_v38, %v2497_v33 }
 0x685   :  { %v2489_v44 = vrot.slane %v2488_v39, 1  ;;  %v2506_v45 = vadd.f32 %v2505_v41, %v2504_v35 }
 0x686   :  { %v2500_v46 = vrot.slane %v2499_v43, 1  ;;  %v2483_v48 = vadd.f32 %v2482_v42, %v2481_v36 }
 0x687   :  { %v2507_v47 = vrot.slane %v2506_v45, 1  ;;  %v2490_v50 = vadd.f32 %v2489_v44, %v2488_v39 }
 0x688   :  { %v2501_v49 = vadd.f32 %v2500_v46, %v2499_v43 }
 0x689   :  { %v2508_v51 = vadd.f32 %v2507_v47, %v2506_v45 }
 0x68a   :  { %v2509_v52 = vsel %vm461_vm1, %v2483_v48, %v2501_v49 }
 0x68b   :  { %v2510_v53 = vsel %vm461_vm1, %v2490_v50, %v2508_v51 }
 0x68c   :  { %2607 = vmatprep.mubr.f32.mxu0 %v2510_v53 }
 0x68d   :  { %2608 = vmatmul.mubr.f32.vlgmr.msra.gmra.mrb[36].mxu0 %v2509_v52 }
 0x760   :  { %v7539_v4 = vpop.f32.mrb[36].mxu0 }
 0x761   :  { %v7540_v5 = vpop.f32.mrb[37].mxu0 }
 0x762   :  { %v7541_v6 = vadd.f32 %v7540_v5, %v7539_v4 }
 0x764   :  { %v2613_v7 = vmul.f32 0.0078125, %v7541_v6 }
 0x766   :  { %v2614_v8 = vmul.f32 %v2613_v7, %v2613_v7 }
 0x768   :  { %v2616_v37 = vrot.slane %v2614_v8, 7 }
 0x76a   :  { %v2618_v40 = vsub.f32 %v2613_v7, %v2616_v37 }
 0x76c   :  { %v2620_v11 = vadd.f32 1e-05, %v2618_v40 }
 0x76e   :  { %8304 = vrsqrt.f32 %v2620_v11 }
 0x778   :  { %v8305_v12 = vpop.eup %8304 }
 0x779   :  { %v2623_v17 = vrot.slane %v8305_v12, 1 }
 0x77b   :  { %v2625_v18 = vmul.f32 %v2623_v17, %v2619_v13 }
 0x77d   :  { %v2626_v19 = vmul.f32 %v2625_v18, %v2613_v7 }
 0x77f   :  { %v2628_v9 = vrot.slane %v2626_v19, 7 }
 0x781   :  { %v2630_v21 = vsub.f32 %v2619_v13, %v2628_v9 }
 0x783   :  { %v2631_v22 = vsel %vm461_vm1, %v2625_v18, %v2630_v21 }
 0x784   :  { %7214 = vmatmul.mubr.msk.f32.vlgmr.msra.gmra.mrb[16].mxu1 %vm2640_vm8, %v2631_v22 }
 0x857   :  { %v2710_v23 = vpop.f32.mrb[16].mxu1 }
 0x858   :  { %v2718_v24 = vrot.slane %v2710_v23, %v9069_v56  ;;  %v2712_v25 = vpop.f32.mrb[17].mxu1  ;;  %v2730_v29 = vrot.slane %v2710_v23, %v9071_v57 }
 0x859   :  { %v2722_v26 = vrot.slane %v2712_v25, %v9069_v56  ;;  %v2734_v33 = vrot.slane %v2712_v25, %v9071_v57 }
 0x85a   :  { %v2723_v27 = vmul.f32 %v2718_v24, %v9510_v14  ;;  %v2725_v28 = vmul.f32 %v2718_v24, %v9514_v16 }
 0x85b   :  { %v2724_v31 = vmul.f32 %v2722_v26, %v9512_v15  ;;  %v2726_v32 = vmul.f32 %v2722_v26, %v9522_v20 }
 0x85c   :  { %v2735_v34 = vadd.f32 %v2730_v29, %v2723_v27  ;;  %v2737_v35 = vadd.f32 %v2730_v29, %v2725_v28 }
 0x85d   :  { %v2736_v36 = vadd.f32 %v2734_v33, %v2724_v31  ;;  %v2738_v38 = vadd.f32 %v2734_v33, %v2726_v32 }
 0x85e   :  { %vm2739_vm9 = vcmp.ge.f32.partialorder %v2735_v34, 0.0  ;;  %vm2741_vm10 = vcmp.ge.f32.partialorder %v2737_v35, 0.0  ;;  %v2743_v39 = vmul.f32 0.2, %v2735_v34  ;;  %v2745_v41 = vmul.f32 0.2, %v2737_v35 }
 0x85f   :  { %vm2740_vm11 = vcmp.ge.f32.partialorder %v2736_v36, 0.0  ;;  %vm2742_vm12 = vcmp.ge.f32.partialorder %v2738_v38, 0.0  ;;  %v2744_v14 = vmul.f32 0.2, %v2736_v36  ;;  %v2746_v16 = vmul.f32 0.2, %v2738_v38 }
 0x860   :  { %v2747_v42 = vsel %vm2739_vm9, %v2735_v34, %v2743_v39  ;;  %v2749_v43 = vsel %vm2741_vm10, %v2737_v35, %v2745_v41 }
 0x861   :  { %v9569_v44 = vpack.c.bf16 %v2749_v43, %v2747_v42  ;;  %v2748_v15 = vsel %vm2740_vm11, %v2736_v36, %v2744_v14  ;;  %v2750_v20 = vsel %vm2742_vm12, %v2738_v38, %v2746_v16 }
 0x862   :  { %v9571_v45 = vpack.c.bf16 %v2750_v20, %v2748_v15 }
 0x863   :  { %8444 = dma.done.wait [#allocation5], 20480 }
 0x864   :  { %8445 = vsyncadd [#allocation5], 4294946816  ;;  %2949 = vmatprep.mubr.bf16.mxu1 %v9571_v45  ;;  %2992 = vmatprep.mubr.bf16.mxu0 %v9571_v45  ;;  %v2758_v46 = vld [vmem:[#allocation2 + $0x8] sm:$0xff]  ;;  %v2760_v47 = vld [vmem:[#allocation2 + $0x18] sm:$0xff] }
 0x865   :  { %v2757_v48 = vld [vmem:[#allocation2] sm:$0xff]  ;;  %2917 = vmatprep.subr.bf16.mxu1 %v2758_v46  ;;  %2960 = vmatprep.subr.bf16.mxu0 %v2760_v47  ;;  %v2759_v49 = vld [vmem:[#allocation2 + $0x10] sm:$0xff]  ;;  %v2768_v50 = vld [vmem:[#allocation2 + $0x58] sm:$0xff] }
 0x866   :  { %v2770_v51 = vld [vmem:[#allocation2 + $0x68] sm:$0xff]  ;;  %2918 = vmatpush1.bf16.msra.mxu1 %v2757_v48  ;;  %2961 = vmatpush1.bf16.msra.mxu0 %v2759_v49  ;;  %v2767_v52 = vld [vmem:[#allocation2 + $0x50] sm:$0xff]  ;;  %v2769_v53 = vld [vmem:[#allocation2 + $0x60] sm:$0xff] }
 0x867   :  { %2919 = vmatprep.subr.bf16.mxu1 %v2768_v50  ;;  %2962 = vmatprep.subr.bf16.mxu0 %v2770_v51  ;;  %v2778_v54 = vld [vmem:[#allocation2 + $0xa8] sm:$0xff]  ;;  %v2780_v55 = vld [vmem:[#allocation2 + $0xb8] sm:$0xff]  ;;  %v2777_v58 = vld [vmem:[#allocation2 + $0xa0] sm:$0xff] }
 0x868   :  { %v2779_v59 = vld [vmem:[#allocation2 + $0xb0] sm:$0xff]  ;;  %v2788_v60 = vld [vmem:[#allocation2 + $0xf8] sm:$0xff]  ;;  %v2790_v61 = vld [vmem:[#allocation2 + $0x108] sm:$0xff] }
 0x869   :  { %v2787_v62 = vld [vmem:[#allocation2 + $0xf0] sm:$0xff]  ;;  %v2789_v63 = vld [vmem:[#allocation2 + $0x100] sm:$0xff]  ;;  %v2798_v1 = vld [vmem:[#allocation2 + $0x148] sm:$0xff] }
 0x86a   :  { %2920 = vmatpush1.bf16.msra.mxu1 %v2767_v52  ;;  %2963 = vmatpush1.bf16.msra.mxu0 %v2769_v53  ;;  %v2800_v10 = vld [vmem:[#allocation2 + $0x158] sm:$0xff]  ;;  %v2797_v2 = vld [vmem:[#allocation2 + $0x140] sm:$0xff]  ;;  %v2799_v3 = vld [vmem:[#allocation2 + $0x150] sm:$0xff] }
 0x86b   :  { %2921 = vmatprep.subr.bf16.mxu1 %v2778_v54  ;;  %2964 = vmatprep.subr.bf16.mxu0 %v2780_v55  ;;  %v2808_v4 = vld [vmem:[#allocation2 + $0x198] sm:$0xff]  ;;  %v2810_v5 = vld [vmem:[#allocation2 + $0x1a8] sm:$0xff]  ;;  %v2807_v6 = vld [vmem:[#allocation2 + $0x190] sm:$0xff] }
 0x86c   :  { %v2809_v7 = vld [vmem:[#allocation2 + $0x1a0] sm:$0xff]  ;;  %v2818_v8 = vld [vmem:[#allocation2 + $0x1e8] sm:$0xff]  ;;  %v2820_v37 = vld [vmem:[#allocation2 + $0x1f8] sm:$0xff] }
 0x86d   :  { %v2817_v40 = vld [vmem:[#allocation2 + $0x1e0] sm:$0xff]  ;;  %v2819_v11 = vld [vmem:[#allocation2 + $0x1f0] sm:$0xff]  ;;  %v2828_v12 = vld [vmem:[#allocation2 + $0x238] sm:$0xff] }
 0x86e   :  { %2922 = vmatpush1.bf16.msra.mxu1 %v2777_v58  ;;  %2965 = vmatpush1.bf16.msra.mxu0 %v2779_v59  ;;  %v2830_v13 = vld [vmem:[#allocation2 + $0x248] sm:$0xff]  ;;  %v2827_v17 = vld [vmem:[#allocation2 + $0x230] sm:$0xff]  ;;  %v2829_v18 = vld [vmem:[#allocation2 + $0x240] sm:$0xff] }
 0x86f   :  { %2923 = vmatprep.subr.bf16.mxu1 %v2788_v60  ;;  %2966 = vmatprep.subr.bf16.mxu0 %v2790_v61  ;;  %v2838_v19 = vld [vmem:[#allocation2 + $0x288] sm:$0xff]  ;;  %v2840_v9 = vld [vmem:[#allocation2 + $0x298] sm:$0xff]  ;;  %v2837_v21 = vld [vmem:[#allocation2 + $0x280] sm:$0xff] }
 0x870   :  { %v2839_v22 = vld [vmem:[#allocation2 + $0x290] sm:$0xff]  ;;  %v2848_v23 = vld [vmem:[#allocation2 + $0x2d8] sm:$0xff]  ;;  %v2850_v24 = vld [vmem:[#allocation2 + $0x2e8] sm:$0xff] }
 0x871   :  { %v2847_v25 = vld [vmem:[#allocation2 + $0x2d0] sm:$0xff]  ;;  %v2849_v26 = vld [vmem:[#allocation2 + $0x2e0] sm:$0xff]  ;;  %v2858_v27 = vld [vmem:[#allocation2 + $0x328] sm:$0xff] }
 0x872   :  { %2924 = vmatpush1.bf16.msra.mxu1 %v2787_v62  ;;  %2967 = vmatpush1.bf16.msra.mxu0 %v2789_v63  ;;  %v2860_v28 = vld [vmem:[#allocation2 + $0x338] sm:$0xff]  ;;  %v2857_v29 = vld [vmem:[#allocation2 + $0x320] sm:$0xff]  ;;  %v2859_v31 = vld [vmem:[#allocation2 + $0x330] sm:$0xff] }
 0x873   :  { %2925 = vmatprep.subr.bf16.mxu1 %v2798_v1  ;;  %2968 = vmatprep.subr.bf16.mxu0 %v2800_v10  ;;  %v2868_v32 = vld [vmem:[#allocation2 + $0x378] sm:$0xff]  ;;  %v2870_v33 = vld [vmem:[#allocation2 + $0x388] sm:$0xff]  ;;  %v2867_v34 = vld [vmem:[#allocation2 + $0x370] sm:$0xff] }
 0x874   :  { %v2869_v35 = vld [vmem:[#allocation2 + $0x380] sm:$0xff]  ;;  %v2878_v36 = vld [vmem:[#allocation2 + $0x3c8] sm:$0xff]  ;;  %v2880_v38 = vld [vmem:[#allocation2 + $0x3d8] sm:$0xff] }
 0x875   :  { %v2877_v39 = vld [vmem:[#allocation2 + $0x3c0] sm:$0xff]  ;;  %v2879_v41 = vld [vmem:[#allocation2 + $0x3d0] sm:$0xff]  ;;  %v2888_v14 = vld [vmem:[#allocation2 + $0x418] sm:$0xff] }
 0x876   :  { %2926 = vmatpush1.bf16.msra.mxu1 %v2797_v2  ;;  %2969 = vmatpush1.bf16.msra.mxu0 %v2799_v3  ;;  %v2890_v16 = vld [vmem:[#allocation2 + $0x428] sm:$0xff]  ;;  %v2887_v42 = vld [vmem:[#allocation2 + $0x410] sm:$0xff]  ;;  %v2889_v43 = vld [vmem:[#allocation2 + $0x420] sm:$0xff] }
 0x877   :  { %2927 = vmatprep.subr.bf16.mxu1 %v2808_v4  ;;  %2970 = vmatprep.subr.bf16.mxu0 %v2810_v5  ;;  %v2898_v15 = vld [vmem:[#allocation2 + $0x468] sm:$0xff]  ;;  %v2900_v20 = vld [vmem:[#allocation2 + $0x478] sm:$0xff]  ;;  %v2897_v46 = vld [vmem:[#allocation2 + $0x460] sm:$0xff] }
 0x878   :  { %v2899_v47 = vld [vmem:[#allocation2 + $0x470] sm:$0xff]  ;;  %v2908_v48 = vld [vmem:[#allocation2 + $0x4b8] sm:$0xff]  ;;  %v2910_v49 = vld [vmem:[#allocation2 + $0x4c8] sm:$0xff] }
 0x879   :  { %v2907_v50 = vld [vmem:[#allocation2 + $0x4b0] sm:$0xff]  ;;  %v2909_v51 = vld [vmem:[#allocation2 + $0x4c0] sm:$0xff]  ;;  %v2762_v52 = vld [vmem:[#allocation2 + $0x28] sm:$0xff] }
 0x87a   :  { %2928 = vmatpush1.bf16.msra.mxu1 %v2807_v6  ;;  %2971 = vmatpush1.bf16.msra.mxu0 %v2809_v7  ;;  %v2764_v53 = vld [vmem:[#allocation2 + $0x38] sm:$0xff]  ;;  %v2761_v54 = vld [vmem:[#allocation2 + $0x20] sm:$0xff]  ;;  %v2763_v55 = vld [vmem:[#allocation2 + $0x30] sm:$0xff] }
 0x87b   :  { %2929 = vmatprep.subr.bf16.mxu1 %v2818_v8  ;;  %2972 = vmatprep.subr.bf16.mxu0 %v2820_v37  ;;  %v2772_v58 = vld [vmem:[#allocation2 + $0x78] sm:$0xff]  ;;  %v2774_v59 = vld [vmem:[#allocation2 + $0x88] sm:$0xff]  ;;  %v2771_v60 = vld [vmem:[#allocation2 + $0x70] sm:$0xff] }
 0x87c   :  { %v2773_v61 = vld [vmem:[#allocation2 + $0x80] sm:$0xff]  ;;  %v2782_v62 = vld [vmem:[#allocation2 + $0xc8] sm:$0xff]  ;;  %v2784_v63 = vld [vmem:[#allocation2 + $0xd8] sm:$0xff] }
 0x87d   :  { %v2781_v1 = vld [vmem:[#allocation2 + $0xc0] sm:$0xff]  ;;  %v2783_v10 = vld [vmem:[#allocation2 + $0xd0] sm:$0xff]  ;;  %v2792_v2 = vld [vmem:[#allocation2 + $0x118] sm:$0xff] }
 0x87e   :  { %2930 = vmatpush1.bf16.msra.mxu1 %v2817_v40  ;;  %2973 = vmatpush1.bf16.msra.mxu0 %v2819_v11  ;;  %v2794_v3 = vld [vmem:[#allocation2 + $0x128] sm:$0xff]  ;;  %v2791_v4 = vld [vmem:[#allocation2 + $0x110] sm:$0xff]  ;;  %v2793_v5 = vld [vmem:[#allocation2 + $0x120] sm:$0xff] }
 0x87f   :  { %2931 = vmatprep.subr.bf16.mxu1 %v2828_v12  ;;  %2974 = vmatprep.subr.bf16.mxu0 %v2830_v13  ;;  %v2802_v6 = vld [vmem:[#allocation2 + $0x168] sm:$0xff]  ;;  %v2804_v7 = vld [vmem:[#allocation2 + $0x178] sm:$0xff]  ;;  %v2801_v8 = vld [vmem:[#allocation2 + $0x160] sm:$0xff] }
 0x880   :  { %v2803_v37 = vld [vmem:[#allocation2 + $0x170] sm:$0xff]  ;;  %v2812_v40 = vld [vmem:[#allocation2 + $0x1b8] sm:$0xff]  ;;  %v2814_v11 = vld [vmem:[#allocation2 + $0x1c8] sm:$0xff] }
 0x881   :  { %v2811_v12 = vld [vmem:[#allocation2 + $0x1b0] sm:$0xff]  ;;  %v2813_v13 = vld [vmem:[#allocation2 + $0x1c0] sm:$0xff] }
 0x882   :  { %2932 = vmatpush1.bf16.msra.mxu1 %v2827_v17  ;;  %2975 = vmatpush1.bf16.msra.mxu0 %v2829_v18  ;;  %v2822_v17 = vld [vmem:[#allocation2 + $0x208] sm:$0xff]  ;;  %v2824_v18 = vld [vmem:[#allocation2 + $0x218] sm:$0xff] }
 0x883   :  { %2933 = vmatprep.subr.bf16.mxu1 %v2838_v19  ;;  %2976 = vmatprep.subr.bf16.mxu0 %v2840_v9  ;;  %v2821_v19 = vld [vmem:[#allocation2 + $0x200] sm:$0xff]  ;;  %v2823_v9 = vld [vmem:[#allocation2 + $0x210] sm:$0xff] }
 0x886   :  { %2934 = vmatpush1.bf16.msra.mxu1 %v2837_v21  ;;  %2977 = vmatpush1.bf16.msra.mxu0 %v2839_v22  ;;  %v2832_v21 = vld [vmem:[#allocation2 + $0x258] sm:$0xff]  ;;  %v2834_v22 = vld [vmem:[#allocation2 + $0x268] sm:$0xff] }
 0x887   :  { %2935 = vmatprep.subr.bf16.mxu1 %v2848_v23  ;;  %2978 = vmatprep.subr.bf16.mxu0 %v2850_v24  ;;  %v2831_v23 = vld [vmem:[#allocation2 + $0x250] sm:$0xff]  ;;  %v2833_v24 = vld [vmem:[#allocation2 + $0x260] sm:$0xff] }
 0x88a   :  { %2936 = vmatpush1.bf16.msra.mxu1 %v2847_v25  ;;  %2979 = vmatpush1.bf16.msra.mxu0 %v2849_v26  ;;  %v2842_v25 = vld [vmem:[#allocation2 + $0x2a8] sm:$0xff]  ;;  %v2844_v26 = vld [vmem:[#allocation2 + $0x2b8] sm:$0xff] }
 0x88b   :  { %2937 = vmatprep.subr.bf16.mxu1 %v2858_v27  ;;  %2980 = vmatprep.subr.bf16.mxu0 %v2860_v28  ;;  %v2841_v27 = vld [vmem:[#allocation2 + $0x2a0] sm:$0xff]  ;;  %v2843_v28 = vld [vmem:[#allocation2 + $0x2b0] sm:$0xff] }
 0x88e   :  { %2938 = vmatpush1.bf16.msra.mxu1 %v2857_v29  ;;  %2981 = vmatpush1.bf16.msra.mxu0 %v2859_v31  ;;  %v2852_v29 = vld [vmem:[#allocation2 + $0x2f8] sm:$0xff]  ;;  %v2854_v31 = vld [vmem:[#allocation2 + $0x308] sm:$0xff] }
 0x88f   :  { %2939 = vmatprep.subr.bf16.mxu1 %v2868_v32  ;;  %2982 = vmatprep.subr.bf16.mxu0 %v2870_v33  ;;  %v2851_v32 = vld [vmem:[#allocation2 + $0x2f0] sm:$0xff]  ;;  %v2853_v33 = vld [vmem:[#allocation2 + $0x300] sm:$0xff] }
 0x892   :  { %2940 = vmatpush1.bf16.msra.mxu1 %v2867_v34  ;;  %2983 = vmatpush1.bf16.msra.mxu0 %v2869_v35  ;;  %v2862_v34 = vld [vmem:[#allocation2 + $0x348] sm:$0xff]  ;;  %v2864_v35 = vld [vmem:[#allocation2 + $0x358] sm:$0xff] }
 0x893   :  { %2941 = vmatprep.subr.bf16.mxu1 %v2878_v36  ;;  %2984 = vmatprep.subr.bf16.mxu0 %v2880_v38  ;;  %v2861_v36 = vld [vmem:[#allocation2 + $0x340] sm:$0xff]  ;;  %v2863_v38 = vld [vmem:[#allocation2 + $0x350] sm:$0xff] }
 0x896   :  { %2942 = vmatpush1.bf16.msra.mxu1 %v2877_v39  ;;  %2985 = vmatpush1.bf16.msra.mxu0 %v2879_v41  ;;  %v2872_v39 = vld [vmem:[#allocation2 + $0x398] sm:$0xff]  ;;  %v2874_v41 = vld [vmem:[#allocation2 + $0x3a8] sm:$0xff] }
 0x897   :  { %2943 = vmatprep.subr.bf16.mxu1 %v2888_v14  ;;  %2986 = vmatprep.subr.bf16.mxu0 %v2890_v16  ;;  %v2871_v14 = vld [vmem:[#allocation2 + $0x390] sm:$0xff]  ;;  %v2873_v16 = vld [vmem:[#allocation2 + $0x3a0] sm:$0xff] }
 0x89a   :  { %2944 = vmatpush1.bf16.msra.mxu1 %v2887_v42  ;;  %2987 = vmatpush1.bf16.msra.mxu0 %v2889_v43  ;;  %v2882_v42 = vld [vmem:[#allocation2 + $0x3e8] sm:$0xff]  ;;  %v2884_v43 = vld [vmem:[#allocation2 + $0x3f8] sm:$0xff] }
 0x89b   :  { %2945 = vmatprep.subr.bf16.mxu1 %v2898_v15  ;;  %2988 = vmatprep.subr.bf16.mxu0 %v2900_v20  ;;  %v2881_v15 = vld [vmem:[#allocation2 + $0x3e0] sm:$0xff]  ;;  %v2883_v20 = vld [vmem:[#allocation2 + $0x3f0] sm:$0xff] }
 0x89e   :  { %2946 = vmatpush1.bf16.msra.mxu1 %v2897_v46  ;;  %2989 = vmatpush1.bf16.msra.mxu0 %v2899_v47  ;;  %v2892_v46 = vld [vmem:[#allocation2 + $0x438] sm:$0xff]  ;;  %v2894_v47 = vld [vmem:[#allocation2 + $0x448] sm:$0xff] }
 0x89f   :  { %2947 = vmatprep.subr.bf16.mxu1 %v2908_v48  ;;  %2990 = vmatprep.subr.bf16.mxu0 %v2910_v49  ;;  %v2891_v48 = vld [vmem:[#allocation2 + $0x430] sm:$0xff]  ;;  %v2893_v49 = vld [vmem:[#allocation2 + $0x440] sm:$0xff] }
 0x8a2   :  { %2948 = vmatpush1.bf16.msra.mxu1 %v2907_v50  ;;  %2991 = vmatpush1.bf16.msra.mxu0 %v2909_v51  ;;  %v2902_v50 = vld [vmem:[#allocation2 + $0x488] sm:$0xff]  ;;  %v2904_v51 = vld [vmem:[#allocation2 + $0x498] sm:$0xff] }
 0x8a3   :  { %3003 = vmatprep.subr.bf16.mxu1 %v2762_v52  ;;  %3046 = vmatprep.subr.bf16.mxu0 %v2764_v53  ;;  %v2901_v52 = vld [vmem:[#allocation2 + $0x480] sm:$0xff]  ;;  %v2903_v53 = vld [vmem:[#allocation2 + $0x490] sm:$0xff] }
 0x8a5   :  { %2950 = vmatmul.mubr.bf16.vlgmr.msra.gmra.mrb[20].mxu1 %v9569_v44  ;;  %2993 = vmatmul.mubr.bf16.vlgmr.msra.gmra.mrb[40].mxu0 %v9569_v44 }
 0x8a6   :  { %3004 = vmatpush1.bf16.msra.mxu1 %v2761_v54  ;;  %3047 = vmatpush1.bf16.msra.mxu0 %v2763_v55  ;;  %v2912_v54 = vld [vmem:[#allocation2 + $0x4d8] sm:$0xff]  ;;  %v2914_v55 = vld [vmem:[#allocation2 + $0x4e8] sm:$0xff] }
 0x8a7   :  { %3005 = vmatprep.subr.bf16.mxu1 %v2772_v58  ;;  %3048 = vmatprep.subr.bf16.mxu0 %v2774_v59  ;;  %v2911_v58 = vld [vmem:[#allocation2 + $0x4d0] sm:$0xff]  ;;  %v2913_v59 = vld [vmem:[#allocation2 + $0x4e0] sm:$0xff] }
 0x8a8   :  { %3035 = vmatprep.mubr.bf16.mxu1 %v9571_v45  ;;  %3078 = vmatprep.mubr.bf16.mxu0 %v9571_v45 }
 0x8aa   :  { %3006 = vmatpush1.bf16.msra.mxu1 %v2771_v60  ;;  %3049 = vmatpush1.bf16.msra.mxu0 %v2773_v61  ;;  %v2766_v60 = vld [vmem:[#allocation2 + $0x48] sm:$0xff]  ;;  %v2765_v61 = vld [vmem:[#allocation2 + $0x40] sm:$0xff] }
 0x8ab   :  { %3007 = vmatprep.subr.bf16.mxu1 %v2782_v62  ;;  %3050 = vmatprep.subr.bf16.mxu0 %v2784_v63  ;;  %v2776_v62 = vld [vmem:[#allocation2 + $0x98] sm:$0xff]  ;;  %v2775_v63 = vld [vmem:[#allocation2 + $0x90] sm:$0xff] }
 0x8ae   :  { %3008 = vmatpush1.bf16.msra.mxu1 %v2781_v1  ;;  %3051 = vmatpush1.bf16.msra.mxu0 %v2783_v10  ;;  %v2786_v1 = vld [vmem:[#allocation2 + $0xe8] sm:$0xff]  ;;  %v2785_v10 = vld [vmem:[#allocation2 + $0xe0] sm:$0xff] }
 0x8af   :  { %3009 = vmatprep.subr.bf16.mxu1 %v2792_v2  ;;  %3052 = vmatprep.subr.bf16.mxu0 %v2794_v3  ;;  %v2796_v2 = vld [vmem:[#allocation2 + $0x138] sm:$0xff]  ;;  %v2795_v3 = vld [vmem:[#allocation2 + $0x130] sm:$0xff] }
 0x8b2   :  { %3010 = vmatpush1.bf16.msra.mxu1 %v2791_v4  ;;  %3053 = vmatpush1.bf16.msra.mxu0 %v2793_v5  ;;  %v2806_v4 = vld [vmem:[#allocation2 + $0x188] sm:$0xff]  ;;  %v2805_v5 = vld [vmem:[#allocation2 + $0x180] sm:$0xff] }
 0x8b3   :  { %3011 = vmatprep.subr.bf16.mxu1 %v2802_v6  ;;  %3054 = vmatprep.subr.bf16.mxu0 %v2804_v7  ;;  %v2816_v6 = vld [vmem:[#allocation2 + $0x1d8] sm:$0xff]  ;;  %v2826_v7 = vld [vmem:[#allocation2 + $0x228] sm:$0xff] }
 0x8b6   :  { %3012 = vmatpush1.bf16.msra.mxu1 %v2801_v8  ;;  %3055 = vmatpush1.bf16.msra.mxu0 %v2803_v37  ;;  %v2825_v8 = vld [vmem:[#allocation2 + $0x220] sm:$0xff]  ;;  %v2836_v37 = vld [vmem:[#allocation2 + $0x278] sm:$0xff] }
 0x8b7   :  { %3013 = vmatprep.subr.bf16.mxu1 %v2812_v40  ;;  %3056 = vmatprep.subr.bf16.mxu0 %v2814_v11  ;;  %v2835_v40 = vld [vmem:[#allocation2 + $0x270] sm:$0xff]  ;;  %v2846_v11 = vld [vmem:[#allocation2 + $0x2c8] sm:$0xff] }
 0x8ba   :  { %3014 = vmatpush1.bf16.msra.mxu1 %v2811_v12  ;;  %3057 = vmatpush1.bf16.msra.mxu0 %v2813_v13  ;;  %v2845_v12 = vld [vmem:[#allocation2 + $0x2c0] sm:$0xff]  ;;  %v2856_v13 = vld [vmem:[#allocation2 + $0x318] sm:$0xff] }
 0x8bb   :  { %3015 = vmatprep.subr.bf16.mxu1 %v2822_v17  ;;  %3058 = vmatprep.subr.bf16.mxu0 %v2824_v18  ;;  %v2855_v17 = vld [vmem:[#allocation2 + $0x310] sm:$0xff]  ;;  %v2866_v18 = vld [vmem:[#allocation2 + $0x368] sm:$0xff] }
 0x8be   :  { %3016 = vmatpush1.bf16.msra.mxu1 %v2821_v19  ;;  %3059 = vmatpush1.bf16.msra.mxu0 %v2823_v9  ;;  %v2865_v19 = vld [vmem:[#allocation2 + $0x360] sm:$0xff]  ;;  %v2876_v9 = vld [vmem:[#allocation2 + $0x3b8] sm:$0xff] }
 0x8bf   :  { %3017 = vmatprep.subr.bf16.mxu1 %v2832_v21  ;;  %3060 = vmatprep.subr.bf16.mxu0 %v2834_v22  ;;  %v2875_v21 = vld [vmem:[#allocation2 + $0x3b0] sm:$0xff]  ;;  %v2886_v22 = vld [vmem:[#allocation2 + $0x408] sm:$0xff] }
 0x8c2   :  { %3018 = vmatpush1.bf16.msra.mxu1 %v2831_v23  ;;  %3061 = vmatpush1.bf16.msra.mxu0 %v2833_v24  ;;  %v2885_v23 = vld [vmem:[#allocation2 + $0x400] sm:$0xff]  ;;  %v2896_v24 = vld [vmem:[#allocation2 + $0x458] sm:$0xff] }
 0x8c3   :  { %3019 = vmatprep.subr.bf16.mxu1 %v2842_v25  ;;  %3062 = vmatprep.subr.bf16.mxu0 %v2844_v26  ;;  %v2895_v25 = vld [vmem:[#allocation2 + $0x450] sm:$0xff]  ;;  %v2906_v26 = vld [vmem:[#allocation2 + $0x4a8] sm:$0xff] }
 0x8c6   :  { %3020 = vmatpush1.bf16.msra.mxu1 %v2841_v27  ;;  %3063 = vmatpush1.bf16.msra.mxu0 %v2843_v28  ;;  %v2905_v27 = vld [vmem:[#allocation2 + $0x4a0] sm:$0xff]  ;;  %v2916_v28 = vld [vmem:[#allocation2 + $0x4f8] sm:$0xff] }
 0x8c7   :  { %3021 = vmatprep.subr.bf16.mxu1 %v2852_v29  ;;  %3064 = vmatprep.subr.bf16.mxu0 %v2854_v31  ;;  %v2915_v29 = vld [vmem:[#allocation2 + $0x4f0] sm:$0xff] }
 0x8ca   :  { %3022 = vmatpush1.bf16.msra.mxu1 %v2851_v32  ;;  %3065 = vmatpush1.bf16.msra.mxu0 %v2853_v33 }
 0x8cb   :  { %3023 = vmatprep.subr.bf16.mxu1 %v2862_v34  ;;  %3066 = vmatprep.subr.bf16.mxu0 %v2864_v35 }
 0x8ce   :  { %3024 = vmatpush1.bf16.msra.mxu1 %v2861_v36  ;;  %3067 = vmatpush1.bf16.msra.mxu0 %v2863_v38 }
 0x8cf   :  { %3025 = vmatprep.subr.bf16.mxu1 %v2872_v39  ;;  %3068 = vmatprep.subr.bf16.mxu0 %v2874_v41 }
 0x8d2   :  { %3026 = vmatpush1.bf16.msra.mxu1 %v2871_v14  ;;  %3069 = vmatpush1.bf16.msra.mxu0 %v2873_v16 }
 0x8d3   :  { %3027 = vmatprep.subr.bf16.mxu1 %v2882_v42  ;;  %3070 = vmatprep.subr.bf16.mxu0 %v2884_v43  ;;  %v8306_v43 = vld [vmem:[%s10647_s11 + $0x10] sm:$0xff]  }
 0x8d6   :  { %3028 = vmatpush1.bf16.msra.mxu1 %v2881_v15  ;;  %3071 = vmatpush1.bf16.msra.mxu0 %v2883_v20  ;;  %v3597_v15 = vld [vmem:[%s10650_s14 + $0x80] sm:$0xff]  ;;  %v3598_v20 = vld [vmem:[%s10650_s14 + $0x88] sm:$0xff] }
 0x8d7   :  { %3029 = vmatprep.subr.bf16.mxu1 %v2892_v46  ;;  %3072 = vmatprep.subr.bf16.mxu0 %v2894_v47  ;;  %v3581_v46 = vld [vmem:[%s10650_s14] sm:$0xff]  ;;  %v7700_v47 = vpack.c.bf16 %v3598_v20, %v3597_v15  ;;  %v3592_v15 = vld [vmem:[%s10650_s14 + $0x58] sm:$0xff] }
 0x8da   :  { %3030 = vmatpush1.bf16.msra.mxu1 %v2891_v48  ;;  %3073 = vmatpush1.bf16.msra.mxu0 %v2893_v49  ;;  %v3582_v48 = vld [vmem:[%s10650_s14 + $0x8] sm:$0xff] }
 0x8db   :  { %3031 = vmatprep.subr.bf16.mxu1 %v2902_v50  ;;  %3074 = vmatprep.subr.bf16.mxu0 %v2904_v51  ;;  %v7702_v49 = vpack.c.bf16 %v3582_v48, %v3581_v46  ;;  %v8308_v50 = vld [vmem:[%s10647_s11] sm:$0xff]   ;;  %v8309_v51 = vld [vmem:[%s10647_s11 + $0x8] sm:$0xff]  }
 0x8dc   :  { %v3609_v46 = vld [vmem:[%s10650_s14 + $0xe0] sm:$0xff] }
 0x8dd   :  { %v3593_v48 = vld [vmem:[%s10650_s14 + $0x60] sm:$0xff] }
 0x8de   :  { %3032 = vmatpush1.bf16.msra.mxu1 %v2901_v52  ;;  %3075 = vmatpush1.bf16.msra.mxu0 %v2903_v53 }
 0x8df   :  { %3033 = vmatprep.subr.bf16.mxu1 %v2912_v54  ;;  %3076 = vmatprep.subr.bf16.mxu0 %v2914_v55 }
 0x8e2   :  { %3034 = vmatpush1.bf16.msra.mxu1 %v2911_v58  ;;  %3077 = vmatpush1.bf16.msra.mxu0 %v2913_v59 }
 0x8e3   :  { %3089 = vmatprep.subr.bf16.mxu1 %v2766_v60 }
 0x8e5   :  { %3036 = vmatmul.mubr.bf16.vlgmr.msra.gmra.mrb[24].mxu1 %v9569_v44  ;;  %3079 = vmatmul.mubr.bf16.vlgmr.msra.gmra.mrb[44].mxu0 %v9569_v44 }
 0x8e6   :  { %3090 = vmatpush1.bf16.msra.mxu1 %v2765_v61  ;;  %3121 = vmatprep.mubr.bf16.mxu1 %v9571_v45  ;;  %v2815_v45 = vld [vmem:[#allocation2 + $0x1d0] sm:$0xff] }
 0x8e7   :  { %3091 = vmatprep.subr.bf16.mxu1 %v2776_v62  ;;  %3199 = vmatprep.mubr.bf16.mxu0 %v8451_v0 }
 0x8ea   :  { %3092 = vmatpush1.bf16.msra.mxu1 %v2775_v63 }
 0x8eb   :  { %3093 = vmatprep.subr.bf16.mxu1 %v2786_v1 }
 0x8ee   :  { %3094 = vmatpush1.bf16.msra.mxu1 %v2785_v10 }
 0x8ef   :  { %3095 = vmatprep.subr.bf16.mxu1 %v2796_v2  ;;  %v8310_v2 = vld [vmem:[%s10647_s11 + $0x20] sm:$0xff]  }
 0x8f2   :  { %3096 = vmatpush1.bf16.msra.mxu1 %v2795_v3  ;;  %v8311_v3 = vld [vmem:[%s10647_s11 + $0x28] sm:$0xff]  }
 0x8f3   :  { %3097 = vmatprep.subr.bf16.mxu1 %v2806_v4  ;;  %v8312_v4 = vld [vmem:[%s10647_s11 + $0x30] sm:$0xff]  }
 0x8f6   :  { %3098 = vmatpush1.bf16.msra.mxu1 %v2805_v5  ;;  %v8313_v5 = vld [vmem:[%s10647_s11 + $0x38] sm:$0xff]  }
 0x8f7   :  { %3099 = vmatprep.subr.bf16.mxu1 %v2816_v6 }
 0x8fa   :  { %3100 = vmatpush1.bf16.msra.mxu1 %v2815_v45 }
 0x8fb   :  { %3101 = vmatprep.subr.bf16.mxu1 %v2826_v7 }
 0x8fe   :  { %3102 = vmatpush1.bf16.msra.mxu1 %v2825_v8 }
 0x8ff   :  { %3103 = vmatprep.subr.bf16.mxu1 %v2836_v37 }
 0x902   :  { %3104 = vmatpush1.bf16.msra.mxu1 %v2835_v40 }
 0x903   :  { %3105 = vmatprep.subr.bf16.mxu1 %v2846_v11  ;;  %v8314_v11 = vld [vmem:[%s10647_s11 + $0x40] sm:$0xff]  }
 0x906   :  { %3106 = vmatpush1.bf16.msra.mxu1 %v2845_v12  ;;  %v8315_v12 = vld [vmem:[%s10647_s11 + $0x48] sm:$0xff]  }
 0x907   :  { %3107 = vmatprep.subr.bf16.mxu1 %v2856_v13  ;;  %v3599_v13 = vld [vmem:[%s10650_s14 + $0x90] sm:$0xff] }
 0x90a   :  { %3108 = vmatpush1.bf16.msra.mxu1 %v2855_v17  ;;  %v3600_v17 = vld [vmem:[%s10650_s14 + $0x98] sm:$0xff] }
 0x90b   :  { %3109 = vmatprep.subr.bf16.mxu1 %v2866_v18  ;;  %v7704_v18 = vpack.c.bf16 %v3600_v17, %v3599_v13 }
 0x90e   :  { %3110 = vmatpush1.bf16.msra.mxu1 %v2865_v19  ;;  %v3583_v19 = vld [vmem:[%s10650_s14 + $0x10] sm:$0xff] }
 0x90f   :  { %3111 = vmatprep.subr.bf16.mxu1 %v2876_v9  ;;  %v3584_v9 = vld [vmem:[%s10650_s14 + $0x18] sm:$0xff] }
 0x912   :  { %3112 = vmatpush1.bf16.msra.mxu1 %v2875_v21  ;;  %v7706_v21 = vpack.c.bf16 %v3584_v9, %v3583_v19 }
 0x913   :  { %3113 = vmatprep.subr.bf16.mxu1 %v2886_v22  ;;  %v3601_v22 = vld [vmem:[%s10650_s14 + $0xa0] sm:$0xff] }
 0x916   :  { %3114 = vmatpush1.bf16.msra.mxu1 %v2885_v23  ;;  %v3602_v23 = vld [vmem:[%s10650_s14 + $0xa8] sm:$0xff] }
 0x917   :  { %3115 = vmatprep.subr.bf16.mxu1 %v2896_v24  ;;  %v7708_v24 = vpack.c.bf16 %v3602_v23, %v3601_v22 }
 0x91a   :  { %3116 = vmatpush1.bf16.msra.mxu1 %v2895_v25  ;;  %v3585_v25 = vld [vmem:[%s10650_s14 + $0x20] sm:$0xff] }
 0x91b   :  { %3117 = vmatprep.subr.bf16.mxu1 %v2906_v26  ;;  %v3586_v26 = vld [vmem:[%s10650_s14 + $0x28] sm:$0xff] }
 0x91e   :  { %3118 = vmatpush1.bf16.msra.mxu1 %v2905_v27  ;;  %v7710_v27 = vpack.c.bf16 %v3586_v26, %v3585_v25 }
 0x91f   :  { %3119 = vmatprep.subr.bf16.mxu1 %v2916_v28  ;;  %v3603_v28 = vld [vmem:[%s10650_s14 + $0xb0] sm:$0xff] }
 0x922   :  { %3120 = vmatpush1.bf16.msra.mxu1 %v2915_v29  ;;  %v3604_v29 = vld [vmem:[%s10650_s14 + $0xb8] sm:$0xff] }
 0x923   :  { %7701 = vmatprep.subr.bf16.mxu1 %v7700_v47  ;;  %v3610_v47 = vld [vmem:[%s10650_s14 + $0xe8] sm:$0xff] }
 0x925   :  { %3122 = vmatmul.mubr.bf16.vlgmr.msra.gmra.mrb[28].mxu1 %v9569_v44  ;;  %v8307_v44 = vld [vmem:[%s10647_s11 + $0x18] sm:$0xff]  }
 0x926   :  { %7703 = vmatpush3.bf16.msra.mxu1 %v7702_v49  ;;  %v7724_v49 = vpack.c.bf16 %v3610_v47, %v3609_v46 }
 0x927   :  { %7705 = vmatprep.subr.bf16.mxu1 %v7704_v18 }
 0x92a   :  { %7707 = vmatpush3.bf16.msra.mxu1 %v7706_v21 }
 0x92b   :  { %7709 = vmatprep.subr.bf16.mxu1 %v7708_v24 }
 0x92e   :  { %7711 = vmatpush3.bf16.msra.mxu1 %v7710_v27 }
 0x978   :  { %v2951_v31 = vpop.f32.mrb[20].mxu1  ;;  %v2994_v32 = vpop.f32.mrb[40].mxu0 }
 0x979   :  { %v2953_v33 = vpop.f32.mrb[21].mxu1  ;;  %v2996_v34 = vpop.f32.mrb[41].mxu0 }
 0x97a   :  { %v2955_v35 = vpop.f32.mrb[22].mxu1  ;;  %v2998_v36 = vpop.f32.mrb[42].mxu0 }
 0x97b   :  { %v3132_v38 = vpack.c.bf16 %v2955_v35, %v2951_v31  ;;  %v3134_v39 = vpack.c.bf16 %v2998_v36, %v2994_v32  ;;  %v2957_v41 = vpop.f32.mrb[23].mxu1  ;;  %v3000_v14 = vpop.f32.mrb[43].mxu0  ;;  %v7712_v31 = vpack.c.bf16 %v3604_v29, %v3603_v28  ;;  %v3587_v32 = vld [vmem:[%s10650_s14 + $0x30] sm:$0xff]  ;;  %v3605_v35 = vld [vmem:[%s10650_s14 + $0xc0] sm:$0xff]  ;;  %v3606_v36 = vld [vmem:[%s10650_s14 + $0xc8] sm:$0xff] }
 0x97c   :  { %v3133_v16 = vpack.c.bf16 %v2957_v41, %v2953_v33  ;;  %v3135_v42 = vpack.c.bf16 %v3000_v14, %v2996_v34  ;;  %v3588_v33 = vld [vmem:[%s10650_s14 + $0x38] sm:$0xff]  ;;  %v3590_v41 = vld [vmem:[%s10650_s14 + $0x48] sm:$0xff] }
 0x97d   :  { %v7714_v34 = vpack.c.bf16 %v3588_v33, %v3587_v32  ;;  %7713 = vmatprep.subr.bf16.mxu1 %v7712_v31 }
 0x97e   :  { %3167 = vmatprep.subr.bf16.mxu0 %v3135_v42  ;;  %v3608_v42 = vld [vmem:[%s10650_s14 + $0xd8] sm:$0xff] }
 0x97f   :  { %3168 = vmatpush1.bf16.msra.mxu0 %v3134_v39  ;;  %7715 = vmatpush3.bf16.msra.mxu1 %v7714_v34  ;;  %v3589_v39 = vld [vmem:[%s10650_s14 + $0x40] sm:$0xff] }
 0x980   :  { %3236 = vmatprep.subr.bf16.mxu0 %v3133_v16  ;;  %v7718_v14 = vpack.c.bf16 %v3590_v41, %v3589_v39  ;;  %v3607_v16 = vld [vmem:[%s10650_s14 + $0xd0] sm:$0xff] }
 0x982   :  { %7221 = vmatmul.mubr.msk.bf16.vlgmr.msra.gmra.mrb[48].mxu0 %vm235_vm0, %v8306_v43  ;;  %v7720_v43 = vpack.c.bf16 %v3608_v42, %v3607_v16 }
 0x983   :  { %3237 = vmatpush1.bf16.msra.mxu0 %v3132_v38  ;;  %3209 = vmatprep.mubr.bf16.mxu0 %v8451_v0  ;;  %v7716_v38 = vpack.c.bf16 %v3606_v36, %v3605_v35 }
 0x985   :  { %7717 = vmatprep.subr.bf16.mxu1 %v7716_v38 }
 0x986   :  { %7719 = vmatpush3.bf16.msra.mxu1 %v7718_v14 }
 0x987   :  { %7721 = vmatprep.subr.bf16.mxu1 %v7720_v43 }
 0x98a   :  { %7222 = vmatmul.mubr.msk.bf16.gmra.mrb[52].mxu0 %vm235_vm0, %v8307_v44  ;;  %v3591_v44 = vld [vmem:[%s10650_s14 + $0x50] sm:$0xff] }
 0x98b   :  { %3268 = vmatprep.mubr.bf16.mxu0 %v8451_v0  ;;  %v7722_v20 = vpack.c.bf16 %v3592_v15, %v3591_v44 }
 0x98d   :  { %7723 = vmatpush3.bf16.msra.mxu1 %v7722_v20 }
 0x98e   :  { %7725 = vmatprep.subr.bf16.mxu1 %v7724_v49 }
 0x992   :  { %7225 = vmatmul.mubr.msk.bf16.vlgmr.msra.gmra.mrb[48].mxu0 %vm235_vm0, %v8308_v50  ;;  %v3594_v50 = vld [vmem:[%s10650_s14 + $0x68] sm:$0xff] }
 0x993   :  { %3278 = vmatprep.mubr.bf16.mxu0 %v8451_v0 }
 0x99a   :  { %7226 = vmatmul.mubr.msk.bf16.gmra.mrb[52].mxu0 %vm235_vm0, %v8309_v51  ;;  %v3611_v51 = vld [vmem:[%s10650_s14 + $0xf0] sm:$0xff] }
 0x99b   :  { %3342 = vmatprep.mubr.bf16.mxu0 %v8451_v0 }
 0x9b8   :  { %v3037_v52 = vpop.f32.mrb[24].mxu1  ;;  %v3080_v53 = vpop.f32.mrb[44].mxu0 }
 0x9b9   :  { %v3039_v54 = vpop.f32.mrb[25].mxu1  ;;  %v3082_v55 = vpop.f32.mrb[45].mxu0 }
 0x9ba   :  { %v3041_v58 = vpop.f32.mrb[26].mxu1  ;;  %v3084_v59 = vpop.f32.mrb[46].mxu0 }
 0x9bb   :  { %v3136_v60 = vpack.c.bf16 %v3041_v58, %v3037_v52  ;;  %v3043_v61 = vpop.f32.mrb[27].mxu1  ;;  %v3138_v62 = vpack.c.bf16 %v3084_v59, %v3080_v53  ;;  %v3086_v63 = vpop.f32.mrb[47].mxu0  ;;  %v3612_v52 = vld [vmem:[%s10650_s14 + $0xf8] sm:$0xff]  ;;  %v7726_v53 = vpack.c.bf16 %v3594_v50, %v3593_v48 }
 0x9bc   :  { %v3137_v1 = vpack.c.bf16 %v3043_v61, %v3039_v54  ;;  %v3139_v10 = vpack.c.bf16 %v3086_v63, %v3082_v55  ;;  %v7728_v54 = vpack.c.bf16 %v3612_v52, %v3611_v51  ;;  %v3595_v55 = vld [vmem:[%s10650_s14 + $0x70] sm:$0xff]  ;;  %v3596_v58 = vld [vmem:[%s10650_s14 + $0x78] sm:$0xff]  ;;  %v3703_v52 = vld [vmem:[%s10651_s15 + $0x8] sm:$0xff] }
 0x9bd   :  { %7727 = vmatpush3.bf16.msra.mxu1 %v7726_v53  ;;  %v7730_v59 = vpack.c.bf16 %v3596_v58, %v3595_v55  ;;  %v3705_v53 = vld [vmem:[%s10651_s15 + $0x18] sm:$0xff]  ;;  %v3702_v55 = vld [vmem:[%s10651_s15] sm:$0xff]  ;;  %v3704_v58 = vld [vmem:[%s10651_s15 + $0x10] sm:$0xff] }
 0x9be   :  { %3310 = vmatprep.subr.bf16.mxu0 %v3137_v1  ;;  %7729 = vmatprep.subr.bf16.mxu1 %v7728_v54  ;;  %v7732_v54 = vpack.c.bf16 %v3705_v53, %v3703_v52 }
 0x9bf   :  { %3311 = vmatpush1.bf16.msra.mxu0 %v3136_v60 }
 0x9c0   :  { %3392 = vmatprep.subr.bf16.mxu0 %v3139_v10 }
 0x9c1   :  { %7731 = vmatpush3.bf16.msra.mxu1 %v7730_v59  ;;  %v7734_v59 = vpack.c.bf16 %v3704_v58, %v3702_v55 }
 0x9c2   :  { %7233 = vmatmul.mubr.msk.bf16.vlgmr.msra.gmra.mrb[48].mxu0 %vm235_vm0, %v8310_v2  ;;  %7733 = vmatprep.subr.bf16.mxu1 %v7732_v54 }
 0x9c3   :  { %3352 = vmatprep.mubr.bf16.mxu0 %v8451_v0  ;;  %3393 = vmatpush1.bf16.msra.mxu0 %v3138_v62 }
 0x9ca   :  { %7234 = vmatmul.mubr.msk.bf16.gmra.mrb[52].mxu0 %vm235_vm0, %v8311_v3 }
 0x9cb   :  { %3424 = vmatprep.mubr.bf16.mxu0 %v8451_v0 }
 0x9d2   :  { %7241 = vmatmul.mubr.msk.bf16.vlgmr.msra.gmra.mrb[48].mxu0 %vm235_vm0, %v8312_v4 }
 0x9d3   :  { %3434 = vmatprep.mubr.bf16.mxu0 %v8451_v0 }
 0x9da   :  { %7242 = vmatmul.mubr.msk.bf16.gmra.mrb[52].mxu0 %vm235_vm0, %v8313_v5 }
 0x9db   :  { %3506 = vmatprep.mubr.bf16.mxu0 %v8451_v0 }
 0x9f8   :  { %v3123_v6 = vpop.f32.mrb[28].mxu1 }
 0x9f9   :  { %v3125_v45 = vpop.f32.mrb[29].mxu1 }
 0x9fa   :  { %v3127_v7 = vpop.f32.mrb[30].mxu1 }
 0x9fb   :  { %v3140_v8 = vpack.c.bf16 %v3127_v7, %v3123_v6  ;;  %v3129_v37 = vpop.f32.mrb[31].mxu1 }
 0x9fc   :  { %v3141_v40 = vpack.c.bf16 %v3129_v37, %v3125_v45 }
 0x9fe   :  { %3474 = vmatprep.subr.bf16.mxu0 %v3141_v40 }
 0x9ff   :  { %3475 = vmatpush1.bf16.msra.mxu0 %v3140_v8 }
 0xa02   :  { %7249 = vmatmul.mubr.msk.bf16.vlgmr.msra.gmra.mrb[48].mxu0 %vm235_vm0, %v8314_v11 }
 0xa03   :  { %3516 = vmatprep.mubr.bf16.mxu0 %v8451_v0 }
 0xa0a   :  { %7250 = vmatmul.mubr.msk.bf16.gmra.mrb[52].mxu0 %vm235_vm0, %v8315_v12 }
 0xad5   :  { %v9729_v60 = vpop.f32.mrb[48].mxu0 }
 0xad6   :  { %v9731_v61 = vpop.f32.mrb[49].mxu0  ;;  %v3553_v63 = vmul.f32 %v9729_v60, %v9729_v60 }
 0xad7   :  { %v9733_v62 = vpop.f32.mrb[50].mxu0  ;;  %v3554_v3 = vmul.f32 %v9731_v61, %v9731_v61 }
 0xad8   :  { %v3535_v1 = vadd.f32 %v9733_v62, %v9729_v60  ;;  %v3555_v10 = vmul.f32 %v9733_v62, %v9733_v62  ;;  %v9741_v2 = vpop.f32.mrb[51].mxu0 }
 0xad9   :  { %v3544_v4 = vadd.f32 %v9741_v2, %v9731_v61  ;;  %v3556_v5 = vmul.f32 %v9741_v2, %v9741_v2 }
 0xada   :  { %v3561_v6 = vadd.f32 %v3555_v10, %v3553_v63 }
 0xadb   :  { %v3570_v45 = vadd.f32 %v3556_v5, %v3554_v3 }
 0xadd   :  { %v9749_v7 = vpop.f32.mrb[52].mxu0 }
 0xade   :  { %v3536_v8 = vadd.f32 %v3535_v1, %v9749_v7  ;;  %v3557_v37 = vmul.f32 %v9749_v7, %v9749_v7  ;;  %v9754_v40 = vpop.f32.mrb[53].mxu0 }
 0xadf   :  { %v3545_v11 = vadd.f32 %v3544_v4, %v9754_v40  ;;  %v3558_v12 = vmul.f32 %v9754_v40, %v9754_v40  ;;  %v9759_v13 = vpop.f32.mrb[54].mxu0 }
 0xae0   :  { %v3562_v17 = vadd.f32 %v3561_v6, %v3557_v37  ;;  %v3537_v18 = vadd.f32 %v3536_v8, %v9759_v13  ;;  %v3559_v19 = vmul.f32 %v9759_v13, %v9759_v13  ;;  %v9764_v9 = vpop.f32.mrb[55].mxu0  ;;  %v3689_v37 = vld [vmem:[%s10649_s13] sm:$0x3] }
 0xae1   :  { %v3571_v21 = vadd.f32 %v3570_v45, %v3558_v12  ;;  %v3546_v22 = vadd.f32 %v3545_v11, %v9764_v9  ;;  %v3560_v23 = vmul.f32 %v9764_v9, %v9764_v9 }
 0xae2   :  { %v3538_v24 = vrot.slane %v3537_v18, 4  ;;  %v3563_v25 = vadd.f32 %v3562_v17, %v3559_v19 }
 0xae3   :  { %v3547_v26 = vrot.slane %v3546_v22, 4  ;;  %v3572_v27 = vadd.f32 %v3571_v21, %v3560_v23 }
 0xae4   :  { %v3539_v28 = vadd.f32 %v3538_v24, %v3537_v18  ;;  %v3564_v29 = vrot.slane %v3563_v25, 4 }
 0xae5   :  { %v3548_v31 = vadd.f32 %v3547_v26, %v3546_v22  ;;  %v3573_v32 = vrot.slane %v3572_v27, 4 }
 0xae6   :  { %v3540_v33 = vrot.slane %v3539_v28, 2  ;;  %v3565_v34 = vadd.f32 %v3564_v29, %v3563_v25 }
 0xae7   :  { %v3549_v35 = vrot.slane %v3548_v31, 2  ;;  %v3574_v36 = vadd.f32 %v3573_v32, %v3572_v27 }
 0xae8   :  { %v3541_v38 = vadd.f32 %v3540_v33, %v3539_v28  ;;  %v3566_v39 = vrot.slane %v3565_v34, 2 }
 0xae9   :  { %v3550_v41 = vadd.f32 %v3549_v35, %v3548_v31  ;;  %v3575_v14 = vrot.slane %v3574_v36, 2 }
 0xaea   :  { %v3542_v16 = vrot.slane %v3541_v38, 1  ;;  %v3567_v42 = vadd.f32 %v3566_v39, %v3565_v34 }
 0xaeb   :  { %v3551_v43 = vrot.slane %v3550_v41, 1  ;;  %v3576_v44 = vadd.f32 %v3575_v14, %v3574_v36 }
 0xaec   :  { %v3568_v15 = vrot.slane %v3567_v42, 1  ;;  %v3543_v46 = vadd.f32 %v3542_v16, %v3541_v38 }
 0xaed   :  { %v3577_v20 = vrot.slane %v3576_v44, 1  ;;  %v3552_v48 = vadd.f32 %v3551_v43, %v3550_v41 }
 0xaee   :  { %v3569_v47 = vadd.f32 %v3568_v15, %v3567_v42 }
 0xaef   :  { %v3578_v49 = vadd.f32 %v3577_v20, %v3576_v44 }
 0xaf0   :  { %v3579_v50 = vsel %vm461_vm1, %v3543_v46, %v3569_v47 }
 0xaf1   :  { %v3580_v51 = vsel %vm461_vm1, %v3552_v48, %v3578_v49 }
 0xaf2   :  { %3677 = vmatprep.mubr.f32.mxu1 %v3580_v51 }
 0xaf3   :  { %3678 = vmatmul.mubr.f32.vlgmr.msra.gmra.mrb[18].mxu1 %v3579_v50 }
 0xaf4   :  { %3773 = vmatprep.mubr.f32.mxu1 %v8467_v30  ;;  %7735 = vmatpush1.bf16.msra.mxu1 %v7734_v59 }
 0xbc6   :  { %v7574_v63 = vpop.f32.mrb[18].mxu1 }
 0xbc7   :  { %v7575_v1 = vpop.f32.mrb[19].mxu1 }
 0xbc8   :  { %v7576_v10 = vadd.f32 %v7575_v1, %v7574_v63 }
 0xbca   :  { %v3683_v3 = vmul.f32 0.001953125, %v7576_v10 }
 0xbcc   :  { %v3684_v4 = vmul.f32 %v3683_v3, %v3683_v3 }
 0xbce   :  { %v3686_v5 = vrot.slane %v3684_v4, 7 }
 0xbd0   :  { %v3688_v6 = vsub.f32 %v3683_v3, %v3686_v5 }
 0xbd2   :  { %v3690_v45 = vadd.f32 1e-05, %v3688_v6 }
 0xbd4   :  { %8316 = vrsqrt.f32 %v3690_v45 }
 0xbde   :  { %v8317_v8 = vpop.eup %8316 }
 0xbdf   :  { %v3693_v11 = vrot.slane %v8317_v8, 1 }
 0xbe1   :  { %v3695_v12 = vmul.f32 %v3693_v11, %v3689_v37 }
 0xbe3   :  { %v3696_v17 = vmul.f32 %v3695_v12, %v3683_v3 }
 0xbe5   :  { %v3698_v18 = vrot.slane %v3696_v17, 7 }
 0xbe7   :  { %v3700_v19 = vsub.f32 %v3689_v37, %v3698_v18 }
 0xbe9   :  { %v3701_v21 = vsel %vm461_vm1, %v3695_v12, %v3700_v19 }
 0xbea   :  { %7251 = vmatmul.mubr.msk.f32.vlgmr.msra.gmra.mrb[32].mxu1 %vm235_vm0, %v3701_v21 }
 0xcbd   :  { %v3775_v22 = vpop.f32.mrb[32].mxu1 }
 0xcbe   :  { %v3783_v23 = vrot.slane %v3775_v22, %v9069_v56  ;;  %v3777_v24 = vpop.f32.mrb[33].mxu1  ;;  %v3799_v25 = vrot.slane %v3775_v22, %v9071_v57 }
 0xcbf   :  { %v3787_v26 = vrot.slane %v3777_v24, %v9069_v56  ;;  %v3803_v27 = vrot.slane %v3777_v24, %v9071_v57 }
 0xcc0   :  { %v3788_v28 = vmul.f32 %v3783_v23, %v9729_v60  ;;  %v3790_v29 = vmul.f32 %v3783_v23, %v9733_v62  ;;  %v3792_v31 = vmul.f32 %v3783_v23, %v9749_v7  ;;  %v3794_v32 = vmul.f32 %v3783_v23, %v9759_v13 }
 0xcc1   :  { %v3789_v33 = vmul.f32 %v3787_v26, %v9731_v61  ;;  %v3791_v34 = vmul.f32 %v3787_v26, %v9741_v2  ;;  %v3793_v35 = vmul.f32 %v3787_v26, %v9754_v40  ;;  %v3795_v36 = vmul.f32 %v3787_v26, %v9764_v9 }
 0xcc2   :  { %v3804_v38 = vadd.f32 %v3799_v25, %v3788_v28  ;;  %v3806_v39 = vadd.f32 %v3799_v25, %v3790_v29  ;;  %v3808_v41 = vadd.f32 %v3799_v25, %v3792_v31  ;;  %v3810_v14 = vadd.f32 %v3799_v25, %v3794_v32 }
 0xcc3   :  { %v3805_v16 = vadd.f32 %v3803_v27, %v3789_v33  ;;  %v3807_v60 = vadd.f32 %v3803_v27, %v3791_v34  ;;  %v3809_v42 = vadd.f32 %v3803_v27, %v3793_v35  ;;  %v3811_v62 = vadd.f32 %v3803_v27, %v3795_v36 }
 0xcc4   :  { %vm3812_vm13 = vcmp.ge.f32.partialorder %v3804_v38, 0.0  ;;  %vm3814_vm14 = vcmp.ge.f32.partialorder %v3806_v39, 0.0  ;;  %vm3816_vm15 = vcmp.ge.f32.partialorder %v3808_v41, 0.0  ;;  %vm3818_vm0 = vcmp.ge.f32.partialorder %v3810_v14, 0.0 }
 0xcc5   :  { %v3820_v7 = vmul.f32 0.2, %v3804_v38  ;;  %v3822_v61 = vmul.f32 0.2, %v3806_v39  ;;  %v3824_v13 = vmul.f32 0.2, %v3808_v41 }
 0xcc6   :  { %v3826_v2 = vmul.f32 0.2, %v3810_v14  ;;  %vm3813_vm2 = vcmp.ge.f32.partialorder %v3805_v16, 0.0  ;;  %vm3815_vm4 = vcmp.ge.f32.partialorder %v3807_v60, 0.0  ;;  %vm3817_vm5 = vcmp.ge.f32.partialorder %v3809_v42, 0.0 }
 0xcc7   :  { %v3828_v40 = vsel %vm3812_vm13, %v3804_v38, %v3820_v7  ;;  %v3830_v9 = vsel %vm3814_vm14, %v3806_v39, %v3822_v61  ;;  %v3832_v43 = vsel %vm3816_vm15, %v3808_v41, %v3824_v13  ;;  %vm3819_vm6 = vcmp.ge.f32.partialorder %v3811_v62, 0.0 }
 0xcc8   :  { %v3834_v44 = vsel %vm3818_vm0, %v3810_v14, %v3826_v2  ;;  %v9801_v15 = vpack.c.bf16 %v3830_v9, %v3828_v40  ;;  %v3821_v20 = vmul.f32 0.2, %v3805_v16  ;;  %v3823_v46 = vmul.f32 0.2, %v3807_v60 }
 0xcc9   :  { %v9803_v47 = vpack.c.bf16 %v3834_v44, %v3832_v43  ;;  %v3825_v48 = vmul.f32 0.2, %v3809_v42  ;;  %v3827_v49 = vmul.f32 0.2, %v3811_v62 }
 0xcca   :  { %v3829_v50 = vsel %vm3813_vm2, %v3805_v16, %v3821_v20  ;;  %v3831_v51 = vsel %vm3815_vm4, %v3807_v60, %v3823_v46 }
 0xccb   :  { %v3833_v52 = vsel %vm3817_vm5, %v3809_v42, %v3825_v48  ;;  %v3835_v53 = vsel %vm3819_vm6, %v3811_v62, %v3827_v49  ;;  %v9805_v54 = vpack.c.bf16 %v3831_v51, %v3829_v50 }
 0xccc   :  { %v9807_v55 = vpack.c.bf16 %v3835_v53, %v3833_v52 }
 0xccd   :  { %8446 = dma.done.wait [#allocation5 + $0x1], 20480 }
 0xcce   :  { %8447 = vsyncadd [#allocation5 + $0x1], 4294946816  ;;  %4034 = vmatprep.mubr.bf16.mxu0 %v9805_v54  ;;  %4087 = vmatprep.mubr.bf16.mxu1 %v9805_v54  ;;  %v3843_v58 = vld [vmem:[#allocation3 + $0x8] sm:$0xff]  ;;  %v3842_v59 = vld [vmem:[#allocation3] sm:$0xff] }
 0xccf   :  { %v3853_v63 = vld [vmem:[#allocation3 + $0x58] sm:$0xff]  ;;  %4002 = vmatprep.subr.bf16.mxu0 %v3843_v58  ;;  %v3852_v1 = vld [vmem:[#allocation3 + $0x50] sm:$0xff]  ;;  %v3863_v10 = vld [vmem:[#allocation3 + $0xa8] sm:$0xff] }
 0xcd0   :  { %4003 = vmatpush1.bf16.msra.mxu0 %v3842_v59  ;;  %v3845_v3 = vld [vmem:[#allocation3 + $0x18] sm:$0xff]  ;;  %v3844_v4 = vld [vmem:[#allocation3 + $0x10] sm:$0xff]  ;;  %v3855_v5 = vld [vmem:[#allocation3 + $0x68] sm:$0xff] }
 0xcd1   :  { %4004 = vmatprep.subr.bf16.mxu0 %v3853_v63  ;;  %4055 = vmatprep.subr.bf16.mxu1 %v3845_v3  ;;  %v3862_v6 = vld [vmem:[#allocation3 + $0xa0] sm:$0xff]  ;;  %v3873_v45 = vld [vmem:[#allocation3 + $0xf8] sm:$0xff]  ;;  %v3872_v11 = vld [vmem:[#allocation3 + $0xf0] sm:$0xff] }
 0xcd2   :  { %4056 = vmatpush1.bf16.msra.mxu1 %v3844_v4  ;;  %v3854_v8 = vld [vmem:[#allocation3 + $0x60] sm:$0xff]  ;;  %v3865_v37 = vld [vmem:[#allocation3 + $0xb8] sm:$0xff]  ;;  %v3883_v12 = vld [vmem:[#allocation3 + $0x148] sm:$0xff] }
 0xcd3   :  { %4057 = vmatprep.subr.bf16.mxu1 %v3855_v5  ;;  %v3864_v17 = vld [vmem:[#allocation3 + $0xb0] sm:$0xff]  ;;  %v3875_v18 = vld [vmem:[#allocation3 + $0x108] sm:$0xff]  ;;  %v3882_v19 = vld [vmem:[#allocation3 + $0x140] sm:$0xff] }
 0xcd4   :  { %4005 = vmatpush1.bf16.msra.mxu0 %v3852_v1  ;;  %v3893_v21 = vld [vmem:[#allocation3 + $0x198] sm:$0xff]  ;;  %v3874_v22 = vld [vmem:[#allocation3 + $0x100] sm:$0xff]  ;;  %v3892_v24 = vld [vmem:[#allocation3 + $0x190] sm:$0xff] }
 0xcd5   :  { %4006 = vmatprep.subr.bf16.mxu0 %v3863_v10  ;;  %v3885_v23 = vld [vmem:[#allocation3 + $0x158] sm:$0xff]  ;;  %v3903_v25 = vld [vmem:[#allocation3 + $0x1e8] sm:$0xff]  ;;  %v3884_v26 = vld [vmem:[#allocation3 + $0x150] sm:$0xff] }
 0xcd6   :  { %4058 = vmatpush1.bf16.msra.mxu1 %v3854_v8  ;;  %v3895_v27 = vld [vmem:[#allocation3 + $0x1a8] sm:$0xff]  ;;  %v3902_v28 = vld [vmem:[#allocation3 + $0x1e0] sm:$0xff]  ;;  %v3913_v29 = vld [vmem:[#allocation3 + $0x238] sm:$0xff] }
 0xcd7   :  { %4059 = vmatprep.subr.bf16.mxu1 %v3865_v37  ;;  %v3894_v31 = vld [vmem:[#allocation3 + $0x1a0] sm:$0xff]  ;;  %v3905_v32 = vld [vmem:[#allocation3 + $0x1f8] sm:$0xff]  ;;  %v3912_v33 = vld [vmem:[#allocation3 + $0x230] sm:$0xff] }
 0xcd8   :  { %4007 = vmatpush1.bf16.msra.mxu0 %v3862_v6  ;;  %v3923_v34 = vld [vmem:[#allocation3 + $0x288] sm:$0xff]  ;;  %v3904_v35 = vld [vmem:[#allocation3 + $0x1f0] sm:$0xff]  ;;  %v3922_v38 = vld [vmem:[#allocation3 + $0x280] sm:$0xff] }
 0xcd9   :  { %4008 = vmatprep.subr.bf16.mxu0 %v3873_v45  ;;  %v3915_v36 = vld [vmem:[#allocation3 + $0x248] sm:$0xff]  ;;  %v3933_v39 = vld [vmem:[#allocation3 + $0x2d8] sm:$0xff]  ;;  %v3914_v41 = vld [vmem:[#allocation3 + $0x240] sm:$0xff] }
 0xcda   :  { %4060 = vmatpush1.bf16.msra.mxu1 %v3864_v17  ;;  %v3925_v14 = vld [vmem:[#allocation3 + $0x298] sm:$0xff]  ;;  %v3932_v16 = vld [vmem:[#allocation3 + $0x2d0] sm:$0xff]  ;;  %v3943_v60 = vld [vmem:[#allocation3 + $0x328] sm:$0xff] }
 0xcdb   :  { %4061 = vmatprep.subr.bf16.mxu1 %v3875_v18  ;;  %v3924_v42 = vld [vmem:[#allocation3 + $0x290] sm:$0xff]  ;;  %v3935_v62 = vld [vmem:[#allocation3 + $0x2e8] sm:$0xff]  ;;  %v3942_v7 = vld [vmem:[#allocation3 + $0x320] sm:$0xff] }
 0xcdc   :  { %4009 = vmatpush1.bf16.msra.mxu0 %v3872_v11  ;;  %v3953_v61 = vld [vmem:[#allocation3 + $0x378] sm:$0xff]  ;;  %v3934_v13 = vld [vmem:[#allocation3 + $0x2e0] sm:$0xff]  ;;  %v3952_v40 = vld [vmem:[#allocation3 + $0x370] sm:$0xff] }
 0xcdd   :  { %4010 = vmatprep.subr.bf16.mxu0 %v3883_v12  ;;  %v3945_v2 = vld [vmem:[#allocation3 + $0x338] sm:$0xff]  ;;  %v3963_v9 = vld [vmem:[#allocation3 + $0x3c8] sm:$0xff]  ;;  %v3944_v43 = vld [vmem:[#allocation3 + $0x330] sm:$0xff] }
 0xcde   :  { %4062 = vmatpush1.bf16.msra.mxu1 %v3874_v22  ;;  %v3955_v44 = vld [vmem:[#allocation3 + $0x388] sm:$0xff]  ;;  %v3962_v20 = vld [vmem:[#allocation3 + $0x3c0] sm:$0xff]  ;;  %v3973_v46 = vld [vmem:[#allocation3 + $0x418] sm:$0xff] }
 0xcdf   :  { %4063 = vmatprep.subr.bf16.mxu1 %v3885_v23  ;;  %v3954_v48 = vld [vmem:[#allocation3 + $0x380] sm:$0xff]  ;;  %v3965_v49 = vld [vmem:[#allocation3 + $0x3d8] sm:$0xff]  ;;  %v3972_v50 = vld [vmem:[#allocation3 + $0x410] sm:$0xff] }
 0xce0   :  { %4011 = vmatpush1.bf16.msra.mxu0 %v3882_v19  ;;  %v3983_v51 = vld [vmem:[#allocation3 + $0x468] sm:$0xff]  ;;  %v3964_v52 = vld [vmem:[#allocation3 + $0x3d0] sm:$0xff]  ;;  %v3982_v58 = vld [vmem:[#allocation3 + $0x460] sm:$0xff] }
 0xce1   :  { %4012 = vmatprep.subr.bf16.mxu0 %v3893_v21  ;;  %v3975_v53 = vld [vmem:[#allocation3 + $0x428] sm:$0xff]  ;;  %v3993_v59 = vld [vmem:[#allocation3 + $0x4b8] sm:$0xff]  ;;  %v3974_v63 = vld [vmem:[#allocation3 + $0x420] sm:$0xff] }
 0xce2   :  { %4064 = vmatpush1.bf16.msra.mxu1 %v3884_v26  ;;  %v3985_v1 = vld [vmem:[#allocation3 + $0x478] sm:$0xff]  ;;  %v3992_v10 = vld [vmem:[#allocation3 + $0x4b0] sm:$0xff]  ;;  %v3847_v3 = vld [vmem:[#allocation3 + $0x28] sm:$0xff] }
 0xce3   :  { %4065 = vmatprep.subr.bf16.mxu1 %v3895_v27  ;;  %v3984_v4 = vld [vmem:[#allocation3 + $0x470] sm:$0xff]  ;;  %v3995_v5 = vld [vmem:[#allocation3 + $0x4c8] sm:$0xff]  ;;  %v3846_v6 = vld [vmem:[#allocation3 + $0x20] sm:$0xff] }
 0xce4   :  { %4013 = vmatpush1.bf16.msra.mxu0 %v3892_v24  ;;  %v3857_v45 = vld [vmem:[#allocation3 + $0x78] sm:$0xff]  ;;  %v3994_v8 = vld [vmem:[#allocation3 + $0x4c0] sm:$0xff]  ;;  %v3856_v11 = vld [vmem:[#allocation3 + $0x70] sm:$0xff] }
 0xce5   :  { %4014 = vmatprep.subr.bf16.mxu0 %v3903_v25  ;;  %v3849_v37 = vld [vmem:[#allocation3 + $0x38] sm:$0xff]  ;;  %v3867_v12 = vld [vmem:[#allocation3 + $0xc8] sm:$0xff]  ;;  %v3848_v17 = vld [vmem:[#allocation3 + $0x30] sm:$0xff] }
 0xce6   :  { %4066 = vmatpush1.bf16.msra.mxu1 %v3894_v31  ;;  %v3859_v18 = vld [vmem:[#allocation3 + $0x88] sm:$0xff]  ;;  %v3866_v19 = vld [vmem:[#allocation3 + $0xc0] sm:$0xff]  ;;  %v3877_v21 = vld [vmem:[#allocation3 + $0x118] sm:$0xff] }
 0xce7   :  { %4067 = vmatprep.subr.bf16.mxu1 %v3905_v32  ;;  %v3858_v22 = vld [vmem:[#allocation3 + $0x80] sm:$0xff]  ;;  %v3869_v23 = vld [vmem:[#allocation3 + $0xd8] sm:$0xff]  ;;  %v3876_v24 = vld [vmem:[#allocation3 + $0x110] sm:$0xff] }
 0xce8   :  { %4015 = vmatpush1.bf16.msra.mxu0 %v3902_v28  ;;  %v3887_v25 = vld [vmem:[#allocation3 + $0x168] sm:$0xff]  ;;  %v3868_v26 = vld [vmem:[#allocation3 + $0xd0] sm:$0xff]  ;;  %v3886_v28 = vld [vmem:[#allocation3 + $0x160] sm:$0xff] }
 0xce9   :  { %4016 = vmatprep.subr.bf16.mxu0 %v3913_v29  ;;  %v3879_v27 = vld [vmem:[#allocation3 + $0x128] sm:$0xff]  ;;  %v3897_v29 = vld [vmem:[#allocation3 + $0x1b8] sm:$0xff]  ;;  %v3878_v31 = vld [vmem:[#allocation3 + $0x120] sm:$0xff] }
 0xcea   :  { %4068 = vmatpush1.bf16.msra.mxu1 %v3904_v35  ;;  %v3889_v32 = vld [vmem:[#allocation3 + $0x178] sm:$0xff]  ;;  %v3888_v35 = vld [vmem:[#allocation3 + $0x170] sm:$0xff] }
 0xceb   :  { %4069 = vmatprep.subr.bf16.mxu1 %v3915_v36  ;;  %v3899_v36 = vld [vmem:[#allocation3 + $0x1c8] sm:$0xff] }
 0xcec   :  { %4017 = vmatpush1.bf16.msra.mxu0 %v3912_v33  ;;  %v3896_v33 = vld [vmem:[#allocation3 + $0x1b0] sm:$0xff] }
 0xced   :  { %4018 = vmatprep.subr.bf16.mxu0 %v3923_v34  ;;  %v3907_v34 = vld [vmem:[#allocation3 + $0x208] sm:$0xff] }
 0xcee   :  { %4070 = vmatpush1.bf16.msra.mxu1 %v3914_v41  ;;  %v3898_v41 = vld [vmem:[#allocation3 + $0x1c0] sm:$0xff] }
 0xcef   :  { %4071 = vmatprep.subr.bf16.mxu1 %v3925_v14  ;;  %v3909_v14 = vld [vmem:[#allocation3 + $0x218] sm:$0xff] }
 0xcf0   :  { %4019 = vmatpush1.bf16.msra.mxu0 %v3922_v38  ;;  %v3906_v38 = vld [vmem:[#allocation3 + $0x200] sm:$0xff] }
 0xcf1   :  { %4020 = vmatprep.subr.bf16.mxu0 %v3933_v39  ;;  %v3917_v39 = vld [vmem:[#allocation3 + $0x258] sm:$0xff] }
 0xcf2   :  { %4072 = vmatpush1.bf16.msra.mxu1 %v3924_v42  ;;  %v3908_v42 = vld [vmem:[#allocation3 + $0x210] sm:$0xff] }
 0xcf3   :  { %4073 = vmatprep.subr.bf16.mxu1 %v3935_v62  ;;  %v3919_v62 = vld [vmem:[#allocation3 + $0x268] sm:$0xff] }
 0xcf4   :  { %4021 = vmatpush1.bf16.msra.mxu0 %v3932_v16  ;;  %v3916_v16 = vld [vmem:[#allocation3 + $0x250] sm:$0xff] }
 0xcf5   :  { %4022 = vmatprep.subr.bf16.mxu0 %v3943_v60  ;;  %v3927_v60 = vld [vmem:[#allocation3 + $0x2a8] sm:$0xff] }
 0xcf6   :  { %4074 = vmatpush1.bf16.msra.mxu1 %v3934_v13  ;;  %v3918_v13 = vld [vmem:[#allocation3 + $0x260] sm:$0xff] }
 0xcf7   :  { %4075 = vmatprep.subr.bf16.mxu1 %v3945_v2  ;;  %v3929_v2 = vld [vmem:[#allocation3 + $0x2b8] sm:$0xff] }
 0xcf8   :  { %4023 = vmatpush1.bf16.msra.mxu0 %v3942_v7  ;;  %v3926_v7 = vld [vmem:[#allocation3 + $0x2a0] sm:$0xff] }
 0xcf9   :  { %4024 = vmatprep.subr.bf16.mxu0 %v3953_v61  ;;  %v3937_v61 = vld [vmem:[#allocation3 + $0x2f8] sm:$0xff] }
 0xcfa   :  { %4076 = vmatpush1.bf16.msra.mxu1 %v3944_v43  ;;  %v3928_v43 = vld [vmem:[#allocation3 + $0x2b0] sm:$0xff] }
 0xcfb   :  { %4077 = vmatprep.subr.bf16.mxu1 %v3955_v44  ;;  %v3939_v44 = vld [vmem:[#allocation3 + $0x308] sm:$0xff] }
 0xcfc   :  { %4025 = vmatpush1.bf16.msra.mxu0 %v3952_v40  ;;  %v3936_v40 = vld [vmem:[#allocation3 + $0x2f0] sm:$0xff] }
 0xcfd   :  { %4026 = vmatprep.subr.bf16.mxu0 %v3963_v9  ;;  %v3947_v9 = vld [vmem:[#allocation3 + $0x348] sm:$0xff] }
 0xcfe   :  { %4078 = vmatpush1.bf16.msra.mxu1 %v3954_v48  ;;  %v3938_v48 = vld [vmem:[#allocation3 + $0x300] sm:$0xff] }
 0xcff   :  { %4079 = vmatprep.subr.bf16.mxu1 %v3965_v49  ;;  %v3949_v49 = vld [vmem:[#allocation3 + $0x358] sm:$0xff] }
 0xd00   :  { %4027 = vmatpush1.bf16.msra.mxu0 %v3962_v20  ;;  %v3946_v20 = vld [vmem:[#allocation3 + $0x340] sm:$0xff] }
 0xd01   :  { %4028 = vmatprep.subr.bf16.mxu0 %v3973_v46  ;;  %v3957_v46 = vld [vmem:[#allocation3 + $0x398] sm:$0xff] }
 0xd02   :  { %4080 = vmatpush1.bf16.msra.mxu1 %v3964_v52  ;;  %v3948_v52 = vld [vmem:[#allocation3 + $0x350] sm:$0xff] }
 0xd03   :  { %4081 = vmatprep.subr.bf16.mxu1 %v3975_v53  ;;  %v3959_v53 = vld [vmem:[#allocation3 + $0x3a8] sm:$0xff] }
 0xd04   :  { %4029 = vmatpush1.bf16.msra.mxu0 %v3972_v50  ;;  %v3956_v50 = vld [vmem:[#allocation3 + $0x390] sm:$0xff] }
 0xd05   :  { %4030 = vmatprep.subr.bf16.mxu0 %v3983_v51  ;;  %v3967_v51 = vld [vmem:[#allocation3 + $0x3e8] sm:$0xff] }
 0xd06   :  { %4082 = vmatpush1.bf16.msra.mxu1 %v3974_v63  ;;  %v3958_v63 = vld [vmem:[#allocation3 + $0x3a0] sm:$0xff] }
 0xd07   :  { %4083 = vmatprep.subr.bf16.mxu1 %v3985_v1  ;;  %v3969_v1 = vld [vmem:[#allocation3 + $0x3f8] sm:$0xff] }
 0xd08   :  { %4031 = vmatpush1.bf16.msra.mxu0 %v3982_v58  ;;  %v3966_v58 = vld [vmem:[#allocation3 + $0x3e0] sm:$0xff] }
 0xd09   :  { %4032 = vmatprep.subr.bf16.mxu0 %v3993_v59  ;;  %v3977_v59 = vld [vmem:[#allocation3 + $0x438] sm:$0xff] }
 0xd0a   :  { %4084 = vmatpush1.bf16.msra.mxu1 %v3984_v4  ;;  %v3968_v4 = vld [vmem:[#allocation3 + $0x3f0] sm:$0xff] }
 0xd0b   :  { %4085 = vmatprep.subr.bf16.mxu1 %v3995_v5  ;;  %v3979_v5 = vld [vmem:[#allocation3 + $0x448] sm:$0xff] }
 0xd0c   :  { %4033 = vmatpush1.bf16.msra.mxu0 %v3992_v10  ;;  %v3976_v10 = vld [vmem:[#allocation3 + $0x430] sm:$0xff] }
 0xd0d   :  { %4108 = vmatprep.subr.bf16.mxu0 %v3847_v3  ;;  %v3987_v3 = vld [vmem:[#allocation3 + $0x488] sm:$0xff] }
 0xd0e   :  { %4086 = vmatpush1.bf16.msra.mxu1 %v3994_v8  ;;  %v3978_v8 = vld [vmem:[#allocation3 + $0x440] sm:$0xff] }
 0xd0f   :  { %4035 = vmatmul.mubr.bf16.vlgmr.msra.gmra.mrb[56].mxu0 %v9801_v15  ;;  %4161 = vmatprep.subr.bf16.mxu1 %v3849_v37  ;;  %v3989_v37 = vld [vmem:[#allocation3 + $0x498] sm:$0xff] }
 0xd10   :  { %4109 = vmatpush1.bf16.msra.mxu0 %v3846_v6  ;;  %4044 = vmatprep.mubr.bf16.mxu0 %v9807_v55  ;;  %v3986_v6 = vld [vmem:[#allocation3 + $0x480] sm:$0xff] }
 0xd11   :  { %4110 = vmatprep.subr.bf16.mxu0 %v3857_v45  ;;  %4088 = vmatmul.mubr.bf16.vlgmr.msra.gmra.mrb[36].mxu1 %v9801_v15  ;;  %v3997_v45 = vld [vmem:[#allocation3 + $0x4d8] sm:$0xff] }
 0xd12   :  { %4162 = vmatpush1.bf16.msra.mxu1 %v3848_v17  ;;  %4097 = vmatprep.mubr.bf16.mxu1 %v9807_v55  ;;  %v3988_v17 = vld [vmem:[#allocation3 + $0x490] sm:$0xff] }
 0xd13   :  { %4163 = vmatprep.subr.bf16.mxu1 %v3859_v18  ;;  %v3999_v18 = vld [vmem:[#allocation3 + $0x4e8] sm:$0xff] }
 0xd14   :  { %4111 = vmatpush1.bf16.msra.mxu0 %v3856_v11  ;;  %v3996_v11 = vld [vmem:[#allocation3 + $0x4d0] sm:$0xff] }
 0xd15   :  { %4112 = vmatprep.subr.bf16.mxu0 %v3867_v12  ;;  %v3851_v12 = vld [vmem:[#allocation3 + $0x48] sm:$0xff] }
 0xd16   :  { %4164 = vmatpush1.bf16.msra.mxu1 %v3858_v22  ;;  %v3998_v22 = vld [vmem:[#allocation3 + $0x4e0] sm:$0xff] }
 0xd17   :  { %4045 = vmatmul.mubr.bf16.gmra.mrb[60].mxu0 %v9803_v47  ;;  %4165 = vmatprep.subr.bf16.mxu1 %v3869_v23  ;;  %v3860_v23 = vld [vmem:[#allocation3 + $0x90] sm:$0xff] }
 0xd18   :  { %4113 = vmatpush1.bf16.msra.mxu0 %v3866_v19  ;;  %4140 = vmatprep.mubr.bf16.mxu0 %v9805_v54  ;;  %v3850_v19 = vld [vmem:[#allocation3 + $0x40] sm:$0xff] }
 0xd19   :  { %4114 = vmatprep.subr.bf16.mxu0 %v3877_v21  ;;  %4098 = vmatmul.mubr.bf16.gmra.mrb[40].mxu1 %v9803_v47  ;;  %v3861_v21 = vld [vmem:[#allocation3 + $0x98] sm:$0xff] }
 0xd1a   :  { %4166 = vmatpush1.bf16.msra.mxu1 %v3868_v26  ;;  %4193 = vmatprep.mubr.bf16.mxu1 %v9805_v54  ;;  %v3881_v26 = vld [vmem:[#allocation3 + $0x138] sm:$0xff] }
 0xd1b   :  { %4167 = vmatprep.subr.bf16.mxu1 %v3879_v27  ;;  %v3880_v27 = vld [vmem:[#allocation3 + $0x130] sm:$0xff] }
 0xd1c   :  { %4115 = vmatpush1.bf16.msra.mxu0 %v3876_v24  ;;  %v3871_v24 = vld [vmem:[#allocation3 + $0xe8] sm:$0xff] }
 0xd1d   :  { %4116 = vmatprep.subr.bf16.mxu0 %v3887_v25  ;;  %v3870_v25 = vld [vmem:[#allocation3 + $0xe0] sm:$0xff] }
 0xd1e   :  { %4168 = vmatpush1.bf16.msra.mxu1 %v3878_v31  ;;  %v3901_v31 = vld [vmem:[#allocation3 + $0x1d8] sm:$0xff] }
 0xd1f   :  { %4169 = vmatprep.subr.bf16.mxu1 %v3889_v32  ;;  %v3900_v32 = vld [vmem:[#allocation3 + $0x1d0] sm:$0xff] }
 0xd20   :  { %4117 = vmatpush1.bf16.msra.mxu0 %v3886_v28  ;;  %v3891_v28 = vld [vmem:[#allocation3 + $0x188] sm:$0xff] }
 0xd21   :  { %4118 = vmatprep.subr.bf16.mxu0 %v3897_v29  ;;  %v3890_v29 = vld [vmem:[#allocation3 + $0x180] sm:$0xff] }
 0xd22   :  { %4170 = vmatpush1.bf16.msra.mxu1 %v3888_v35  ;;  %v3921_v35 = vld [vmem:[#allocation3 + $0x278] sm:$0xff] }
 0xd23   :  { %4171 = vmatprep.subr.bf16.mxu1 %v3899_v36  ;;  %v3931_v36 = vld [vmem:[#allocation3 + $0x2c8] sm:$0xff] }
 0xd24   :  { %4119 = vmatpush1.bf16.msra.mxu0 %v3896_v33  ;;  %v3911_v33 = vld [vmem:[#allocation3 + $0x228] sm:$0xff] }
 0xd25   :  { %4120 = vmatprep.subr.bf16.mxu0 %v3907_v34  ;;  %v3910_v34 = vld [vmem:[#allocation3 + $0x220] sm:$0xff] }
 0xd26   :  { %4172 = vmatpush1.bf16.msra.mxu1 %v3898_v41  ;;  %v3940_v41 = vld [vmem:[#allocation3 + $0x310] sm:$0xff] }
 0xd27   :  { %4173 = vmatprep.subr.bf16.mxu1 %v3909_v14  ;;  %v3951_v14 = vld [vmem:[#allocation3 + $0x368] sm:$0xff] }
 0xd28   :  { %4121 = vmatpush1.bf16.msra.mxu0 %v3906_v38  ;;  %v3930_v38 = vld [vmem:[#allocation3 + $0x2c0] sm:$0xff] }
 0xd29   :  { %4122 = vmatprep.subr.bf16.mxu0 %v3917_v39  ;;  %v3941_v39 = vld [vmem:[#allocation3 + $0x318] sm:$0xff] }
 0xd2a   :  { %4174 = vmatpush1.bf16.msra.mxu1 %v3908_v42  ;;  %v3960_v42 = vld [vmem:[#allocation3 + $0x3b0] sm:$0xff] }
 0xd2b   :  { %4175 = vmatprep.subr.bf16.mxu1 %v3919_v62  ;;  %v3971_v62 = vld [vmem:[#allocation3 + $0x408] sm:$0xff] }
 0xd2c   :  { %4123 = vmatpush1.bf16.msra.mxu0 %v3916_v16  ;;  %v3950_v16 = vld [vmem:[#allocation3 + $0x360] sm:$0xff] }
 0xd2d   :  { %4124 = vmatprep.subr.bf16.mxu0 %v3927_v60  ;;  %v3961_v60 = vld [vmem:[#allocation3 + $0x3b8] sm:$0xff] }
 0xd2e   :  { %4176 = vmatpush1.bf16.msra.mxu1 %v3918_v13  ;;  %v3980_v13 = vld [vmem:[#allocation3 + $0x450] sm:$0xff] }
 0xd2f   :  { %4177 = vmatprep.subr.bf16.mxu1 %v3929_v2  ;;  %v3991_v2 = vld [vmem:[#allocation3 + $0x4a8] sm:$0xff] }
 0xd30   :  { %4125 = vmatpush1.bf16.msra.mxu0 %v3926_v7  ;;  %v3970_v7 = vld [vmem:[#allocation3 + $0x400] sm:$0xff] }
 0xd31   :  { %4126 = vmatprep.subr.bf16.mxu0 %v3937_v61  ;;  %v3981_v61 = vld [vmem:[#allocation3 + $0x458] sm:$0xff] }
 0xd32   :  { %4178 = vmatpush1.bf16.msra.mxu1 %v3928_v43  ;;  %v4000_v43 = vld [vmem:[#allocation3 + $0x4f0] sm:$0xff] }
 0xd33   :  { %4179 = vmatprep.subr.bf16.mxu1 %v3939_v44 }
 0xd34   :  { %4127 = vmatpush1.bf16.msra.mxu0 %v3936_v40  ;;  %v3990_v40 = vld [vmem:[#allocation3 + $0x4a0] sm:$0xff] }
 0xd35   :  { %4128 = vmatprep.subr.bf16.mxu0 %v3947_v9  ;;  %v4001_v9 = vld [vmem:[#allocation3 + $0x4f8] sm:$0xff] }
 0xd36   :  { %4180 = vmatpush1.bf16.msra.mxu1 %v3938_v48 }
 0xd37   :  { %4181 = vmatprep.subr.bf16.mxu1 %v3949_v49 }
 0xd38   :  { %4129 = vmatpush1.bf16.msra.mxu0 %v3946_v20 }
 0xd39   :  { %4130 = vmatprep.subr.bf16.mxu0 %v3957_v46 }
 0xd3a   :  { %4182 = vmatpush1.bf16.msra.mxu1 %v3948_v52 }
 0xd3b   :  { %4183 = vmatprep.subr.bf16.mxu1 %v3959_v53 }
 0xd3c   :  { %4131 = vmatpush1.bf16.msra.mxu0 %v3956_v50 }
 0xd3d   :  { %4132 = vmatprep.subr.bf16.mxu0 %v3967_v51 }
 0xd3e   :  { %4184 = vmatpush1.bf16.msra.mxu1 %v3958_v63 }
 0xd3f   :  { %4185 = vmatprep.subr.bf16.mxu1 %v3969_v1 }
 0xd40   :  { %4133 = vmatpush1.bf16.msra.mxu0 %v3966_v58 }
 0xd41   :  { %4134 = vmatprep.subr.bf16.mxu0 %v3977_v59 }
 0xd42   :  { %4186 = vmatpush1.bf16.msra.mxu1 %v3968_v4 }
 0xd43   :  { %4187 = vmatprep.subr.bf16.mxu1 %v3979_v5  ;;  %v8318_v5 = vld [vmem:[%s10652_s16] sm:$0xff]  }
 0xd44   :  { %4135 = vmatpush1.bf16.msra.mxu0 %v3976_v10 }
 0xd45   :  { %4136 = vmatprep.subr.bf16.mxu0 %v3987_v3 }
 0xd46   :  { %4188 = vmatpush1.bf16.msra.mxu1 %v3978_v8 }
 0xd47   :  { %4189 = vmatprep.subr.bf16.mxu1 %v3989_v37 }
 0xd48   :  { %4137 = vmatpush1.bf16.msra.mxu0 %v3986_v6 }
 0xd49   :  { %4138 = vmatprep.subr.bf16.mxu0 %v3997_v45 }
 0xd4a   :  { %4190 = vmatpush1.bf16.msra.mxu1 %v3988_v17  ;;  %v8319_v17 = vld [vmem:[%s10652_s16 + $0x8] sm:$0xff]  }
 0xd4b   :  { %4191 = vmatprep.subr.bf16.mxu1 %v3999_v18  ;;  %v8332_v18 = vld [vmem:[%s10652_s16 + $0x28] sm:$0xff]  }
 0xd4c   :  { %4139 = vmatpush1.bf16.msra.mxu0 %v3996_v11 }
 0xd4d   :  { %4214 = vmatprep.subr.bf16.mxu0 %v3851_v12  ;;  %v8330_v12 = vld [vmem:[%s10652_s16 + $0x20] sm:$0xff]  }
 0xd4e   :  { %4192 = vmatpush1.bf16.msra.mxu1 %v3998_v22  ;;  %v8321_v22 = vld [vmem:[%s10652_s16 + $0x18] sm:$0xff]  }
 0xd4f   :  { %4141 = vmatmul.mubr.bf16.vlgmr.msra.gmra.mrb[64].mxu0 %v9801_v15 }
 0xd50   :  { %4215 = vmatpush1.bf16.msra.mxu0 %v3850_v19  ;;  %4150 = vmatprep.mubr.bf16.mxu0 %v9807_v55  ;;  %v8320_v19 = vld [vmem:[%s10652_s16 + $0x10] sm:$0xff]  }
 0xd51   :  { %4216 = vmatprep.subr.bf16.mxu0 %v3861_v21  ;;  %4194 = vmatmul.mubr.bf16.vlgmr.msra.gmra.mrb[44].mxu1 %v9801_v15  ;;  %v8334_v21 = vld [vmem:[%s10652_s16 + $0x30] sm:$0xff]  }
 0xd52   :  { %4203 = vmatprep.mubr.bf16.mxu1 %v9807_v55 }
 0xd54   :  { %4217 = vmatpush1.bf16.msra.mxu0 %v3860_v23  ;;  %v8336_v23 = vld [vmem:[%s10652_s16 + $0x38] sm:$0xff]  }
 0xd55   :  { %4218 = vmatprep.subr.bf16.mxu0 %v3871_v24 }
 0xd57   :  { %4151 = vmatmul.mubr.bf16.gmra.mrb[68].mxu0 %v9803_v47 }
 0xd58   :  { %4219 = vmatpush1.bf16.msra.mxu0 %v3870_v25  ;;  %4246 = vmatprep.mubr.bf16.mxu0 %v9805_v54  ;;  %v3920_v54 = vld [vmem:[#allocation3 + $0x270] sm:$0xff] }
 0xd59   :  { %4220 = vmatprep.subr.bf16.mxu0 %v3881_v26  ;;  %4204 = vmatmul.mubr.bf16.gmra.mrb[48].mxu1 %v9803_v47 }
 0xd5a   :  { %4473 = vmatprep.mubr.bf16.mxu1 %v8451_v0 }
 0xd5c   :  { %4221 = vmatpush1.bf16.msra.mxu0 %v3880_v27 }
 0xd5d   :  { %4222 = vmatprep.subr.bf16.mxu0 %v3891_v28 }
 0xd60   :  { %4223 = vmatpush1.bf16.msra.mxu0 %v3890_v29 }
 0xd61   :  { %4224 = vmatprep.subr.bf16.mxu0 %v3901_v31 }
 0xd64   :  { %4225 = vmatpush1.bf16.msra.mxu0 %v3900_v32 }
 0xd65   :  { %4226 = vmatprep.subr.bf16.mxu0 %v3911_v33 }
 0xd68   :  { %4227 = vmatpush1.bf16.msra.mxu0 %v3910_v34 }
 0xd69   :  { %4228 = vmatprep.subr.bf16.mxu0 %v3921_v35 }
 0xd6c   :  { %4229 = vmatpush1.bf16.msra.mxu0 %v3920_v54 }
 0xd6d   :  { %4230 = vmatprep.subr.bf16.mxu0 %v3931_v36 }
 0xd70   :  { %4231 = vmatpush1.bf16.msra.mxu0 %v3930_v38 }
 0xd71   :  { %4232 = vmatprep.subr.bf16.mxu0 %v3941_v39 }
 0xd74   :  { %4233 = vmatpush1.bf16.msra.mxu0 %v3940_v41 }
 0xd75   :  { %4234 = vmatprep.subr.bf16.mxu0 %v3951_v14 }
 0xd78   :  { %4235 = vmatpush1.bf16.msra.mxu0 %v3950_v16 }
 0xd79   :  { %4236 = vmatprep.subr.bf16.mxu0 %v3961_v60 }
 0xd7c   :  { %4237 = vmatpush1.bf16.msra.mxu0 %v3960_v42  ;;  %v8322_v42 = vld [vmem:[%s10652_s16 + $0x40] sm:$0xff]  }
 0xd7d   :  { %4238 = vmatprep.subr.bf16.mxu0 %v3971_v62 }
 0xd80   :  { %4239 = vmatpush1.bf16.msra.mxu0 %v3970_v7 }
 0xd81   :  { %4240 = vmatprep.subr.bf16.mxu0 %v3981_v61 }
 0xd84   :  { %4241 = vmatpush1.bf16.msra.mxu0 %v3980_v13 }
 0xd85   :  { %4242 = vmatprep.subr.bf16.mxu0 %v3991_v2 }
 0xd88   :  { %4243 = vmatpush1.bf16.msra.mxu0 %v3990_v40  ;;  %v8323_v40 = vld [vmem:[%s10652_s16 + $0x48] sm:$0xff]  }
 0xd89   :  { %4244 = vmatprep.subr.bf16.mxu0 %v4001_v9  ;;  %v8324_v9 = vld [vmem:[%s10652_s16 + $0x50] sm:$0xff]  }
 0xd8c   :  { %4245 = vmatpush1.bf16.msra.mxu0 %v4000_v43  ;;  %v8325_v43 = vld [vmem:[%s10652_s16 + $0x58] sm:$0xff]  }
 0xd8f   :  { %4247 = vmatmul.mubr.bf16.vlgmr.msra.gmra.mrb[72].mxu0 %v9801_v15 }
 0xd90   :  { %4256 = vmatprep.mubr.bf16.mxu0 %v9807_v55 }
 0xd97   :  { %4257 = vmatmul.mubr.bf16.gmra.mrb[76].mxu0 %v9803_v47 }
 0xd98   :  { %4368 = vmatprep.mubr.bf16.mxu0 %v8451_v0 }
 0xde2   :  { %v4036_v44 = vpop.f32.mrb[56].mxu0 }
 0xde3   :  { %v4038_v20 = vpop.f32.mrb[57].mxu0 }
 0xde4   :  { %v4040_v46 = vpop.f32.mrb[58].mxu0  ;;  %v4089_v51 = vpop.f32.mrb[36].mxu1 }
 0xde5   :  { %v4267_v48 = vpack.c.bf16 %v4040_v46, %v4036_v44  ;;  %v4042_v49 = vpop.f32.mrb[59].mxu0  ;;  %v4091_v52 = vpop.f32.mrb[37].mxu1  ;;  %v8326_v44 = vld [vmem:[%s10652_s16 + $0x60] sm:$0xff]   ;;  %v8328_v46 = vld [vmem:[%s10652_s16 + $0x70] sm:$0xff]  }
 0xde6   :  { %v4268_v50 = vpack.c.bf16 %v4042_v49, %v4038_v20  ;;  %v4093_v53 = vpop.f32.mrb[38].mxu1  ;;  %v8327_v20 = vld [vmem:[%s10652_s16 + $0x68] sm:$0xff]  }
 0xde7   :  { %v4269_v58 = vpack.c.bf16 %v4093_v53, %v4089_v51  ;;  %v4095_v59 = vpop.f32.mrb[39].mxu1 }
 0xde8   :  { %4441 = vmatprep.subr.bf16.mxu1 %v4268_v50  ;;  %v4270_v63 = vpack.c.bf16 %v4095_v59, %v4091_v52 }
 0xde9   :  { %4442 = vmatpush1.bf16.msra.mxu1 %v4267_v48 }
 0xdea   :  { %v4046_v15 = vpop.f32.mrb[60].mxu0  ;;  %4336 = vmatprep.subr.bf16.mxu0 %v4270_v63 }
 0xdeb   :  { %v4048_v55 = vpop.f32.mrb[61].mxu0  ;;  %4337 = vmatpush1.bf16.msra.mxu0 %v4269_v58  ;;  %v8329_v58 = vld [vmem:[%s10652_s16 + $0x78] sm:$0xff]  }
 0xdec   :  { %v4050_v1 = vpop.f32.mrb[62].mxu0  ;;  %v4099_v4 = vpop.f32.mrb[40].mxu1 }
 0xded   :  { %v4277_v47 = vpack.c.bf16 %v4050_v1, %v4046_v15  ;;  %v4052_v10 = vpop.f32.mrb[63].mxu0  ;;  %v4101_v6 = vpop.f32.mrb[41].mxu1 }
 0xdee   :  { %v4278_v3 = vpack.c.bf16 %v4052_v10, %v4048_v55  ;;  %v4103_v45 = vpop.f32.mrb[42].mxu1  ;;  %v8331_v10 = vld [vmem:[%s10652_s16 + $0x80] sm:$0xff]  }
 0xdef   :  { %v4279_v8 = vpack.c.bf16 %v4103_v45, %v4099_v4  ;;  %v4105_v37 = vpop.f32.mrb[43].mxu1  ;;  %v8335_v4 = vld [vmem:[%s10652_s16 + $0x90] sm:$0xff]  }
 0xdf0   :  { %4443 = vmatprep.subr.bf16.mxu1 %v4278_v3  ;;  %v4280_v11 = vpack.c.bf16 %v4105_v37, %v4101_v6  ;;  %v8333_v3 = vld [vmem:[%s10652_s16 + $0x88] sm:$0xff]  }
 0xdf1   :  { %4444 = vmatpush1.bf16.msra.mxu1 %v4277_v47 }
 0xdf2   :  { %4338 = vmatprep.subr.bf16.mxu0 %v4280_v11 }
 0xdf3   :  { %4339 = vmatpush1.bf16.msra.mxu0 %v4279_v8 }
 0xdf4   :  { %7272 = vmatmul.mubr.msk.bf16.vlgmr.msra.gmra.mrb[52].mxu1 %vm2640_vm8, %v8318_v5  ;;  %v8337_v5 = vld [vmem:[%s10652_s16 + $0x98] sm:$0xff]  }
 0xdf5   :  { %4483 = vmatprep.mubr.bf16.mxu1 %v8451_v0 }
 0xdf6   :  { %7264 = vmatmul.mubr.msk.bf16.vlgmr.msra.gmra.mrb[80].mxu0 %vm2640_vm8, %v8330_v12  ;;  %v4990_v12 = vld [vmem:[%s10655_s19 + $0x80] sm:$0xff] }
 0xdf7   :  { %4378 = vmatprep.mubr.bf16.mxu0 %v8451_v0 }
 0xdfc   :  { %7273 = vmatmul.mubr.msk.bf16.gmra.mrb[56].mxu1 %vm2640_vm8, %v8319_v17  ;;  %v4991_v17 = vld [vmem:[%s10655_s19 + $0x88] sm:$0xff] }
 0xdfd   :  { %4493 = vmatprep.mubr.bf16.mxu1 %v8451_v0 }
 0xdfe   :  { %7265 = vmatmul.mubr.msk.bf16.gmra.mrb[84].mxu0 %vm2640_vm8, %v8332_v18 }
 0xdff   :  { %4388 = vmatprep.mubr.bf16.mxu0 %v8451_v0 }
 0xe04   :  { %7274 = vmatmul.mubr.msk.bf16.gmra.mrb[60].mxu1 %vm2640_vm8, %v8320_v19  ;;  %v7736_v19 = vpack.c.bf16 %v4991_v17, %v4990_v12  ;;  %v4988_v17 = vld [vmem:[%s10655_s19 + $0x70] sm:$0xff] }
 0xe05   :  { %4503 = vmatprep.mubr.bf16.mxu1 %v8451_v0 }
 0xe06   :  { %7266 = vmatmul.mubr.msk.bf16.gmra.mrb[88].mxu0 %vm2640_vm8, %v8334_v21  ;;  %v4974_v21 = vld [vmem:[%s10655_s19] sm:$0xff]  ;;  %7737 = vmatprep.subr.bf16.mxu0 %v7736_v19  ;;  %v4989_v19 = vld [vmem:[%s10655_s19 + $0x78] sm:$0xff] }
 0xe07   :  { %4398 = vmatprep.mubr.bf16.mxu0 %v8451_v0 }
 0xe0c   :  { %7275 = vmatmul.mubr.msk.bf16.gmra.mrb[64].mxu1 %vm2640_vm8, %v8321_v22  ;;  %v4975_v22 = vld [vmem:[%s10655_s19 + $0x8] sm:$0xff] }
 0xe0d   :  { %4587 = vmatprep.mubr.bf16.mxu1 %v8451_v0 }
 0xe0e   :  { %7267 = vmatmul.mubr.msk.bf16.gmra.mrb[92].mxu0 %vm2640_vm8, %v8336_v23 }
 0xe22   :  { %v4142_v24 = vpop.f32.mrb[64].mxu0 }
 0xe23   :  { %v4144_v25 = vpop.f32.mrb[65].mxu0 }
 0xe24   :  { %v4146_v26 = vpop.f32.mrb[66].mxu0  ;;  %v4195_v31 = vpop.f32.mrb[44].mxu1 }
 0xe25   :  { %v4271_v27 = vpack.c.bf16 %v4146_v26, %v4142_v24  ;;  %v4148_v28 = vpop.f32.mrb[67].mxu0  ;;  %v4197_v32 = vpop.f32.mrb[45].mxu1  ;;  %v7738_v24 = vpack.c.bf16 %v4975_v22, %v4974_v21  ;;  %v4992_v26 = vld [vmem:[%s10655_s19 + $0x90] sm:$0xff]  ;;  %v7766_v21 = vpack.c.bf16 %v4989_v19, %v4988_v17 }
 0xe26   :  { %v4272_v29 = vpack.c.bf16 %v4148_v28, %v4144_v25  ;;  %v4199_v33 = vpop.f32.mrb[46].mxu1 }
 0xe27   :  { %v4273_v35 = vpack.c.bf16 %v4199_v33, %v4195_v31  ;;  %v4201_v54 = vpop.f32.mrb[47].mxu1  ;;  %7739 = vmatpush3.bf16.msra.mxu0 %v7738_v24  ;;  %v4977_v31 = vld [vmem:[%s10655_s19 + $0x18] sm:$0xff] }
 0xe28   :  { %4555 = vmatprep.subr.bf16.mxu1 %v4272_v29  ;;  %v4274_v38 = vpack.c.bf16 %v4201_v54, %v4197_v32  ;;  %v4976_v29 = vld [vmem:[%s10655_s19 + $0x10] sm:$0xff] }
 0xe29   :  { %4556 = vmatpush1.bf16.msra.mxu1 %v4271_v27  ;;  %v4993_v27 = vld [vmem:[%s10655_s19 + $0x98] sm:$0xff]  ;;  %v7742_v32 = vpack.c.bf16 %v4977_v31, %v4976_v29 }
 0xe2a   :  { %v4152_v34 = vpop.f32.mrb[68].mxu0  ;;  %v7740_v28 = vpack.c.bf16 %v4993_v27, %v4992_v26 }
 0xe2b   :  { %v4154_v36 = vpop.f32.mrb[69].mxu0 }
 0xe2c   :  { %v4156_v39 = vpop.f32.mrb[70].mxu0  ;;  %v4205_v60 = vpop.f32.mrb[48].mxu1  ;;  %7741 = vmatprep.subr.bf16.mxu0 %v7740_v28 }
 0xe2d   :  { %v4281_v41 = vpack.c.bf16 %v4156_v39, %v4152_v34  ;;  %v4158_v14 = vpop.f32.mrb[71].mxu0  ;;  %v4207_v62 = vpop.f32.mrb[49].mxu1  ;;  %7743 = vmatpush3.bf16.msra.mxu0 %v7742_v32  ;;  %v4994_v34 = vld [vmem:[%s10655_s19 + $0xa0] sm:$0xff]  ;;  %v4979_v39 = vld [vmem:[%s10655_s19 + $0x28] sm:$0xff] }
 0xe2e   :  { %v4282_v16 = vpack.c.bf16 %v4158_v14, %v4154_v36  ;;  %v4209_v7 = vpop.f32.mrb[50].mxu1 }
 0xe2f   :  { %v4283_v61 = vpack.c.bf16 %v4209_v7, %v4205_v60  ;;  %v4211_v13 = vpop.f32.mrb[51].mxu1  ;;  %v4996_v60 = vld [vmem:[%s10655_s19 + $0xb0] sm:$0xff] }
 0xe30   :  { %4557 = vmatprep.subr.bf16.mxu1 %v4282_v16  ;;  %v4284_v2 = vpack.c.bf16 %v4211_v13, %v4207_v62  ;;  %v4980_v7 = vld [vmem:[%s10655_s19 + $0x30] sm:$0xff] }
 0xe31   :  { %4558 = vmatpush1.bf16.msra.mxu1 %v4281_v41 }
 0xe32   :  { %4685 = vmatprep.subr.bf16.mxu1 %v4274_v38  ;;  %v4978_v38 = vld [vmem:[%s10655_s19 + $0x20] sm:$0xff] }
 0xe33   :  { %v7746_v14 = vpack.c.bf16 %v4979_v39, %v4978_v38 }
 0xe34   :  { %7288 = vmatmul.mubr.msk.bf16.vlgmr.msra.gmra.mrb[52].mxu1 %vm2640_vm8, %v8322_v42  ;;  %v4997_v42 = vld [vmem:[%s10655_s19 + $0xb8] sm:$0xff] }
 0xe35   :  { %4597 = vmatprep.mubr.bf16.mxu1 %v8451_v0  ;;  %4686 = vmatpush1.bf16.msra.mxu1 %v4273_v35  ;;  %v4995_v35 = vld [vmem:[%s10655_s19 + $0xa8] sm:$0xff]  ;;  %v7748_v62 = vpack.c.bf16 %v4997_v42, %v4996_v60 }
 0xe36   :  { %4687 = vmatprep.subr.bf16.mxu1 %v4284_v2  ;;  %v7744_v36 = vpack.c.bf16 %v4995_v35, %v4994_v34 }
 0xe38   :  { %7745 = vmatprep.subr.bf16.mxu0 %v7744_v36 }
 0xe39   :  { %4688 = vmatpush1.bf16.msra.mxu1 %v4283_v61  ;;  %7747 = vmatpush3.bf16.msra.mxu0 %v7746_v14  ;;  %v4981_v61 = vld [vmem:[%s10655_s19 + $0x38] sm:$0xff] }
 0xe3a   :  { %v7750_v13 = vpack.c.bf16 %v4981_v61, %v4980_v7  ;;  %7749 = vmatprep.subr.bf16.mxu0 %v7748_v62 }
 0xe3c   :  { %7289 = vmatmul.mubr.msk.bf16.gmra.mrb[56].mxu1 %vm2640_vm8, %v8323_v40  ;;  %v4998_v40 = vld [vmem:[%s10655_s19 + $0xc0] sm:$0xff] }
 0xe3d   :  { %4607 = vmatprep.mubr.bf16.mxu1 %v8451_v0  ;;  %7751 = vmatpush3.bf16.msra.mxu0 %v7750_v13 }
 0xe44   :  { %7290 = vmatmul.mubr.msk.bf16.gmra.mrb[60].mxu1 %vm2640_vm8, %v8324_v9  ;;  %v4999_v9 = vld [vmem:[%s10655_s19 + $0xc8] sm:$0xff] }
 0xe45   :  { %4617 = vmatprep.mubr.bf16.mxu1 %v8451_v0 }
 0xe4c   :  { %7291 = vmatmul.mubr.msk.bf16.gmra.mrb[64].mxu1 %vm2640_vm8, %v8325_v43 }
 0xe4d   :  { %4717 = vmatprep.mubr.bf16.mxu1 %v8451_v0 }
 0xe54   :  { %7304 = vmatmul.mubr.msk.bf16.vlgmr.msra.gmra.mrb[52].mxu1 %vm2640_vm8, %v8326_v44  ;;  %v7752_v44 = vpack.c.bf16 %v4999_v9, %v4998_v40 }
 0xe55   :  { %4727 = vmatprep.mubr.bf16.mxu1 %v8451_v0 }
 0xe56   :  { %7753 = vmatprep.subr.bf16.mxu0 %v7752_v44 }
 0xe5c   :  { %7305 = vmatmul.mubr.msk.bf16.gmra.mrb[56].mxu1 %vm2640_vm8, %v8327_v20  ;;  %v4982_v20 = vld [vmem:[%s10655_s19 + $0x40] sm:$0xff] }
 0xe5d   :  { %4737 = vmatprep.mubr.bf16.mxu1 %v8451_v0 }
 0xe62   :  { %v4248_v48 = vpop.f32.mrb[72].mxu0 }
 0xe63   :  { %v4250_v49 = vpop.f32.mrb[73].mxu0 }
 0xe64   :  { %v4252_v50 = vpop.f32.mrb[74].mxu0  ;;  %7306 = vmatmul.mubr.msk.bf16.gmra.mrb[60].mxu1 %vm2640_vm8, %v8328_v46  ;;  %v4983_v46 = vld [vmem:[%s10655_s19 + $0x48] sm:$0xff] }
 0xe65   :  { %v4275_v51 = vpack.c.bf16 %v4252_v50, %v4248_v48  ;;  %v4254_v52 = vpop.f32.mrb[75].mxu0  ;;  %4747 = vmatprep.mubr.bf16.mxu1 %v8451_v0 }
 0xe66   :  { %v4276_v53 = vpack.c.bf16 %v4254_v52, %v4250_v49  ;;  %v7754_v49 = vpack.c.bf16 %v4983_v46, %v4982_v20  ;;  %v5001_v52 = vld [vmem:[%s10655_s19 + $0xd8] sm:$0xff] }
 0xe68   :  { %4815 = vmatprep.subr.bf16.mxu1 %v4276_v53  ;;  %7755 = vmatpush3.bf16.msra.mxu0 %v7754_v49 }
 0xe69   :  { %4816 = vmatpush1.bf16.msra.mxu1 %v4275_v51  ;;  %v5000_v51 = vld [vmem:[%s10655_s19 + $0xd0] sm:$0xff] }
 0xe6a   :  { %v4258_v59 = vpop.f32.mrb[76].mxu0  ;;  %v7756_v53 = vpack.c.bf16 %v5001_v52, %v5000_v51 }
 0xe6b   :  { %v4260_v15 = vpop.f32.mrb[77].mxu0 }
 0xe6c   :  { %v4262_v63 = vpop.f32.mrb[78].mxu0  ;;  %7307 = vmatmul.mubr.msk.bf16.gmra.mrb[64].mxu1 %vm2640_vm8, %v8329_v58  ;;  %v4984_v58 = vld [vmem:[%s10655_s19 + $0x50] sm:$0xff]  ;;  %7757 = vmatprep.subr.bf16.mxu0 %v7756_v53 }
 0xe6d   :  { %v4285_v55 = vpack.c.bf16 %v4262_v63, %v4258_v59  ;;  %v4264_v1 = vpop.f32.mrb[79].mxu0  ;;  %4847 = vmatprep.mubr.bf16.mxu1 %v8451_v0  ;;  %v4985_v59 = vld [vmem:[%s10655_s19 + $0x58] sm:$0xff]  ;;  %v5002_v63 = vld [vmem:[%s10655_s19 + $0xe0] sm:$0xff] }
 0xe6e   :  { %v4286_v47 = vpack.c.bf16 %v4264_v1, %v4260_v15  ;;  %v7758_v15 = vpack.c.bf16 %v4985_v59, %v4984_v58  ;;  %v4986_v1 = vld [vmem:[%s10655_s19 + $0x60] sm:$0xff] }
 0xe70   :  { %4817 = vmatprep.subr.bf16.mxu1 %v4286_v47  ;;  %7759 = vmatpush3.bf16.msra.mxu0 %v7758_v15 }
 0xe71   :  { %4818 = vmatpush1.bf16.msra.mxu1 %v4285_v55  ;;  %v5003_v55 = vld [vmem:[%s10655_s19 + $0xe8] sm:$0xff] }
 0xe72   :  { %v7760_v47 = vpack.c.bf16 %v5003_v55, %v5002_v63 }
 0xe74   :  { %7320 = vmatmul.mubr.msk.bf16.vlgmr.msra.gmra.mrb[52].mxu1 %vm2640_vm8, %v8331_v10  ;;  %v4987_v10 = vld [vmem:[%s10655_s19 + $0x68] sm:$0xff]  ;;  %7761 = vmatprep.subr.bf16.mxu0 %v7760_v47 }
 0xe75   :  { %4857 = vmatprep.mubr.bf16.mxu1 %v8451_v0 }
 0xe7c   :  { %7321 = vmatmul.mubr.msk.bf16.gmra.mrb[56].mxu1 %vm2640_vm8, %v8333_v3  ;;  %v5004_v3 = vld [vmem:[%s10655_s19 + $0xf0] sm:$0xff] }
 0xe7d   :  { %4867 = vmatprep.mubr.bf16.mxu1 %v8451_v0 }
 0xe84   :  { %7322 = vmatmul.mubr.msk.bf16.gmra.mrb[60].mxu1 %vm2640_vm8, %v8335_v4  ;;  %v5005_v4 = vld [vmem:[%s10655_s19 + $0xf8] sm:$0xff] }
 0xe85   :  { %4877 = vmatprep.mubr.bf16.mxu1 %v8451_v0  ;;  %v7764_v12 = vpack.c.bf16 %v5005_v4, %v5004_v3 }
 0xe8c   :  { %7323 = vmatmul.mubr.msk.bf16.gmra.mrb[64].mxu1 %vm2640_vm8, %v8337_v5  ;;  %v7762_v5 = vpack.c.bf16 %v4987_v10, %v4986_v1 }
 0xe8e   :  { %7763 = vmatpush3.bf16.msra.mxu0 %v7762_v5 }
 0xe8f   :  { %7765 = vmatprep.subr.bf16.mxu0 %v7764_v12 }
 0xe92   :  { %7767 = vmatpush3.bf16.msra.mxu0 %v7766_v21 }
 0xec9   :  { %v9929_v6 = vpop.f32.mrb[80].mxu0 }
 0xeca   :  { %v9931_v45 = vpop.f32.mrb[81].mxu0 }
 0xecb   :  { %v9933_v8 = vpop.f32.mrb[82].mxu0 }
 0xecc   :  { %v9935_v37 = vpop.f32.mrb[83].mxu0 }
 0xed1   :  { %v9937_v11 = vpop.f32.mrb[84].mxu0 }
 0xed2   :  { %v9945_v18 = vpop.f32.mrb[85].mxu0 }
 0xed3   :  { %v9953_v23 = vpop.f32.mrb[86].mxu0 }
 0xed4   :  { %v9955_v25 = vpop.f32.mrb[87].mxu0 }
 0xed9   :  { %v9969_v33 = vpop.f32.mrb[88].mxu0 }
 0xeda   :  { %v9977_v54 = vpop.f32.mrb[89].mxu0 }
 0xedb   :  { %v9985_v41 = vpop.f32.mrb[90].mxu0 }
 0xedc   :  { %v9987_v16 = vpop.f32.mrb[91].mxu0 }
 0xee1   :  { %v10001_v2 = vpop.f32.mrb[92].mxu0 }
 0xee2   :  { %v10009_v43 = vpop.f32.mrb[93].mxu0 }
 0xee3   :  { %v10017_v48 = vpop.f32.mrb[94].mxu0 }
 0xee4   :  { %v10019_v50 = vpop.f32.mrb[95].mxu0 }
 0xf47   :  { %v4849_v22 = vpop.f32.mrb[52].mxu1 }
 0xf48   :  { %v10058_v24 = vadd.f32 %v4849_v22, %v9929_v6  ;;  %v4851_v26 = vpop.f32.mrb[53].mxu1 }
 0xf49   :  { %v10061_v27 = vadd.f32 %v4851_v26, %v9931_v45  ;;  %v4853_v28 = vpop.f32.mrb[54].mxu1 }
 0xf4a   :  { %v10064_v29 = vadd.f32 %v4853_v28, %v9933_v8  ;;  %v4855_v31 = vpop.f32.mrb[55].mxu1 }
 0xf4b   :  { %v10067_v32 = vadd.f32 %v4855_v31, %v9935_v37 }
 0xf4c   :  { %v4932_v45 = vmul.f32 %v10064_v29, %v10064_v29 }
 0xf4d   :  { %v4933_v37 = vmul.f32 %v10067_v32, %v10067_v32  ;;  %v4917_v42 = vadd.f32 %v10067_v32, %v10061_v27 }
 0xf4f   :  { %v4859_v34 = vpop.f32.mrb[56].mxu1 }
 0xf50   :  { %v10070_v35 = vadd.f32 %v4859_v34, %v9937_v11  ;;  %v4861_v36 = vpop.f32.mrb[57].mxu1  ;;  %v4930_v11 = vmul.f32 %v10058_v24, %v10058_v24 }
 0xf51   :  { %v10073_v6 = vadd.f32 %v4861_v36, %v9945_v18  ;;  %v4863_v38 = vpop.f32.mrb[58].mxu1  ;;  %v4904_v18 = vadd.f32 %v10064_v29, %v10058_v24 }
 0xf52   :  { %v10078_v39 = vadd.f32 %v4863_v38, %v9953_v23  ;;  %v4865_v8 = vpop.f32.mrb[59].mxu1  ;;  %v4934_v60 = vmul.f32 %v10070_v35, %v10070_v35  ;;  %v4931_v23 = vmul.f32 %v10061_v27, %v10061_v27 }
 0xf53   :  { %v10083_v14 = vadd.f32 %v4865_v8, %v9955_v25  ;;  %v4935_v62 = vmul.f32 %v10073_v6, %v10073_v6  ;;  %v4946_v25 = vadd.f32 %v4932_v45, %v4930_v11  ;;  %v4905_v7 = vadd.f32 %v10070_v35, %v4904_v18 }
 0xf54   :  { %v4959_v61 = vadd.f32 %v4933_v37, %v4931_v23  ;;  %v4918_v13 = vadd.f32 %v10073_v6, %v4917_v42  ;;  %v4936_v44 = vmul.f32 %v10078_v39, %v10078_v39 }
 0xf55   :  { %v4947_v9 = vadd.f32 %v4946_v25, %v4934_v60  ;;  %v4937_v51 = vmul.f32 %v10083_v14, %v10083_v14  ;;  %v4906_v58 = vadd.f32 %v10078_v39, %v4905_v7 }
 0xf56   :  { %v4960_v49 = vadd.f32 %v4959_v61, %v4935_v62 }
 0xf57   :  { %v4869_v40 = vpop.f32.mrb[60].mxu1 }
 0xf58   :  { %v10102_v20 = vadd.f32 %v4869_v40, %v9969_v33  ;;  %v4871_v46 = vpop.f32.mrb[61].mxu1  ;;  %v4919_v33 = vadd.f32 %v10083_v14, %v4918_v13  ;;  %v4961_v10 = vadd.f32 %v4960_v49, %v4937_v51 }
 0xf59   :  { %v10107_v52 = vadd.f32 %v4871_v46, %v9977_v54  ;;  %v4873_v53 = vpop.f32.mrb[62].mxu1  ;;  %v4948_v54 = vadd.f32 %v4947_v9, %v4936_v44 }
 0xf5a   :  { %v4938_v59 = vmul.f32 %v10102_v20, %v10102_v20  ;;  %v10113_v15 = vadd.f32 %v4873_v53, %v9985_v41  ;;  %v4875_v63 = vpop.f32.mrb[63].mxu1  ;;  %v4907_v47 = vadd.f32 %v10102_v20, %v4906_v58 }
 0xf5b   :  { %v4939_v55 = vmul.f32 %v10107_v52, %v10107_v52  ;;  %v10119_v1 = vadd.f32 %v4875_v63, %v9987_v16  ;;  %v4920_v3 = vadd.f32 %v10107_v52, %v4919_v33 }
 0xf5c   :  { %v4949_v4 = vadd.f32 %v4948_v54, %v4938_v59  ;;  %v4940_v41 = vmul.f32 %v10113_v15, %v10113_v15  ;;  %v4908_v19 = vadd.f32 %v10113_v15, %v4907_v47 }
 0xf5d   :  { %v4962_v5 = vadd.f32 %v4961_v10, %v4939_v55  ;;  %v4941_v12 = vmul.f32 %v10119_v1, %v10119_v1  ;;  %v4921_v22 = vadd.f32 %v10119_v1, %v4920_v3 }
 0xf5e   :  { %v4950_v31 = vadd.f32 %v4949_v4, %v4940_v41 }
 0xf5f   :  { %v4879_v17 = vpop.f32.mrb[64].mxu1  ;;  %v4963_v8 = vadd.f32 %v4962_v5, %v4941_v12 }
 0xf60   :  { %v10129_v16 = vadd.f32 %v4879_v17, %v10001_v2  ;;  %v4881_v21 = vpop.f32.mrb[65].mxu1 }
 0xf61   :  { %v10133_v26 = vadd.f32 %v4881_v21, %v10009_v43  ;;  %v4883_v28 = vpop.f32.mrb[66].mxu1  ;;  %v5096_v21 = vld [vmem:[%s10656_s20 + $0x8] sm:$0xff] }
 0xf62   :  { %v4909_v34 = vadd.f32 %v10129_v16, %v4908_v19  ;;  %v4942_v36 = vmul.f32 %v10129_v16, %v10129_v16  ;;  %v10139_v38 = vadd.f32 %v4883_v28, %v10017_v48  ;;  %v4885_v45 = vpop.f32.mrb[67].mxu1  ;;  %5100 = vmatprep.subr.mxu0 %v5096_v21 }
 0xf63   :  { %v4922_v2 = vadd.f32 %v10133_v26, %v4921_v22  ;;  %v4943_v37 = vmul.f32 %v10133_v26, %v10133_v26  ;;  %v10145_v43 = vadd.f32 %v4885_v45, %v10019_v50  ;;  %v5095_v22 = vld [vmem:[%s10656_s20] sm:$0xff] }
 0xf64   :  { %v4951_v11 = vadd.f32 %v4950_v31, %v4942_v36  ;;  %v4910_v18 = vadd.f32 %v10139_v38, %v4909_v34  ;;  %v4944_v60 = vmul.f32 %v10139_v38, %v10139_v38 }
 0xf65   :  { %v4964_v23 = vadd.f32 %v4963_v8, %v4943_v37  ;;  %v4923_v48 = vadd.f32 %v10145_v43, %v4922_v2  ;;  %v4945_v42 = vmul.f32 %v10145_v43, %v10145_v43 }
 0xf66   :  { %v4911_v62 = vrot.slane %v4910_v18, 4  ;;  %v4952_v25 = vadd.f32 %v4951_v11, %v4944_v60  ;;  %v5082_v11 = vld [vmem:[%s10654_s18] sm:$0x3] }
 0xf67   :  { %v4924_v7 = vrot.slane %v4923_v48, 4  ;;  %v4965_v61 = vadd.f32 %v4964_v23, %v4945_v42 }
 0xf68   :  { %v4912_v13 = vadd.f32 %v4911_v62, %v4910_v18  ;;  %v4953_v40 = vrot.slane %v4952_v25, 4 }
 0xf69   :  { %v4925_v50 = vadd.f32 %v4924_v7, %v4923_v48  ;;  %v4966_v9 = vrot.slane %v4965_v61, 4 }
 0xf6a   :  { %v4913_v44 = vrot.slane %v4912_v13, 2  ;;  %v4954_v46 = vadd.f32 %v4953_v40, %v4952_v25 }
 0xf6b   :  { %v4926_v49 = vrot.slane %v4925_v50, 2  ;;  %v4967_v51 = vadd.f32 %v4966_v9, %v4965_v61 }
 0xf6c   :  { %v4914_v53 = vadd.f32 %v4913_v44, %v4912_v13  ;;  %v4955_v58 = vrot.slane %v4954_v46, 2 }
 0xf6d   :  { %v4927_v59 = vadd.f32 %v4926_v49, %v4925_v50  ;;  %v4968_v63 = vrot.slane %v4967_v51, 2 }
 0xf6e   :  { %v4956_v33 = vadd.f32 %v4955_v58, %v4954_v46  ;;  %v4915_v47 = vrot.slane %v4914_v53, 1 }
 0xf6f   :  { %v4928_v55 = vrot.slane %v4927_v59, 1  ;;  %v4969_v54 = vadd.f32 %v4968_v63, %v4967_v51 }
 0xf70   :  { %v4957_v10 = vrot.slane %v4956_v33, 1  ;;  %v4916_v12 = vadd.f32 %v4915_v47, %v4914_v53 }
 0xf71   :  { %v4970_v3 = vrot.slane %v4969_v54, 1  ;;  %v4929_v41 = vadd.f32 %v4928_v55, %v4927_v59 }
 0xf72   :  { %v4958_v4 = vadd.f32 %v4957_v10, %v4956_v33 }
 0xf73   :  { %v4971_v5 = vadd.f32 %v4970_v3, %v4969_v54 }
 0xf74   :  { %v4972_v19 = vsel %vm461_vm1, %v4916_v12, %v4958_v4 }
 0xf75   :  { %v4973_v17 = vsel %vm461_vm1, %v4929_v41, %v4971_v5 }
 0xf76   :  { %5070 = vmatprep.mubr.f32.mxu0 %v4973_v17 }
 0xf77   :  { %5071 = vmatmul.mubr.f32.vlgmr.msra.gmra.mrb[38].mxu0 %v4972_v19 }
 0xf78   :  { %5164 = vmatprep.mubr.f32.mxu0 %v8467_v30  ;;  %5101 = vmatpush1.msra.mxu0 %v5095_v22 }
0x104a   :  { %v7609_v28 = vpop.f32.mrb[38].mxu0 }
0x104b   :  { %v7610_v31 = vpop.f32.mrb[39].mxu0 }
0x104c   :  { %v7611_v34 = vadd.f32 %v7610_v31, %v7609_v28 }
0x104e   :  { %v5076_v36 = vmul.f32 0.00048828125, %v7611_v34 }
0x1050   :  { %v5077_v45 = vmul.f32 %v5076_v36, %v5076_v36 }
0x1052   :  { %v5079_v8 = vrot.slane %v5077_v45, 7 }
0x1054   :  { %v5081_v2 = vsub.f32 %v5076_v36, %v5079_v8 }
0x1056   :  { %v5083_v37 = vadd.f32 1e-05, %v5081_v2 }
0x1058   :  { %8338 = vrsqrt.f32 %v5083_v37 }
0x1062   :  { %v8339_v30 = vpop.eup %8338 }
0x1063   :  { %v5086_v18 = vrot.slane %v8339_v30, 1 }
0x1065   :  { %v5088_v60 = vmul.f32 %v5086_v18, %v5082_v11 }
0x1067   :  { %v5089_v23 = vmul.f32 %v5088_v60, %v5076_v36 }
0x1069   :  { %v5091_v48 = vrot.slane %v5089_v23, 7 }
0x106b   :  { %v5093_v42 = vsub.f32 %v5082_v11, %v5091_v48 }
0x106d   :  { %v5094_v62 = vsel %vm461_vm1, %v5088_v60, %v5093_v42 }
0x106e   :  { %7324 = vmatmul.mubr.msk.f32.vlgmr.msra.gmra.mrb[96].mxu0 %vm2174_vm7, %v5094_v62 }
0x1141   :  { %v5166_v25 = vpop.f32.mrb[96].mxu0 }
0x1142   :  { %v5174_v7 = vrot.slane %v5166_v25, %v9069_v56  ;;  %v5168_v61 = vpop.f32.mrb[97].mxu0  ;;  %v5198_v13 = vrot.slane %v5166_v25, %v9071_v57 }
0x1143   :  { %v5178_v40 = vrot.slane %v5168_v61, %v9069_v56  ;;  %v5202_v50 = vrot.slane %v5168_v61, %v9071_v57 }
0x1144   :  { %v5179_v9 = vmul.f32 %v10058_v24, %v5174_v7  ;;  %v5181_v44 = vmul.f32 %v10064_v29, %v5174_v7  ;;  %v5183_v46 = vmul.f32 %v10070_v35, %v5174_v7  ;;  %v5185_v49 = vmul.f32 %v10078_v39, %v5174_v7 }
0x1145   :  { %v5187_v51 = vmul.f32 %v10102_v20, %v5174_v7  ;;  %v5189_v53 = vmul.f32 %v10113_v15, %v5174_v7  ;;  %v5191_v58 = vmul.f32 %v10129_v16, %v5174_v7  ;;  %v5193_v59 = vmul.f32 %v10139_v38, %v5174_v7 }
0x1146   :  { %v5203_v63 = vadd.f32 %v5198_v13, %v5179_v9  ;;  %v5205_v56 = vadd.f32 %v5198_v13, %v5181_v44  ;;  %v5207_v33 = vadd.f32 %v5198_v13, %v5183_v46  ;;  %v5209_v57 = vadd.f32 %v5198_v13, %v5185_v49 }
0x1147   :  { %v5211_v55 = vadd.f32 %v5198_v13, %v5187_v51  ;;  %v5213_v24 = vadd.f32 %v5198_v13, %v5189_v53  ;;  %v5215_v54 = vadd.f32 %v5198_v13, %v5191_v58  ;;  %v5217_v29 = vadd.f32 %v5198_v13, %v5193_v59 }
0x1148   :  { %vm5219_vm1 = vcmp.ge.f32.partialorder %v5203_v63, 0.0  ;;  %vm5221_vm7 = vcmp.ge.f32.partialorder %v5205_v56, 0.0  ;;  %vm5223_vm8 = vcmp.ge.f32.partialorder %v5207_v33, 0.0  ;;  %vm5225_vm9 = vcmp.ge.f32.partialorder %v5209_v57, 0.0 }
0x1149   :  { %vm5227_vm10 = vcmp.ge.f32.partialorder %v5211_v55, 0.0  ;;  %vm5229_vm11 = vcmp.ge.f32.partialorder %v5213_v24, 0.0  ;;  %vm5231_vm12 = vcmp.ge.f32.partialorder %v5215_v54, 0.0  ;;  %vm5233_vm13 = vcmp.ge.f32.partialorder %v5217_v29, 0.0 }
0x114a   :  { %v5235_v35 = vmul.f32 0.2, %v5203_v63  ;;  %v5237_v39 = vmul.f32 0.2, %v5205_v56  ;;  %v5239_v20 = vmul.f32 0.2, %v5207_v33  ;;  %v5180_v15 = vmul.f32 %v10061_v27, %v5178_v40 }
0x114b   :  { %v5241_v16 = vmul.f32 0.2, %v5209_v57  ;;  %v5243_v38 = vmul.f32 0.2, %v5211_v55  ;;  %v5245_v47 = vmul.f32 0.2, %v5213_v24  ;;  %v5182_v10 = vmul.f32 %v10067_v32, %v5178_v40 }
0x114c   :  { %v5247_v3 = vmul.f32 0.2, %v5215_v54  ;;  %v5249_v4 = vmul.f32 0.2, %v5217_v29  ;;  %v5251_v41 = vsel %vm5219_vm1, %v5203_v63, %v5235_v35  ;;  %v5253_v5 = vsel %vm5221_vm7, %v5205_v56, %v5237_v39 }
0x114d   :  { %v5255_v12 = vsel %vm5223_vm8, %v5207_v33, %v5239_v20  ;;  %v5257_v17 = vsel %vm5225_vm9, %v5209_v57, %v5241_v16  ;;  %v5259_v19 = vsel %vm5227_vm10, %v5211_v55, %v5243_v38  ;;  %v5261_v21 = vsel %vm5229_vm11, %v5213_v24, %v5245_v47 }
0x114e   :  { %v5263_v27 = vsel %vm5231_vm12, %v5215_v54, %v5247_v3  ;;  %v5265_v22 = vsel %vm5233_vm13, %v5217_v29, %v5249_v4  ;;  %v10189_v28 = vpack.c.bf16 %v5253_v5, %v5251_v41  ;;  %v10191_v32 = vpack.c.bf16 %v5257_v17, %v5255_v12 }
0x114f   :  { %v10193_v31 = vpack.c.bf16 %v5261_v21, %v5259_v19  ;;  %v10195_v34 = vpack.c.bf16 %v5265_v22, %v5263_v27  ;;  %v5184_v36 = vmul.f32 %v10073_v6, %v5178_v40  ;;  %v5186_v45 = vmul.f32 %v10083_v14, %v5178_v40 }
0x1150   :  { %v5188_v8 = vmul.f32 %v10107_v52, %v5178_v40  ;;  %v5190_v2 = vmul.f32 %v10119_v1, %v5178_v40  ;;  %v5192_v37 = vmul.f32 %v10133_v26, %v5178_v40  ;;  %v5194_v30 = vmul.f32 %v10145_v43, %v5178_v40 }
0x1151   :  { %v5204_v11 = vadd.f32 %v5202_v50, %v5180_v15  ;;  %v5206_v18 = vadd.f32 %v5202_v50, %v5182_v10  ;;  %v5208_v60 = vadd.f32 %v5202_v50, %v5184_v36  ;;  %v5210_v23 = vadd.f32 %v5202_v50, %v5186_v45 }
0x1152   :  { %v5212_v48 = vadd.f32 %v5202_v50, %v5188_v8  ;;  %v5214_v42 = vadd.f32 %v5202_v50, %v5190_v2  ;;  %v5216_v62 = vadd.f32 %v5202_v50, %v5192_v37  ;;  %v5218_v25 = vadd.f32 %v5202_v50, %v5194_v30 }
0x1153   :  { %vm5220_vm14 = vcmp.ge.f32.partialorder %v5204_v11, 0.0  ;;  %vm5222_vm15 = vcmp.ge.f32.partialorder %v5206_v18, 0.0  ;;  %vm5224_vm0 = vcmp.ge.f32.partialorder %v5208_v60, 0.0  ;;  %vm5226_vm2 = vcmp.ge.f32.partialorder %v5210_v23, 0.0 }
0x1154   :  { %vm5228_vm4 = vcmp.ge.f32.partialorder %v5212_v48, 0.0  ;;  %vm5230_vm5 = vcmp.ge.f32.partialorder %v5214_v42, 0.0  ;;  %vm5232_vm6 = vcmp.ge.f32.partialorder %v5216_v62, 0.0  ;;  %vm5234_vm1 = vcmp.ge.f32.partialorder %v5218_v25, 0.0 }
0x1155   :  { %v5236_v6 = vmul.f32 0.2, %v5204_v11  ;;  %v5238_v14 = vmul.f32 0.2, %v5206_v18  ;;  %v5240_v52 = vmul.f32 0.2, %v5208_v60 }
0x1156   :  { %v5242_v1 = vmul.f32 0.2, %v5210_v23  ;;  %v5244_v26 = vmul.f32 0.2, %v5212_v48  ;;  %v5246_v43 = vmul.f32 0.2, %v5214_v42 }
0x1157   :  { %v5248_v7 = vmul.f32 0.2, %v5216_v62  ;;  %v5250_v61 = vmul.f32 0.2, %v5218_v25  ;;  %v5252_v13 = vsel %vm5220_vm14, %v5204_v11, %v5236_v6  ;;  %v5254_v40 = vsel %vm5222_vm15, %v5206_v18, %v5238_v14 }
0x1158   :  { %v5256_v50 = vsel %vm5224_vm0, %v5208_v60, %v5240_v52  ;;  %v5258_v9 = vsel %vm5226_vm2, %v5210_v23, %v5242_v1  ;;  %v5260_v44 = vsel %vm5228_vm4, %v5212_v48, %v5244_v26  ;;  %v5262_v46 = vsel %vm5230_vm5, %v5214_v42, %v5246_v43 }
0x1159   :  { %v5264_v49 = vsel %vm5232_vm6, %v5216_v62, %v5248_v7  ;;  %v5266_v51 = vsel %vm5234_vm1, %v5218_v25, %v5250_v61  ;;  %v10211_v53 = vpack.c.bf16 %v5254_v40, %v5252_v13  ;;  %v10213_v58 = vpack.c.bf16 %v5258_v9, %v5256_v50 }
0x115a   :  { %v10215_v59 = vpack.c.bf16 %v5262_v46, %v5260_v44  ;;  %v10217_v63 = vpack.c.bf16 %v5266_v51, %v5264_v49 }
0x115b   :  { %8448 = dma.done.wait [#allocation5 + $0x2], 20480 }
0x115c   :  { %8449 = vsyncadd [#allocation5 + $0x2], 4294946816  ;;  %5542 = vmatprep.mubr.bf16.mxu1 %v10211_v53  ;;  %5469 = vmatprep.mubr.bf16.mxu0 %v10211_v53  ;;  %v5280_v56 = vld [vmem:[#allocation4 + $0x18] sm:$0xff]  ;;  %v5279_v33 = vld [vmem:[#allocation4 + $0x10] sm:$0xff] }
0x115d   :  { %v5290_v57 = vld [vmem:[#allocation4 + $0x68] sm:$0xff]  ;;  %5510 = vmatprep.subr.bf16.mxu1 %v5280_v56  ;;  %v5289_v55 = vld [vmem:[#allocation4 + $0x60] sm:$0xff]  ;;  %v5300_v24 = vld [vmem:[#allocation4 + $0xb8] sm:$0xff] }
0x115e   :  { %5511 = vmatpush1.bf16.msra.mxu1 %v5279_v33  ;;  %v5278_v54 = vld [vmem:[#allocation4 + $0x8] sm:$0xff]  ;;  %v5277_v29 = vld [vmem:[#allocation4] sm:$0xff]  ;;  %v5288_v35 = vld [vmem:[#allocation4 + $0x58] sm:$0xff] }
0x115f   :  { %5512 = vmatprep.subr.bf16.mxu1 %v5290_v57  ;;  %5437 = vmatprep.subr.bf16.mxu0 %v5278_v54  ;;  %v5299_v39 = vld [vmem:[#allocation4 + $0xb0] sm:$0xff]  ;;  %v5310_v15 = vld [vmem:[#allocation4 + $0x108] sm:$0xff]  ;;  %v5309_v38 = vld [vmem:[#allocation4 + $0x100] sm:$0xff] }
0x1160   :  { %5438 = vmatpush1.bf16.msra.mxu0 %v5277_v29  ;;  %v5287_v20 = vld [vmem:[#allocation4 + $0x50] sm:$0xff]  ;;  %v5298_v16 = vld [vmem:[#allocation4 + $0xa8] sm:$0xff]  ;;  %v5297_v47 = vld [vmem:[#allocation4 + $0xa0] sm:$0xff] }
0x1161   :  { %5439 = vmatprep.subr.bf16.mxu0 %v5288_v35  ;;  %v5320_v10 = vld [vmem:[#allocation4 + $0x158] sm:$0xff]  ;;  %v5319_v4 = vld [vmem:[#allocation4 + $0x150] sm:$0xff]  ;;  %v5330_v5 = vld [vmem:[#allocation4 + $0x1a8] sm:$0xff] }
0x1162   :  { %5513 = vmatpush1.bf16.msra.mxu1 %v5289_v55  ;;  %v5308_v3 = vld [vmem:[#allocation4 + $0xf8] sm:$0xff]  ;;  %v5307_v41 = vld [vmem:[#allocation4 + $0xf0] sm:$0xff]  ;;  %v5318_v12 = vld [vmem:[#allocation4 + $0x148] sm:$0xff] }
0x1163   :  { %5514 = vmatprep.subr.bf16.mxu1 %v5300_v24  ;;  %v5329_v17 = vld [vmem:[#allocation4 + $0x1a0] sm:$0xff]  ;;  %v5340_v21 = vld [vmem:[#allocation4 + $0x1f8] sm:$0xff]  ;;  %v5339_v22 = vld [vmem:[#allocation4 + $0x1f0] sm:$0xff] }
0x1164   :  { %5440 = vmatpush1.bf16.msra.mxu0 %v5287_v20  ;;  %v5317_v19 = vld [vmem:[#allocation4 + $0x140] sm:$0xff]  ;;  %v5328_v27 = vld [vmem:[#allocation4 + $0x198] sm:$0xff]  ;;  %v5327_v36 = vld [vmem:[#allocation4 + $0x190] sm:$0xff] }
0x1165   :  { %5441 = vmatprep.subr.bf16.mxu0 %v5298_v16  ;;  %v5350_v45 = vld [vmem:[#allocation4 + $0x248] sm:$0xff]  ;;  %v5349_v2 = vld [vmem:[#allocation4 + $0x240] sm:$0xff]  ;;  %v5360_v30 = vld [vmem:[#allocation4 + $0x298] sm:$0xff] }
0x1166   :  { %5515 = vmatpush1.bf16.msra.mxu1 %v5299_v39  ;;  %v5338_v8 = vld [vmem:[#allocation4 + $0x1e8] sm:$0xff]  ;;  %v5337_v37 = vld [vmem:[#allocation4 + $0x1e0] sm:$0xff]  ;;  %v5348_v11 = vld [vmem:[#allocation4 + $0x238] sm:$0xff] }
0x1167   :  { %5516 = vmatprep.subr.bf16.mxu1 %v5310_v15  ;;  %v5359_v18 = vld [vmem:[#allocation4 + $0x290] sm:$0xff]  ;;  %v5370_v23 = vld [vmem:[#allocation4 + $0x2e8] sm:$0xff]  ;;  %v5369_v42 = vld [vmem:[#allocation4 + $0x2e0] sm:$0xff] }
0x1168   :  { %5442 = vmatpush1.bf16.msra.mxu0 %v5297_v47  ;;  %v5347_v60 = vld [vmem:[#allocation4 + $0x230] sm:$0xff]  ;;  %v5358_v48 = vld [vmem:[#allocation4 + $0x288] sm:$0xff]  ;;  %v5357_v62 = vld [vmem:[#allocation4 + $0x280] sm:$0xff] }
0x1169   :  { %5443 = vmatprep.subr.bf16.mxu0 %v5308_v3  ;;  %v5380_v25 = vld [vmem:[#allocation4 + $0x338] sm:$0xff]  ;;  %v5379_v14 = vld [vmem:[#allocation4 + $0x330] sm:$0xff]  ;;  %v5390_v1 = vld [vmem:[#allocation4 + $0x388] sm:$0xff] }
0x116a   :  { %5517 = vmatpush1.bf16.msra.mxu1 %v5309_v38  ;;  %v5368_v6 = vld [vmem:[#allocation4 + $0x2d8] sm:$0xff]  ;;  %v5367_v52 = vld [vmem:[#allocation4 + $0x2d0] sm:$0xff]  ;;  %v5378_v26 = vld [vmem:[#allocation4 + $0x328] sm:$0xff] }
0x116b   :  { %5518 = vmatprep.subr.bf16.mxu1 %v5320_v10  ;;  %v5389_v43 = vld [vmem:[#allocation4 + $0x380] sm:$0xff]  ;;  %v5400_v61 = vld [vmem:[#allocation4 + $0x3d8] sm:$0xff]  ;;  %v5399_v40 = vld [vmem:[#allocation4 + $0x3d0] sm:$0xff] }
0x116c   :  { %5444 = vmatpush1.bf16.msra.mxu0 %v5307_v41  ;;  %v5377_v7 = vld [vmem:[#allocation4 + $0x320] sm:$0xff]  ;;  %v5388_v13 = vld [vmem:[#allocation4 + $0x378] sm:$0xff]  ;;  %v5387_v50 = vld [vmem:[#allocation4 + $0x370] sm:$0xff] }
0x116d   :  { %5445 = vmatprep.subr.bf16.mxu0 %v5318_v12  ;;  %v5410_v9 = vld [vmem:[#allocation4 + $0x428] sm:$0xff]  ;;  %v5409_v46 = vld [vmem:[#allocation4 + $0x420] sm:$0xff]  ;;  %v5420_v49 = vld [vmem:[#allocation4 + $0x478] sm:$0xff] }
0x116e   :  { %5519 = vmatpush1.bf16.msra.mxu1 %v5319_v4  ;;  %v5398_v44 = vld [vmem:[#allocation4 + $0x3c8] sm:$0xff]  ;;  %v5397_v51 = vld [vmem:[#allocation4 + $0x3c0] sm:$0xff]  ;;  %v5408_v56 = vld [vmem:[#allocation4 + $0x418] sm:$0xff] }
0x116f   :  { %5520 = vmatprep.subr.bf16.mxu1 %v5330_v5  ;;  %v5419_v33 = vld [vmem:[#allocation4 + $0x470] sm:$0xff]  ;;  %v5430_v57 = vld [vmem:[#allocation4 + $0x4c8] sm:$0xff]  ;;  %v5429_v54 = vld [vmem:[#allocation4 + $0x4c0] sm:$0xff] }
0x1170   :  { %5446 = vmatpush1.bf16.msra.mxu0 %v5317_v19  ;;  %v5407_v55 = vld [vmem:[#allocation4 + $0x410] sm:$0xff]  ;;  %v5418_v24 = vld [vmem:[#allocation4 + $0x468] sm:$0xff]  ;;  %v5417_v29 = vld [vmem:[#allocation4 + $0x460] sm:$0xff] }
0x1171   :  { %5447 = vmatprep.subr.bf16.mxu0 %v5328_v27  ;;  %v5428_v35 = vld [vmem:[#allocation4 + $0x4b8] sm:$0xff]  ;;  %v5427_v20 = vld [vmem:[#allocation4 + $0x4b0] sm:$0xff]  ;;  %v5282_v15 = vld [vmem:[#allocation4 + $0x28] sm:$0xff] }
0x1172   :  { %5521 = vmatpush1.bf16.msra.mxu1 %v5329_v17  ;;  %v5284_v39 = vld [vmem:[#allocation4 + $0x38] sm:$0xff]  ;;  %v5283_v16 = vld [vmem:[#allocation4 + $0x30] sm:$0xff]  ;;  %v5294_v38 = vld [vmem:[#allocation4 + $0x88] sm:$0xff] }
0x1173   :  { %5522 = vmatprep.subr.bf16.mxu1 %v5340_v21  ;;  %v5281_v47 = vld [vmem:[#allocation4 + $0x20] sm:$0xff]  ;;  %v5292_v10 = vld [vmem:[#allocation4 + $0x78] sm:$0xff]  ;;  %v5291_v41 = vld [vmem:[#allocation4 + $0x70] sm:$0xff] }
0x1174   :  { %5448 = vmatpush1.bf16.msra.mxu0 %v5327_v36  ;;  %v5293_v3 = vld [vmem:[#allocation4 + $0x80] sm:$0xff]  ;;  %v5304_v4 = vld [vmem:[#allocation4 + $0xd8] sm:$0xff]  ;;  %v5302_v5 = vld [vmem:[#allocation4 + $0xc8] sm:$0xff] }
0x1175   :  { %5449 = vmatprep.subr.bf16.mxu0 %v5338_v8  ;;  %v5303_v12 = vld [vmem:[#allocation4 + $0xd0] sm:$0xff]  ;;  %v5314_v17 = vld [vmem:[#allocation4 + $0x128] sm:$0xff]  ;;  %v5301_v19 = vld [vmem:[#allocation4 + $0xc0] sm:$0xff] }
0x1176   :  { %5523 = vmatpush1.bf16.msra.mxu1 %v5339_v22  ;;  %v5312_v21 = vld [vmem:[#allocation4 + $0x118] sm:$0xff]  ;;  %v5313_v27 = vld [vmem:[#allocation4 + $0x120] sm:$0xff]  ;;  %v5311_v36 = vld [vmem:[#allocation4 + $0x110] sm:$0xff] }
0x1177   :  { %5524 = vmatprep.subr.bf16.mxu1 %v5350_v45  ;;  %v5324_v22 = vld [vmem:[#allocation4 + $0x178] sm:$0xff]  ;;  %v5322_v45 = vld [vmem:[#allocation4 + $0x168] sm:$0xff]  ;;  %v5323_v8 = vld [vmem:[#allocation4 + $0x170] sm:$0xff] }
0x1178   :  { %5450 = vmatpush1.bf16.msra.mxu0 %v5337_v37  ;;  %v5321_v37 = vld [vmem:[#allocation4 + $0x160] sm:$0xff] }
0x1179   :  { %5451 = vmatprep.subr.bf16.mxu0 %v5348_v11  ;;  %v5333_v11 = vld [vmem:[#allocation4 + $0x1c0] sm:$0xff] }
0x117a   :  { %5525 = vmatpush1.bf16.msra.mxu1 %v5349_v2  ;;  %v5334_v2 = vld [vmem:[#allocation4 + $0x1c8] sm:$0xff] }
0x117b   :  { %5526 = vmatprep.subr.bf16.mxu1 %v5360_v30  ;;  %v5332_v30 = vld [vmem:[#allocation4 + $0x1b8] sm:$0xff] }
0x117c   :  { %5452 = vmatpush1.bf16.msra.mxu0 %v5347_v60  ;;  %v5331_v60 = vld [vmem:[#allocation4 + $0x1b0] sm:$0xff] }
0x117d   :  { %5453 = vmatprep.subr.bf16.mxu0 %v5358_v48  ;;  %v5343_v48 = vld [vmem:[#allocation4 + $0x210] sm:$0xff] }
0x117e   :  { %5527 = vmatpush1.bf16.msra.mxu1 %v5359_v18  ;;  %v5344_v18 = vld [vmem:[#allocation4 + $0x218] sm:$0xff] }
0x117f   :  { %5528 = vmatprep.subr.bf16.mxu1 %v5370_v23  ;;  %v5342_v23 = vld [vmem:[#allocation4 + $0x208] sm:$0xff] }
0x1180   :  { %5454 = vmatpush1.bf16.msra.mxu0 %v5357_v62  ;;  %v5341_v62 = vld [vmem:[#allocation4 + $0x200] sm:$0xff] }
0x1181   :  { %5455 = vmatprep.subr.bf16.mxu0 %v5368_v6  ;;  %v5353_v6 = vld [vmem:[#allocation4 + $0x260] sm:$0xff] }
0x1182   :  { %5529 = vmatpush1.bf16.msra.mxu1 %v5369_v42  ;;  %v5354_v42 = vld [vmem:[#allocation4 + $0x268] sm:$0xff] }
0x1183   :  { %5530 = vmatprep.subr.bf16.mxu1 %v5380_v25  ;;  %v5352_v25 = vld [vmem:[#allocation4 + $0x258] sm:$0xff] }
0x1184   :  { %5456 = vmatpush1.bf16.msra.mxu0 %v5367_v52  ;;  %v5351_v52 = vld [vmem:[#allocation4 + $0x250] sm:$0xff] }
0x1185   :  { %5457 = vmatprep.subr.bf16.mxu0 %v5378_v26  ;;  %v5363_v26 = vld [vmem:[#allocation4 + $0x2b0] sm:$0xff] }
0x1186   :  { %5531 = vmatpush1.bf16.msra.mxu1 %v5379_v14  ;;  %v5364_v14 = vld [vmem:[#allocation4 + $0x2b8] sm:$0xff] }
0x1187   :  { %5532 = vmatprep.subr.bf16.mxu1 %v5390_v1  ;;  %v5362_v1 = vld [vmem:[#allocation4 + $0x2a8] sm:$0xff] }
0x1188   :  { %5458 = vmatpush1.bf16.msra.mxu0 %v5377_v7  ;;  %v5361_v7 = vld [vmem:[#allocation4 + $0x2a0] sm:$0xff] }
0x1189   :  { %5459 = vmatprep.subr.bf16.mxu0 %v5388_v13  ;;  %v5373_v13 = vld [vmem:[#allocation4 + $0x300] sm:$0xff] }
0x118a   :  { %5533 = vmatpush1.bf16.msra.mxu1 %v5389_v43  ;;  %v5374_v43 = vld [vmem:[#allocation4 + $0x308] sm:$0xff] }
0x118b   :  { %5534 = vmatprep.subr.bf16.mxu1 %v5400_v61  ;;  %v5372_v61 = vld [vmem:[#allocation4 + $0x2f8] sm:$0xff] }
0x118c   :  { %5460 = vmatpush1.bf16.msra.mxu0 %v5387_v50  ;;  %v5371_v50 = vld [vmem:[#allocation4 + $0x2f0] sm:$0xff] }
0x118d   :  { %5461 = vmatprep.subr.bf16.mxu0 %v5398_v44  ;;  %v5383_v44 = vld [vmem:[#allocation4 + $0x350] sm:$0xff] }
0x118e   :  { %5535 = vmatpush1.bf16.msra.mxu1 %v5399_v40  ;;  %v5384_v40 = vld [vmem:[#allocation4 + $0x358] sm:$0xff] }
0x118f   :  { %5536 = vmatprep.subr.bf16.mxu1 %v5410_v9  ;;  %v5382_v9 = vld [vmem:[#allocation4 + $0x348] sm:$0xff] }
0x1190   :  { %5462 = vmatpush1.bf16.msra.mxu0 %v5397_v51  ;;  %v5392_v51 = vld [vmem:[#allocation4 + $0x398] sm:$0xff] }
0x1191   :  { %5463 = vmatprep.subr.bf16.mxu0 %v5408_v56  ;;  %v5393_v56 = vld [vmem:[#allocation4 + $0x3a0] sm:$0xff] }
0x1192   :  { %5537 = vmatpush1.bf16.msra.mxu1 %v5409_v46  ;;  %v5394_v46 = vld [vmem:[#allocation4 + $0x3a8] sm:$0xff] }
0x1193   :  { %5538 = vmatprep.subr.bf16.mxu1 %v5420_v49  ;;  %v5381_v49 = vld [vmem:[#allocation4 + $0x340] sm:$0xff] }
0x1194   :  { %5464 = vmatpush1.bf16.msra.mxu0 %v5407_v55  ;;  %v5402_v55 = vld [vmem:[#allocation4 + $0x3e8] sm:$0xff] }
0x1195   :  { %5465 = vmatprep.subr.bf16.mxu0 %v5418_v24  ;;  %v5403_v24 = vld [vmem:[#allocation4 + $0x3f0] sm:$0xff] }
0x1196   :  { %5539 = vmatpush1.bf16.msra.mxu1 %v5419_v33  ;;  %v5404_v33 = vld [vmem:[#allocation4 + $0x3f8] sm:$0xff] }
0x1197   :  { %5540 = vmatprep.subr.bf16.mxu1 %v5430_v57  ;;  %v5391_v57 = vld [vmem:[#allocation4 + $0x390] sm:$0xff] }
0x1198   :  { %5466 = vmatpush1.bf16.msra.mxu0 %v5417_v29  ;;  %v5401_v29 = vld [vmem:[#allocation4 + $0x3e0] sm:$0xff] }
0x1199   :  { %5467 = vmatprep.subr.bf16.mxu0 %v5428_v35  ;;  %v5412_v35 = vld [vmem:[#allocation4 + $0x438] sm:$0xff] }
0x119a   :  { %5541 = vmatpush1.bf16.msra.mxu1 %v5429_v54  ;;  %v5414_v54 = vld [vmem:[#allocation4 + $0x448] sm:$0xff] }
0x119b   :  { %5656 = vmatprep.subr.bf16.mxu1 %v5284_v39  ;;  %v5413_v39 = vld [vmem:[#allocation4 + $0x440] sm:$0xff] }
0x119c   :  { %5468 = vmatpush1.bf16.msra.mxu0 %v5427_v20  ;;  %v5424_v20 = vld [vmem:[#allocation4 + $0x498] sm:$0xff] }
0x119d   :  { %5543 = vmatmul.mubr.bf16.vlgmr.msra.gmra.mrb[68].mxu1 %v10189_v28  ;;  %5583 = vmatprep.subr.bf16.mxu0 %v5282_v15  ;;  %v5411_v15 = vld [vmem:[#allocation4 + $0x430] sm:$0xff] }
0x119e   :  { %5552 = vmatprep.mubr.bf16.mxu1 %v10213_v58  ;;  %5657 = vmatpush1.bf16.msra.mxu1 %v5283_v16  ;;  %v5422_v16 = vld [vmem:[#allocation4 + $0x488] sm:$0xff] }
0x119f   :  { %5658 = vmatprep.subr.bf16.mxu1 %v5294_v38  ;;  %5470 = vmatmul.mubr.bf16.vlgmr.msra.gmra.mrb[100].mxu0 %v10189_v28  ;;  %v5423_v38 = vld [vmem:[#allocation4 + $0x490] sm:$0xff] }
0x11a0   :  { %5584 = vmatpush1.bf16.msra.mxu0 %v5281_v47  ;;  %5479 = vmatprep.mubr.bf16.mxu0 %v10213_v58  ;;  %v5434_v47 = vld [vmem:[#allocation4 + $0x4e8] sm:$0xff] }
0x11a1   :  { %5585 = vmatprep.subr.bf16.mxu0 %v5292_v10  ;;  %v5421_v10 = vld [vmem:[#allocation4 + $0x480] sm:$0xff] }
0x11a2   :  { %5659 = vmatpush1.bf16.msra.mxu1 %v5293_v3  ;;  %v5432_v3 = vld [vmem:[#allocation4 + $0x4d8] sm:$0xff] }
0x11a3   :  { %5660 = vmatprep.subr.bf16.mxu1 %v5304_v4  ;;  %v5433_v4 = vld [vmem:[#allocation4 + $0x4e0] sm:$0xff] }
0x11a4   :  { %5586 = vmatpush1.bf16.msra.mxu0 %v5291_v41  ;;  %v5431_v41 = vld [vmem:[#allocation4 + $0x4d0] sm:$0xff] }
0x11a5   :  { %5553 = vmatmul.mubr.bf16.gmra.mrb[72].mxu1 %v10191_v32  ;;  %5587 = vmatprep.subr.bf16.mxu0 %v5302_v5  ;;  %v5286_v5 = vld [vmem:[#allocation4 + $0x48] sm:$0xff] }
0x11a6   :  { %5562 = vmatprep.mubr.bf16.mxu1 %v10215_v59  ;;  %5661 = vmatpush1.bf16.msra.mxu1 %v5303_v12  ;;  %v5285_v12 = vld [vmem:[#allocation4 + $0x40] sm:$0xff] }
0x11a7   :  { %5662 = vmatprep.subr.bf16.mxu1 %v5314_v17  ;;  %5480 = vmatmul.mubr.bf16.gmra.mrb[104].mxu0 %v10191_v32  ;;  %v5296_v17 = vld [vmem:[#allocation4 + $0x98] sm:$0xff] }
0x11a8   :  { %5588 = vmatpush1.bf16.msra.mxu0 %v5301_v19  ;;  %5489 = vmatprep.mubr.bf16.mxu0 %v10215_v59  ;;  %v5295_v19 = vld [vmem:[#allocation4 + $0x90] sm:$0xff] }
0x11a9   :  { %5589 = vmatprep.subr.bf16.mxu0 %v5312_v21  ;;  %v5306_v21 = vld [vmem:[#allocation4 + $0xe8] sm:$0xff] }
0x11aa   :  { %5663 = vmatpush1.bf16.msra.mxu1 %v5313_v27  ;;  %v5305_v27 = vld [vmem:[#allocation4 + $0xe0] sm:$0xff] }
0x11ab   :  { %5664 = vmatprep.subr.bf16.mxu1 %v5324_v22  ;;  %v5316_v22 = vld [vmem:[#allocation4 + $0x138] sm:$0xff] }
0x11ac   :  { %5590 = vmatpush1.bf16.msra.mxu0 %v5311_v36  ;;  %v5315_v36 = vld [vmem:[#allocation4 + $0x130] sm:$0xff] }
0x11ad   :  { %5563 = vmatmul.mubr.bf16.gmra.mrb[76].mxu1 %v10193_v31  ;;  %5591 = vmatprep.subr.bf16.mxu0 %v5322_v45  ;;  %v5326_v45 = vld [vmem:[#allocation4 + $0x188] sm:$0xff] }
0x11ae   :  { %5572 = vmatprep.mubr.bf16.mxu1 %v10217_v63  ;;  %5665 = vmatpush1.bf16.msra.mxu1 %v5323_v8  ;;  %v5325_v8 = vld [vmem:[#allocation4 + $0x180] sm:$0xff] }
0x11af   :  { %5666 = vmatprep.subr.bf16.mxu1 %v5334_v2  ;;  %5490 = vmatmul.mubr.bf16.gmra.mrb[108].mxu0 %v10193_v31  ;;  %v5336_v2 = vld [vmem:[#allocation4 + $0x1d8] sm:$0xff] }
0x11b0   :  { %5592 = vmatpush1.bf16.msra.mxu0 %v5321_v37  ;;  %5499 = vmatprep.mubr.bf16.mxu0 %v10217_v63  ;;  %v5335_v37 = vld [vmem:[#allocation4 + $0x1d0] sm:$0xff] }
0x11b1   :  { %5593 = vmatprep.subr.bf16.mxu0 %v5332_v30  ;;  %v5346_v30 = vld [vmem:[#allocation4 + $0x228] sm:$0xff] }
0x11b2   :  { %5667 = vmatpush1.bf16.msra.mxu1 %v5333_v11  ;;  %v5345_v11 = vld [vmem:[#allocation4 + $0x220] sm:$0xff] }
0x11b3   :  { %5668 = vmatprep.subr.bf16.mxu1 %v5344_v18  ;;  %v5356_v18 = vld [vmem:[#allocation4 + $0x278] sm:$0xff] }
0x11b4   :  { %5594 = vmatpush1.bf16.msra.mxu0 %v5331_v60  ;;  %v5355_v60 = vld [vmem:[#allocation4 + $0x270] sm:$0xff] }
0x11b5   :  { %5573 = vmatmul.mubr.bf16.gmra.mrb[80].mxu1 %v10195_v34  ;;  %5595 = vmatprep.subr.bf16.mxu0 %v5342_v23  ;;  %v5366_v23 = vld [vmem:[#allocation4 + $0x2c8] sm:$0xff] }
0x11b6   :  { %5688 = vmatprep.mubr.bf16.mxu1 %v10211_v53  ;;  %5669 = vmatpush1.bf16.msra.mxu1 %v5343_v48  ;;  %v5365_v48 = vld [vmem:[#allocation4 + $0x2c0] sm:$0xff] }
0x11b7   :  { %5670 = vmatprep.subr.bf16.mxu1 %v5354_v42  ;;  %5500 = vmatmul.mubr.bf16.gmra.mrb[112].mxu0 %v10195_v34  ;;  %v5376_v42 = vld [vmem:[#allocation4 + $0x318] sm:$0xff] }
0x11b8   :  { %5596 = vmatpush1.bf16.msra.mxu0 %v5341_v62  ;;  %5615 = vmatprep.mubr.bf16.mxu0 %v10211_v53  ;;  %v5375_v62 = vld [vmem:[#allocation4 + $0x310] sm:$0xff] }
0x11b9   :  { %5597 = vmatprep.subr.bf16.mxu0 %v5352_v25  ;;  %v5386_v25 = vld [vmem:[#allocation4 + $0x368] sm:$0xff] }
0x11ba   :  { %5671 = vmatpush1.bf16.msra.mxu1 %v5353_v6  ;;  %v5385_v6 = vld [vmem:[#allocation4 + $0x360] sm:$0xff] }
0x11bb   :  { %5672 = vmatprep.subr.bf16.mxu1 %v5364_v14  ;;  %v5396_v14 = vld [vmem:[#allocation4 + $0x3b8] sm:$0xff] }
0x11bc   :  { %5598 = vmatpush1.bf16.msra.mxu0 %v5351_v52  ;;  %v5395_v52 = vld [vmem:[#allocation4 + $0x3b0] sm:$0xff] }
0x11bd   :  { %5599 = vmatprep.subr.bf16.mxu0 %v5362_v1  ;;  %v5406_v1 = vld [vmem:[#allocation4 + $0x408] sm:$0xff] }
0x11be   :  { %5673 = vmatpush1.bf16.msra.mxu1 %v5363_v26  ;;  %v5416_v26 = vld [vmem:[#allocation4 + $0x458] sm:$0xff] }
0x11bf   :  { %5674 = vmatprep.subr.bf16.mxu1 %v5374_v43  ;;  %v5415_v43 = vld [vmem:[#allocation4 + $0x450] sm:$0xff] }
0x11c0   :  { %5600 = vmatpush1.bf16.msra.mxu0 %v5361_v7  ;;  %v5426_v7 = vld [vmem:[#allocation4 + $0x4a8] sm:$0xff] }
0x11c1   :  { %5601 = vmatprep.subr.bf16.mxu0 %v5372_v61  ;;  %v5425_v61 = vld [vmem:[#allocation4 + $0x4a0] sm:$0xff] }
0x11c2   :  { %5675 = vmatpush1.bf16.msra.mxu1 %v5373_v13  ;;  %v5436_v13 = vld [vmem:[#allocation4 + $0x4f8] sm:$0xff] }
0x11c3   :  { %5676 = vmatprep.subr.bf16.mxu1 %v5384_v40  ;;  %v5435_v40 = vld [vmem:[#allocation4 + $0x4f0] sm:$0xff] }
0x11c4   :  { %5602 = vmatpush1.bf16.msra.mxu0 %v5371_v50 }
0x11c5   :  { %5603 = vmatprep.subr.bf16.mxu0 %v5382_v9 }
0x11c6   :  { %5677 = vmatpush1.bf16.msra.mxu1 %v5383_v44 }
0x11c7   :  { %5678 = vmatprep.subr.bf16.mxu1 %v5394_v46 }
0x11c8   :  { %5604 = vmatpush1.bf16.msra.mxu0 %v5381_v49 }
0x11c9   :  { %5605 = vmatprep.subr.bf16.mxu0 %v5392_v51 }
0x11ca   :  { %5679 = vmatpush1.bf16.msra.mxu1 %v5393_v56 }
0x11cb   :  { %5680 = vmatprep.subr.bf16.mxu1 %v5404_v33 }
0x11cc   :  { %5606 = vmatpush1.bf16.msra.mxu0 %v5391_v57 }
0x11cd   :  { %5607 = vmatprep.subr.bf16.mxu0 %v5402_v55 }
0x11ce   :  { %5681 = vmatpush1.bf16.msra.mxu1 %v5403_v24 }
0x11cf   :  { %5682 = vmatprep.subr.bf16.mxu1 %v5414_v54 }
0x11d0   :  { %5608 = vmatpush1.bf16.msra.mxu0 %v5401_v29 }
0x11d1   :  { %5609 = vmatprep.subr.bf16.mxu0 %v5412_v35 }
0x11d2   :  { %5683 = vmatpush1.bf16.msra.mxu1 %v5413_v39 }
0x11d3   :  { %5684 = vmatprep.subr.bf16.mxu1 %v5424_v20 }
0x11d4   :  { %5610 = vmatpush1.bf16.msra.mxu0 %v5411_v15 }
0x11d5   :  { %5611 = vmatprep.subr.bf16.mxu0 %v5422_v16 }
0x11d6   :  { %5685 = vmatpush1.bf16.msra.mxu1 %v5423_v38 }
0x11d7   :  { %5686 = vmatprep.subr.bf16.mxu1 %v5434_v47 }
0x11d8   :  { %5612 = vmatpush1.bf16.msra.mxu0 %v5421_v10 }
0x11d9   :  { %5613 = vmatprep.subr.bf16.mxu0 %v5432_v3 }
0x11da   :  { %5687 = vmatpush1.bf16.msra.mxu1 %v5433_v4 }
0x11dc   :  { %5614 = vmatpush1.bf16.msra.mxu0 %v5431_v41 }
0x11dd   :  { %5689 = vmatmul.mubr.bf16.vlgmr.msra.gmra.mrb[84].mxu1 %v10189_v28  ;;  %5729 = vmatprep.subr.bf16.mxu0 %v5286_v5 }
0x11de   :  { %5698 = vmatprep.mubr.bf16.mxu1 %v10213_v58 }
0x11df   :  { %5616 = vmatmul.mubr.bf16.vlgmr.msra.gmra.mrb[116].mxu0 %v10189_v28 }
0x11e0   :  { %5625 = vmatprep.mubr.bf16.mxu0 %v10213_v58  ;;  %5730 = vmatpush1.bf16.msra.mxu0 %v5285_v12 }
0x11e1   :  { %5731 = vmatprep.subr.bf16.mxu0 %v5296_v17 }
0x11e4   :  { %5732 = vmatpush1.bf16.msra.mxu0 %v5295_v19 }
0x11e5   :  { %5699 = vmatmul.mubr.bf16.gmra.mrb[88].mxu1 %v10191_v32  ;;  %5733 = vmatprep.subr.bf16.mxu0 %v5306_v21 }
0x11e6   :  { %5708 = vmatprep.mubr.bf16.mxu1 %v10215_v59 }
0x11e7   :  { %5626 = vmatmul.mubr.bf16.gmra.mrb[120].mxu0 %v10191_v32 }
0x11e8   :  { %5635 = vmatprep.mubr.bf16.mxu0 %v10215_v59  ;;  %5734 = vmatpush1.bf16.msra.mxu0 %v5305_v27 }
0x11e9   :  { %5735 = vmatprep.subr.bf16.mxu0 %v5316_v22 }
0x11ec   :  { %5736 = vmatpush1.bf16.msra.mxu0 %v5315_v36 }
0x11ed   :  { %5709 = vmatmul.mubr.bf16.gmra.mrb[92].mxu1 %v10193_v31  ;;  %5737 = vmatprep.subr.bf16.mxu0 %v5326_v45 }
0x11ee   :  { %5718 = vmatprep.mubr.bf16.mxu1 %v10217_v63 }
0x11ef   :  { %5636 = vmatmul.mubr.bf16.gmra.mrb[124].mxu0 %v10193_v31 }
0x11f0   :  { %5645 = vmatprep.mubr.bf16.mxu0 %v10217_v63  ;;  %5738 = vmatpush1.bf16.msra.mxu0 %v5325_v8 }
0x11f1   :  { %5739 = vmatprep.subr.bf16.mxu0 %v5336_v2 }
0x11f4   :  { %5740 = vmatpush1.bf16.msra.mxu0 %v5335_v37 }
0x11f5   :  { %5719 = vmatmul.mubr.bf16.gmra.mrb[96].mxu1 %v10195_v34  ;;  %5741 = vmatprep.subr.bf16.mxu0 %v5346_v30 }
0x11f6   :  { %5971 = vmatprep.mubr.bf16.mxu1 %v8451_v0 }
0x11f7   :  { %5646 = vmatmul.mubr.bf16.gmra.mrb[128].mxu0 %v10195_v34 }
0x11f8   :  { %5742 = vmatpush1.bf16.msra.mxu0 %v5345_v11  ;;  %5761 = vmatprep.mubr.bf16.mxu0 %v10211_v53  ;;  %v5405_v53 = vld [vmem:[#allocation4 + $0x400] sm:$0xff]  ;;  %v8340_v11 = vld [vmem:[%s10657_s21 + $0x40] sm:$0xff]  }
0x11f9   :  { %5743 = vmatprep.subr.bf16.mxu0 %v5356_v18 }
0x11fc   :  { %5744 = vmatpush1.bf16.msra.mxu0 %v5355_v60 }
0x11fd   :  { %5745 = vmatprep.subr.bf16.mxu0 %v5366_v23 }
0x1200   :  { %5746 = vmatpush1.bf16.msra.mxu0 %v5365_v48 }
0x1201   :  { %5747 = vmatprep.subr.bf16.mxu0 %v5376_v42  ;;  %v8341_v42 = vld [vmem:[%s10657_s21 + $0x48] sm:$0xff]  }
0x1204   :  { %5748 = vmatpush1.bf16.msra.mxu0 %v5375_v62  ;;  %v8342_v62 = vld [vmem:[%s10657_s21 + $0x50] sm:$0xff]  }
0x1205   :  { %5749 = vmatprep.subr.bf16.mxu0 %v5386_v25  ;;  %v8343_v25 = vld [vmem:[%s10657_s21 + $0x58] sm:$0xff]  }
0x1208   :  { %5750 = vmatpush1.bf16.msra.mxu0 %v5385_v6  ;;  %v8344_v6 = vld [vmem:[%s10657_s21 + $0x60] sm:$0xff]  }
0x1209   :  { %5751 = vmatprep.subr.bf16.mxu0 %v5396_v14 }
0x120c   :  { %5752 = vmatpush1.bf16.msra.mxu0 %v5395_v52 }
0x120d   :  { %5753 = vmatprep.subr.bf16.mxu0 %v5406_v1 }
0x1210   :  { %5754 = vmatpush1.bf16.msra.mxu0 %v5405_v53 }
0x1211   :  { %5755 = vmatprep.subr.bf16.mxu0 %v5416_v26 }
0x1214   :  { %5756 = vmatpush1.bf16.msra.mxu0 %v5415_v43 }
0x1215   :  { %5757 = vmatprep.subr.bf16.mxu0 %v5426_v7 }
0x1218   :  { %5758 = vmatpush1.bf16.msra.mxu0 %v5425_v61 }
0x1219   :  { %5759 = vmatprep.subr.bf16.mxu0 %v5436_v13  ;;  %v8345_v13 = vld [vmem:[%s10657_s21 + $0x68] sm:$0xff]  }
0x121c   :  { %5760 = vmatpush1.bf16.msra.mxu0 %v5435_v40 }
0x121f   :  { %5762 = vmatmul.mubr.bf16.vlgmr.msra.gmra.mrb[132].mxu0 %v10189_v28 }
0x1220   :  { %5771 = vmatprep.mubr.bf16.mxu0 %v10213_v58 }
0x1227   :  { %5772 = vmatmul.mubr.bf16.gmra.mrb[136].mxu0 %v10191_v32 }
0x1228   :  { %5781 = vmatprep.mubr.bf16.mxu0 %v10215_v59 }
0x122f   :  { %5782 = vmatmul.mubr.bf16.gmra.mrb[140].mxu0 %v10193_v31 }
0x1230   :  { %5791 = vmatprep.mubr.bf16.mxu0 %v10217_v63 }
0x1237   :  { %5792 = vmatmul.mubr.bf16.gmra.mrb[144].mxu0 %v10195_v34 }
0x1270   :  { %v5544_v50 = vpop.f32.mrb[68].mxu1 }
0x1271   :  { %v5546_v9 = vpop.f32.mrb[69].mxu1 }
0x1272   :  { %v5548_v44 = vpop.f32.mrb[70].mxu1  ;;  %v5471_v56 = vpop.f32.mrb[100].mxu0 }
0x1273   :  { %v5804_v46 = vpack.c.bf16 %v5548_v44, %v5544_v50  ;;  %v5550_v49 = vpop.f32.mrb[71].mxu1  ;;  %v5473_v28 = vpop.f32.mrb[101].mxu0 }
0x1274   :  { %v5805_v51 = vpack.c.bf16 %v5550_v49, %v5546_v9  ;;  %v5475_v58 = vpop.f32.mrb[102].mxu0 }
0x1275   :  { %v5802_v32 = vpack.c.bf16 %v5475_v58, %v5471_v56  ;;  %v5477_v33 = vpop.f32.mrb[103].mxu0 }
0x1276   :  { %5939 = vmatprep.subr.bf16.mxu1 %v5805_v51  ;;  %v5803_v57 = vpack.c.bf16 %v5477_v33, %v5473_v28 }
0x1277   :  { %5940 = vmatpush1.bf16.msra.mxu1 %v5804_v46 }
0x1278   :  { %v5554_v59 = vpop.f32.mrb[72].mxu1 }
0x1279   :  { %v5556_v31 = vpop.f32.mrb[73].mxu1 }
0x127a   :  { %v5558_v55 = vpop.f32.mrb[74].mxu1  ;;  %v5481_v54 = vpop.f32.mrb[104].mxu0 }
0x127b   :  { %v5814_v63 = vpack.c.bf16 %v5558_v55, %v5554_v59  ;;  %v5560_v24 = vpop.f32.mrb[75].mxu1  ;;  %v5483_v29 = vpop.f32.mrb[105].mxu0  ;;  %v8346_v59 = vld [vmem:[%s10657_s21 + $0x70] sm:$0xff]  }
0x127c   :  { %v5815_v34 = vpack.c.bf16 %v5560_v24, %v5556_v31  ;;  %v5485_v35 = vpop.f32.mrb[106].mxu0 }
0x127d   :  { %v5812_v39 = vpack.c.bf16 %v5485_v35, %v5481_v54  ;;  %v5487_v20 = vpop.f32.mrb[107].mxu0 }
0x127e   :  { %5941 = vmatprep.subr.bf16.mxu1 %v5815_v34  ;;  %v5813_v16 = vpack.c.bf16 %v5487_v20, %v5483_v29 }
0x127f   :  { %5942 = vmatpush1.bf16.msra.mxu1 %v5814_v63 }
0x1280   :  { %v5564_v15 = vpop.f32.mrb[76].mxu1 }
0x1281   :  { %v5566_v38 = vpop.f32.mrb[77].mxu1 }
0x1282   :  { %v5568_v47 = vpop.f32.mrb[78].mxu1  ;;  %v5491_v41 = vpop.f32.mrb[108].mxu0 }
0x1283   :  { %v5824_v10 = vpack.c.bf16 %v5568_v47, %v5564_v15  ;;  %v5570_v3 = vpop.f32.mrb[79].mxu1  ;;  %v5493_v5 = vpop.f32.mrb[109].mxu0 }
0x1284   :  { %v5825_v4 = vpack.c.bf16 %v5570_v3, %v5566_v38  ;;  %v5495_v12 = vpop.f32.mrb[110].mxu0 }
0x1285   :  { %v5822_v17 = vpack.c.bf16 %v5495_v12, %v5491_v41  ;;  %v5497_v19 = vpop.f32.mrb[111].mxu0 }
0x1286   :  { %5943 = vmatprep.subr.bf16.mxu1 %v5825_v4  ;;  %v5823_v27 = vpack.c.bf16 %v5497_v19, %v5493_v5 }
0x1287   :  { %5944 = vmatpush1.bf16.msra.mxu1 %v5824_v10 }
0x1288   :  { %v5574_v21 = vpop.f32.mrb[80].mxu1 }
0x1289   :  { %v5576_v22 = vpop.f32.mrb[81].mxu1 }
0x128a   :  { %v5578_v36 = vpop.f32.mrb[82].mxu1  ;;  %v5501_v37 = vpop.f32.mrb[112].mxu0 }
0x128b   :  { %v5834_v45 = vpack.c.bf16 %v5578_v36, %v5574_v21  ;;  %v5580_v8 = vpop.f32.mrb[83].mxu1  ;;  %v5503_v30 = vpop.f32.mrb[113].mxu0 }
0x128c   :  { %v5835_v2 = vpack.c.bf16 %v5580_v8, %v5576_v22  ;;  %v5505_v18 = vpop.f32.mrb[114].mxu0  ;;  %v8348_v22 = vld [vmem:[%s10657_s21] sm:$0xff]  }
0x128d   :  { %v5832_v60 = vpack.c.bf16 %v5505_v18, %v5501_v37  ;;  %v5507_v23 = vpop.f32.mrb[115].mxu0  ;;  %v8349_v37 = vld [vmem:[%s10657_s21 + $0x8] sm:$0xff]   ;;  %v8352_v18 = vld [vmem:[%s10657_s21 + $0x20] sm:$0xff]  }
0x128e   :  { %5945 = vmatprep.subr.bf16.mxu1 %v5835_v2  ;;  %v5833_v48 = vpack.c.bf16 %v5507_v23, %v5503_v30  ;;  %v8350_v30 = vld [vmem:[%s10657_s21 + $0x10] sm:$0xff]  }
0x128f   :  { %5946 = vmatpush1.bf16.msra.mxu1 %v5834_v45 }
0x1290   :  { %6116 = vmatprep.subr.bf16.mxu1 %v5803_v57 }
0x1292   :  { %7349 = vmatmul.mubr.msk.bf16.vlgmr.msra.gmra.mrb[100].mxu1 %vm886_vm3, %v8340_v11  ;;  %v8351_v11 = vld [vmem:[%s10657_s21 + $0x18] sm:$0xff]  }
0x1293   :  { %6117 = vmatpush1.bf16.msra.mxu1 %v5802_v32  ;;  %5981 = vmatprep.mubr.bf16.mxu1 %v8451_v0 }
0x1294   :  { %6118 = vmatprep.subr.bf16.mxu1 %v5813_v16  ;;  %v8347_v16 = vld [vmem:[%s10657_s21 + $0x78] sm:$0xff]  }
0x1297   :  { %6119 = vmatpush1.bf16.msra.mxu1 %v5812_v39 }
0x1298   :  { %6120 = vmatprep.subr.bf16.mxu1 %v5823_v27 }
0x129a   :  { %7350 = vmatmul.mubr.msk.bf16.gmra.mrb[104].mxu1 %vm886_vm3, %v8341_v42 }
0x129b   :  { %5991 = vmatprep.mubr.bf16.mxu1 %v8451_v0  ;;  %6121 = vmatpush1.bf16.msra.mxu1 %v5822_v17 }
0x129c   :  { %6122 = vmatprep.subr.bf16.mxu1 %v5833_v48  ;;  %v8353_v48 = vld [vmem:[%s10657_s21 + $0x28] sm:$0xff]  }
0x129f   :  { %6123 = vmatpush1.bf16.msra.mxu1 %v5832_v60 }
0x12a2   :  { %7351 = vmatmul.mubr.msk.bf16.gmra.mrb[108].mxu1 %vm886_vm3, %v8342_v62 }
0x12a3   :  { %6001 = vmatprep.mubr.bf16.mxu1 %v8451_v0 }
0x12aa   :  { %7352 = vmatmul.mubr.msk.bf16.gmra.mrb[112].mxu1 %vm886_vm3, %v8343_v25 }
0x12ab   :  { %6011 = vmatprep.mubr.bf16.mxu1 %v8451_v0 }
0x12b0   :  { %v10283_v14 = vpop.f32.mrb[84].mxu1 }
0x12b1   :  { %v10286_v52 = vpop.f32.mrb[85].mxu1 }
0x12b2   :  { %7353 = vmatmul.mubr.msk.bf16.gmra.mrb[116].mxu1 %vm886_vm3, %v8344_v6  ;;  %v10289_v1 = vpop.f32.mrb[86].mxu1  ;;  %v5617_v53 = vpop.f32.mrb[116].mxu0 }
0x12b3   :  { %6021 = vmatprep.mubr.bf16.mxu1 %v8451_v0  ;;  %v5808_v26 = vpack.c.bf16 %v10289_v1, %v10283_v14  ;;  %v10293_v43 = vpop.f32.mrb[87].mxu1  ;;  %v5619_v7 = vpop.f32.mrb[117].mxu0  ;;  %v8358_v14 = vld [vmem:[%s10657_s21 + $0x90] sm:$0xff]   ;;  %v8359_v1 = vld [vmem:[%s10657_s21 + $0x98] sm:$0xff]  }
0x12b4   :  { %v5809_v61 = vpack.c.bf16 %v10293_v43, %v10286_v52  ;;  %v5621_v40 = vpop.f32.mrb[118].mxu0  ;;  %v8354_v43 = vld [vmem:[%s10657_s21 + $0x30] sm:$0xff]  }
0x12b5   :  { %v5806_v50 = vpack.c.bf16 %v5621_v40, %v5617_v53  ;;  %v5623_v9 = vpop.f32.mrb[119].mxu0 }
0x12b6   :  { %v5807_v44 = vpack.c.bf16 %v5623_v9, %v5619_v7 }
0x12b8   :  { %v10300_v46 = vpop.f32.mrb[88].mxu1  ;;  %6310 = vmatprep.subr.bf16.mxu1 %v5807_v44  ;;  %v8355_v44 = vld [vmem:[%s10657_s21 + $0x38] sm:$0xff]  }
0x12b9   :  { %v10303_v49 = vpop.f32.mrb[89].mxu1 }
0x12ba   :  { %7354 = vmatmul.mubr.msk.bf16.gmra.mrb[120].mxu1 %vm886_vm3, %v8345_v13  ;;  %v10306_v51 = vpop.f32.mrb[90].mxu1  ;;  %v5627_v56 = vpop.f32.mrb[120].mxu0 }
0x12bb   :  { %6031 = vmatprep.mubr.bf16.mxu1 %v8451_v0  ;;  %v5818_v28 = vpack.c.bf16 %v10306_v51, %v10300_v46  ;;  %v10310_v58 = vpop.f32.mrb[91].mxu1  ;;  %v5629_v32 = vpop.f32.mrb[121].mxu0  ;;  %v8361_v46 = vld [vmem:[%s10657_s21 + $0xa8] sm:$0xff]   ;;  %v8363_v51 = vld [vmem:[%s10657_s21 + $0xb8] sm:$0xff]  }
0x12bc   :  { %v5819_v33 = vpack.c.bf16 %v10310_v58, %v10303_v49  ;;  %v5631_v57 = vpop.f32.mrb[122].mxu0  ;;  %v8362_v49 = vld [vmem:[%s10657_s21 + $0xb0] sm:$0xff]   ;;  %v8365_v58 = vld [vmem:[%s10657_s21 + $0xc8] sm:$0xff]  }
0x12bd   :  { %v5816_v31 = vpack.c.bf16 %v5631_v57, %v5627_v56  ;;  %v5633_v55 = vpop.f32.mrb[123].mxu0 }
0x12be   :  { %v5817_v63 = vpack.c.bf16 %v5633_v55, %v5629_v32 }
0x12c0   :  { %v10317_v24 = vpop.f32.mrb[92].mxu1 }
0x12c1   :  { %v10320_v34 = vpop.f32.mrb[93].mxu1 }
0x12c2   :  { %7355 = vmatmul.mubr.msk.bf16.gmra.mrb[124].mxu1 %vm886_vm3, %v8346_v59  ;;  %v10323_v54 = vpop.f32.mrb[94].mxu1  ;;  %v5637_v29 = vpop.f32.mrb[124].mxu0 }
0x12c3   :  { %6041 = vmatprep.mubr.bf16.mxu1 %v8451_v0  ;;  %v5828_v35 = vpack.c.bf16 %v10323_v54, %v10317_v24  ;;  %v10327_v39 = vpop.f32.mrb[95].mxu1  ;;  %v5639_v20 = vpop.f32.mrb[125].mxu0  ;;  %v8367_v24 = vld [vmem:[%s10657_s21 + $0xd8] sm:$0xff]   ;;  %v8369_v54 = vld [vmem:[%s10657_s21 + $0xe8] sm:$0xff]  }
0x12c4   :  { %v5829_v15 = vpack.c.bf16 %v10327_v39, %v10320_v34  ;;  %v5641_v38 = vpop.f32.mrb[126].mxu0  ;;  %v8368_v34 = vld [vmem:[%s10657_s21 + $0xe0] sm:$0xff]   ;;  %v8371_v39 = vld [vmem:[%s10657_s21 + $0xf8] sm:$0xff]  }
0x12c5   :  { %v5826_v47 = vpack.c.bf16 %v5641_v38, %v5637_v29  ;;  %v5643_v10 = vpop.f32.mrb[127].mxu0 }
0x12c6   :  { %v5827_v3 = vpack.c.bf16 %v5643_v10, %v5639_v20  ;;  %v8373_v10 = vld [vmem:[%s10657_s21 + $0x108] sm:$0xff]  }
0x12c8   :  { %v10334_v4 = vpop.f32.mrb[96].mxu1 }
0x12c9   :  { %v10337_v41 = vpop.f32.mrb[97].mxu1 }
0x12ca   :  { %7356 = vmatmul.mubr.msk.bf16.gmra.mrb[128].mxu1 %vm886_vm3, %v8347_v16  ;;  %v10340_v5 = vpop.f32.mrb[98].mxu1  ;;  %v5647_v12 = vpop.f32.mrb[128].mxu0 }
0x12cb   :  { %6148 = vmatprep.mubr.bf16.mxu1 %v8451_v0  ;;  %v5838_v17 = vpack.c.bf16 %v10340_v5, %v10334_v4  ;;  %v10344_v19 = vpop.f32.mrb[99].mxu1  ;;  %v5649_v21 = vpop.f32.mrb[129].mxu0  ;;  %v8375_v4 = vld [vmem:[%s10657_s21 + $0x118] sm:$0xff]   ;;  %v8377_v5 = vld [vmem:[%s10657_s21 + $0x128] sm:$0xff]  }
0x12cc   :  { %v5839_v27 = vpack.c.bf16 %v10344_v19, %v10337_v41  ;;  %v5651_v36 = vpop.f32.mrb[130].mxu0  ;;  %v8376_v41 = vld [vmem:[%s10657_s21 + $0x120] sm:$0xff]  }
0x12cd   :  { %v5836_v45 = vpack.c.bf16 %v5651_v36, %v5647_v12  ;;  %v5653_v8 = vpop.f32.mrb[131].mxu0  ;;  %v8378_v12 = vld [vmem:[%s10657_s21 + $0x130] sm:$0xff]  }
0x12ce   :  { %v5837_v2 = vpack.c.bf16 %v5653_v8, %v5649_v21 }
0x12d2   :  { %7365 = vmatmul.mubr.msk.bf16.vlgmr.msra.gmra.mrb[100].mxu1 %vm886_vm3, %v8348_v22 }
0x12d3   :  { %6311 = vmatpush1.bf16.msra.mxu1 %v5806_v50  ;;  %6158 = vmatprep.mubr.bf16.mxu1 %v8451_v0 }
0x12d4   :  { %6312 = vmatprep.subr.bf16.mxu1 %v5817_v63  ;;  %v8356_v63 = vld [vmem:[%s10657_s21 + $0x80] sm:$0xff]  }
0x12d7   :  { %6313 = vmatpush1.bf16.msra.mxu1 %v5816_v31 }
0x12d8   :  { %6314 = vmatprep.subr.bf16.mxu1 %v5827_v3  ;;  %v8374_v3 = vld [vmem:[%s10657_s21 + $0x110] sm:$0xff]  }
0x12da   :  { %7366 = vmatmul.mubr.msk.bf16.gmra.mrb[104].mxu1 %vm886_vm3, %v8349_v37 }
0x12db   :  { %6168 = vmatprep.mubr.bf16.mxu1 %v8451_v0  ;;  %6315 = vmatpush1.bf16.msra.mxu1 %v5826_v47  ;;  %v8357_v47 = vld [vmem:[%s10657_s21 + $0x88] sm:$0xff]  }
0x12dc   :  { %6316 = vmatprep.subr.bf16.mxu1 %v5837_v2 }
0x12df   :  { %6317 = vmatpush1.bf16.msra.mxu1 %v5836_v45 }
0x12e0   :  { %6536 = vmatprep.subr.bf16.mxu1 %v5809_v61 }
0x12e2   :  { %7367 = vmatmul.mubr.msk.bf16.gmra.mrb[108].mxu1 %vm886_vm3, %v8350_v30 }
0x12e3   :  { %6178 = vmatprep.mubr.bf16.mxu1 %v8451_v0 }
0x12ea   :  { %7368 = vmatmul.mubr.msk.bf16.gmra.mrb[112].mxu1 %vm886_vm3, %v8351_v11 }
0x12eb   :  { %6188 = vmatprep.mubr.bf16.mxu1 %v8451_v0 }
0x12f2   :  { %7369 = vmatmul.mubr.msk.bf16.gmra.mrb[116].mxu1 %vm886_vm3, %v8352_v18  ;;  %v10376_v60 = vpop.f32.mrb[132].mxu0 }
0x12f3   :  { %6198 = vmatprep.mubr.bf16.mxu1 %v8451_v0  ;;  %v5765_v23 = vpop.f32.mrb[133].mxu0 }
0x12f4   :  { %v10381_v42 = vpop.f32.mrb[134].mxu0 }
0x12f5   :  { %v5810_v62 = vpack.c.bf16 %v10381_v42, %v10376_v60  ;;  %v5769_v25 = vpop.f32.mrb[135].mxu0 }
0x12f6   :  { %v5811_v6 = vpack.c.bf16 %v5769_v25, %v5765_v23 }
0x12fa   :  { %7370 = vmatmul.mubr.msk.bf16.gmra.mrb[120].mxu1 %vm886_vm3, %v8353_v48  ;;  %v5773_v52 = vpop.f32.mrb[136].mxu0 }
0x12fb   :  { %6208 = vmatprep.mubr.bf16.mxu1 %v8451_v0  ;;  %v5775_v53 = vpop.f32.mrb[137].mxu0 }
0x12fc   :  { %v5777_v7 = vpop.f32.mrb[138].mxu0 }
0x12fd   :  { %v5820_v61 = vpack.c.bf16 %v5777_v7, %v5773_v52  ;;  %v5779_v13 = vpop.f32.mrb[139].mxu0 }
0x12fe   :  { %v5821_v40 = vpack.c.bf16 %v5779_v13, %v5775_v53 }
0x1302   :  { %7371 = vmatmul.mubr.msk.bf16.gmra.mrb[124].mxu1 %vm886_vm3, %v8354_v43  ;;  %v5783_v50 = vpop.f32.mrb[140].mxu0 }
0x1303   :  { %6218 = vmatprep.mubr.bf16.mxu1 %v8451_v0  ;;  %v5785_v9 = vpop.f32.mrb[141].mxu0 }
0x1304   :  { %v5787_v56 = vpop.f32.mrb[142].mxu0 }
0x1305   :  { %v5830_v32 = vpack.c.bf16 %v5787_v56, %v5783_v50  ;;  %v5789_v59 = vpop.f32.mrb[143].mxu0 }
0x1306   :  { %v5831_v57 = vpack.c.bf16 %v5789_v59, %v5785_v9 }
0x130a   :  { %7372 = vmatmul.mubr.msk.bf16.gmra.mrb[128].mxu1 %vm886_vm3, %v8355_v44  ;;  %v5793_v31 = vpop.f32.mrb[144].mxu0 }
0x130b   :  { %6342 = vmatprep.mubr.bf16.mxu1 %v8451_v0  ;;  %v5795_v55 = vpop.f32.mrb[145].mxu0 }
0x130c   :  { %v5797_v29 = vpop.f32.mrb[146].mxu0 }
0x130d   :  { %v5840_v20 = vpack.c.bf16 %v5797_v29, %v5793_v31  ;;  %v5799_v16 = vpop.f32.mrb[147].mxu0 }
0x130e   :  { %v5841_v38 = vpack.c.bf16 %v5799_v16, %v5795_v55 }
0x1312   :  { %7397 = vmatmul.mubr.msk.bf16.vlgmr.msra.gmra.mrb[100].mxu1 %vm886_vm3, %v8356_v63 }
0x1313   :  { %6537 = vmatpush1.bf16.msra.mxu1 %v5808_v26  ;;  %6352 = vmatprep.mubr.bf16.mxu1 %v8451_v0  ;;  %v8360_v26 = vld [vmem:[%s10657_s21 + $0xa0] sm:$0xff]  }
0x1314   :  { %6538 = vmatprep.subr.bf16.mxu1 %v5819_v33  ;;  %v8366_v33 = vld [vmem:[%s10657_s21 + $0xd0] sm:$0xff]  }
0x1317   :  { %6539 = vmatpush1.bf16.msra.mxu1 %v5818_v28  ;;  %v8364_v28 = vld [vmem:[%s10657_s21 + $0xc0] sm:$0xff]  }
0x1318   :  { %6540 = vmatprep.subr.bf16.mxu1 %v5829_v15  ;;  %v8372_v15 = vld [vmem:[%s10657_s21 + $0x100] sm:$0xff]  }
0x131a   :  { %7398 = vmatmul.mubr.msk.bf16.gmra.mrb[104].mxu1 %vm886_vm3, %v8357_v47 }
0x131b   :  { %6362 = vmatprep.mubr.bf16.mxu1 %v8451_v0  ;;  %6541 = vmatpush1.bf16.msra.mxu1 %v5828_v35  ;;  %v8370_v35 = vld [vmem:[%s10657_s21 + $0xf0] sm:$0xff]  }
0x131c   :  { %6542 = vmatprep.subr.bf16.mxu1 %v5839_v27 }
0x131f   :  { %6543 = vmatpush1.bf16.msra.mxu1 %v5838_v17  ;;  %v8379_v17 = vld [vmem:[%s10657_s21 + $0x138] sm:$0xff]  }
0x1320   :  { %6762 = vmatprep.subr.bf16.mxu1 %v5811_v6 }
0x1322   :  { %7399 = vmatmul.mubr.msk.bf16.gmra.mrb[108].mxu1 %vm886_vm3, %v8358_v14 }
0x1323   :  { %6372 = vmatprep.mubr.bf16.mxu1 %v8451_v0 }
0x132a   :  { %7400 = vmatmul.mubr.msk.bf16.gmra.mrb[112].mxu1 %vm886_vm3, %v8359_v1 }
0x132b   :  { %6382 = vmatprep.mubr.bf16.mxu1 %v8451_v0 }
0x1332   :  { %7401 = vmatmul.mubr.msk.bf16.gmra.mrb[116].mxu1 %vm886_vm3, %v8360_v26 }
0x1333   :  { %6392 = vmatprep.mubr.bf16.mxu1 %v8451_v0 }
0x133a   :  { %7402 = vmatmul.mubr.msk.bf16.gmra.mrb[120].mxu1 %vm886_vm3, %v8361_v46 }
0x133b   :  { %6402 = vmatprep.mubr.bf16.mxu1 %v8451_v0 }
0x1342   :  { %7403 = vmatmul.mubr.msk.bf16.gmra.mrb[124].mxu1 %vm886_vm3, %v8362_v49 }
0x1343   :  { %6412 = vmatprep.mubr.bf16.mxu1 %v8451_v0 }
0x134a   :  { %7404 = vmatmul.mubr.msk.bf16.gmra.mrb[128].mxu1 %vm886_vm3, %v8363_v51 }
0x134b   :  { %6568 = vmatprep.mubr.bf16.mxu1 %v8451_v0 }
0x1352   :  { %7429 = vmatmul.mubr.msk.bf16.vlgmr.msra.gmra.mrb[100].mxu1 %vm886_vm3, %v8364_v28 }
0x1353   :  { %6763 = vmatpush1.bf16.msra.mxu1 %v5810_v62  ;;  %6578 = vmatprep.mubr.bf16.mxu1 %v8451_v0 }
0x1354   :  { %6764 = vmatprep.subr.bf16.mxu1 %v5821_v40 }
0x1357   :  { %6765 = vmatpush1.bf16.msra.mxu1 %v5820_v61 }
0x1358   :  { %6766 = vmatprep.subr.bf16.mxu1 %v5831_v57 }
0x135a   :  { %7430 = vmatmul.mubr.msk.bf16.gmra.mrb[104].mxu1 %vm886_vm3, %v8365_v58 }
0x135b   :  { %6588 = vmatprep.mubr.bf16.mxu1 %v8451_v0  ;;  %6767 = vmatpush1.bf16.msra.mxu1 %v5830_v32 }
0x135c   :  { %6768 = vmatprep.subr.bf16.mxu1 %v5841_v38 }
0x135f   :  { %6769 = vmatpush1.bf16.msra.mxu1 %v5840_v20 }
0x1362   :  { %7431 = vmatmul.mubr.msk.bf16.gmra.mrb[108].mxu1 %vm886_vm3, %v8366_v33 }
0x1363   :  { %6598 = vmatprep.mubr.bf16.mxu1 %v8451_v0 }
0x136a   :  { %7432 = vmatmul.mubr.msk.bf16.gmra.mrb[112].mxu1 %vm886_vm3, %v8367_v24 }
0x136b   :  { %6608 = vmatprep.mubr.bf16.mxu1 %v8451_v0 }
0x1372   :  { %7433 = vmatmul.mubr.msk.bf16.gmra.mrb[116].mxu1 %vm886_vm3, %v8368_v34 }
0x1373   :  { %6618 = vmatprep.mubr.bf16.mxu1 %v8451_v0 }
0x137a   :  { %7434 = vmatmul.mubr.msk.bf16.gmra.mrb[120].mxu1 %vm886_vm3, %v8369_v54 }
0x137b   :  { %6628 = vmatprep.mubr.bf16.mxu1 %v8451_v0 }
0x1382   :  { %7435 = vmatmul.mubr.msk.bf16.gmra.mrb[124].mxu1 %vm886_vm3, %v8370_v35 }
0x1383   :  { %6638 = vmatprep.mubr.bf16.mxu1 %v8451_v0 }
0x138a   :  { %7436 = vmatmul.mubr.msk.bf16.gmra.mrb[128].mxu1 %vm886_vm3, %v8371_v39 }
0x138b   :  { %6794 = vmatprep.mubr.bf16.mxu1 %v8451_v0 }
0x1392   :  { %7461 = vmatmul.mubr.msk.bf16.vlgmr.msra.gmra.mrb[100].mxu1 %vm886_vm3, %v8372_v15 }
0x1393   :  { %6804 = vmatprep.mubr.bf16.mxu1 %v8451_v0 }
0x139a   :  { %7462 = vmatmul.mubr.msk.bf16.gmra.mrb[104].mxu1 %vm886_vm3, %v8373_v10 }
0x139b   :  { %6814 = vmatprep.mubr.bf16.mxu1 %v8451_v0 }
0x13a2   :  { %7463 = vmatmul.mubr.msk.bf16.gmra.mrb[108].mxu1 %vm886_vm3, %v8374_v3 }
0x13a3   :  { %6824 = vmatprep.mubr.bf16.mxu1 %v8451_v0 }
0x13aa   :  { %7464 = vmatmul.mubr.msk.bf16.gmra.mrb[112].mxu1 %vm886_vm3, %v8375_v4 }
0x13ab   :  { %6834 = vmatprep.mubr.bf16.mxu1 %v8451_v0 }
0x13b2   :  { %7465 = vmatmul.mubr.msk.bf16.gmra.mrb[116].mxu1 %vm886_vm3, %v8376_v41 }
0x13b3   :  { %6844 = vmatprep.mubr.bf16.mxu1 %v8451_v0 }
0x13ba   :  { %7466 = vmatmul.mubr.msk.bf16.gmra.mrb[120].mxu1 %vm886_vm3, %v8377_v5 }
0x13bb   :  { %6854 = vmatprep.mubr.bf16.mxu1 %v8451_v0 }
0x13c2   :  { %7467 = vmatmul.mubr.msk.bf16.gmra.mrb[124].mxu1 %vm886_vm3, %v8378_v12 }
0x13c3   :  { %6864 = vmatprep.mubr.bf16.mxu1 %v8451_v0 }
0x13ca   :  { %7468 = vmatmul.mubr.msk.bf16.gmra.mrb[128].mxu1 %vm886_vm3, %v8379_v17 }
0x1465   :  { %v6796_v19 = vpop.f32.mrb[100].mxu1 }
0x1466   :  { %8380 = vtanh.f32 %v6796_v19  ;;  %v6798_v21 = vpop.f32.mrb[101].mxu1 }
0x1467   :  { %8382 = vtanh.f32 %v6798_v21  ;;  %v6800_v27 = vpop.f32.mrb[102].mxu1 }
0x1468   :  { %8384 = vtanh.f32 %v6800_v27  ;;  %v6802_v22 = vpop.f32.mrb[103].mxu1 }
0x1469   :  { %8386 = vtanh.f32 %v6802_v22 }
0x146d   :  { %v6806_v36 = vpop.f32.mrb[104].mxu1 }
0x146e   :  { %8388 = vtanh.f32 %v6806_v36  ;;  %v6808_v45 = vpop.f32.mrb[105].mxu1 }
0x146f   :  { %8390 = vtanh.f32 %v6808_v45  ;;  %v6810_v8 = vpop.f32.mrb[106].mxu1 }
0x1470   :  { %v8381_v0 = vpop.eup %8380  ;;  %8392 = vtanh.f32 %v6810_v8  ;;  %v6812_v2 = vpop.f32.mrb[107].mxu1 }
0x1471   :  { %v8383_v37 = vpop.eup %8382  ;;  %6939 = vst [vmem:[%s10659_s23] sm:$0xff] %v8381_v0  ;;  %8394 = vtanh.f32 %v6812_v2 }
0x1472   :  { %v8385_v30 = vpop.eup %8384  ;;  %6940 = vst [vmem:[%s10659_s23 + $0x8] sm:$0xff] %v8383_v37 }
0x1473   :  { %v8387_v11 = vpop.eup %8386  ;;  %6941 = vst [vmem:[%s10659_s23 + $0x10] sm:$0xff] %v8385_v30 }
0x1474   :  { %6942 = vst [vmem:[%s10659_s23 + $0x18] sm:$0xff] %v8387_v11 }
0x1475   :  { %v6816_v18 = vpop.f32.mrb[108].mxu1 }
0x1476   :  { %8396 = vtanh.f32 %v6816_v18  ;;  %v6818_v60 = vpop.f32.mrb[109].mxu1 }
0x1477   :  { %8398 = vtanh.f32 %v6818_v60  ;;  %v6820_v23 = vpop.f32.mrb[110].mxu1 }
0x1478   :  { %v8389_v48 = vpop.eup %8388  ;;  %8400 = vtanh.f32 %v6820_v23  ;;  %v6822_v42 = vpop.f32.mrb[111].mxu1 }
0x1479   :  { %v8391_v62 = vpop.eup %8390  ;;  %6943 = vst [vmem:[%s10659_s23 + $0x20] sm:$0xff] %v8389_v48  ;;  %8402 = vtanh.f32 %v6822_v42 }
0x147a   :  { %v8393_v25 = vpop.eup %8392  ;;  %6944 = vst [vmem:[%s10659_s23 + $0x28] sm:$0xff] %v8391_v62 }
0x147b   :  { %v8395_v6 = vpop.eup %8394  ;;  %6945 = vst [vmem:[%s10659_s23 + $0x30] sm:$0xff] %v8393_v25 }
0x147c   :  { %6946 = vst [vmem:[%s10659_s23 + $0x38] sm:$0xff] %v8395_v6 }
0x147d   :  { %v6826_v52 = vpop.f32.mrb[112].mxu1 }
0x147e   :  { %8404 = vtanh.f32 %v6826_v52  ;;  %v6828_v53 = vpop.f32.mrb[113].mxu1 }
0x147f   :  { %8406 = vtanh.f32 %v6828_v53  ;;  %v6830_v43 = vpop.f32.mrb[114].mxu1 }
0x1480   :  { %v8397_v7 = vpop.eup %8396  ;;  %8408 = vtanh.f32 %v6830_v43  ;;  %v6832_v61 = vpop.f32.mrb[115].mxu1 }
0x1481   :  { %v8399_v13 = vpop.eup %8398  ;;  %6947 = vst [vmem:[%s10659_s23 + $0x40] sm:$0xff] %v8397_v7  ;;  %8410 = vtanh.f32 %v6832_v61 }
0x1482   :  { %v8401_v40 = vpop.eup %8400  ;;  %6948 = vst [vmem:[%s10659_s23 + $0x48] sm:$0xff] %v8399_v13 }
0x1483   :  { %v8403_v50 = vpop.eup %8402  ;;  %6949 = vst [vmem:[%s10659_s23 + $0x50] sm:$0xff] %v8401_v40 }
0x1484   :  { %6950 = vst [vmem:[%s10659_s23 + $0x58] sm:$0xff] %v8403_v50 }
0x1485   :  { %v6836_v9 = vpop.f32.mrb[116].mxu1 }
0x1486   :  { %8412 = vtanh.f32 %v6836_v9  ;;  %v6838_v44 = vpop.f32.mrb[117].mxu1 }
0x1487   :  { %8414 = vtanh.f32 %v6838_v44  ;;  %v6840_v56 = vpop.f32.mrb[118].mxu1 }
0x1488   :  { %v8405_v32 = vpop.eup %8404  ;;  %8416 = vtanh.f32 %v6840_v56  ;;  %v6842_v59 = vpop.f32.mrb[119].mxu1 }
0x1489   :  { %v8407_v57 = vpop.eup %8406  ;;  %6951 = vst [vmem:[%s10659_s23 + $0x60] sm:$0xff] %v8405_v32  ;;  %8418 = vtanh.f32 %v6842_v59 }
0x148a   :  { %v8409_v31 = vpop.eup %8408  ;;  %6952 = vst [vmem:[%s10659_s23 + $0x68] sm:$0xff] %v8407_v57 }
0x148b   :  { %v8411_v55 = vpop.eup %8410  ;;  %6953 = vst [vmem:[%s10659_s23 + $0x70] sm:$0xff] %v8409_v31 }
0x148c   :  { %6954 = vst [vmem:[%s10659_s23 + $0x78] sm:$0xff] %v8411_v55 }
0x148d   :  { %v6846_v63 = vpop.f32.mrb[120].mxu1 }
0x148e   :  { %8420 = vtanh.f32 %v6846_v63  ;;  %v6848_v29 = vpop.f32.mrb[121].mxu1 }
0x148f   :  { %8422 = vtanh.f32 %v6848_v29  ;;  %v6850_v20 = vpop.f32.mrb[122].mxu1 }
0x1490   :  { %v8413_v16 = vpop.eup %8412  ;;  %8424 = vtanh.f32 %v6850_v20  ;;  %v6852_v38 = vpop.f32.mrb[123].mxu1 }
0x1491   :  { %v8415_v47 = vpop.eup %8414  ;;  %6955 = vst [vmem:[%s10659_s23 + $0x80] sm:$0xff] %v8413_v16  ;;  %8426 = vtanh.f32 %v6852_v38 }
0x1492   :  { %v8417_v14 = vpop.eup %8416  ;;  %6956 = vst [vmem:[%s10659_s23 + $0x88] sm:$0xff] %v8415_v47 }
0x1493   :  { %v8419_v1 = vpop.eup %8418  ;;  %6957 = vst [vmem:[%s10659_s23 + $0x90] sm:$0xff] %v8417_v14 }
0x1494   :  { %6958 = vst [vmem:[%s10659_s23 + $0x98] sm:$0xff] %v8419_v1 }
0x1495   :  { %v6856_v26 = vpop.f32.mrb[124].mxu1 }
0x1496   :  { %8428 = vtanh.f32 %v6856_v26  ;;  %v6858_v46 = vpop.f32.mrb[125].mxu1 }
0x1497   :  { %8430 = vtanh.f32 %v6858_v46  ;;  %v6860_v49 = vpop.f32.mrb[126].mxu1 }
0x1498   :  { %v8421_v51 = vpop.eup %8420  ;;  %8432 = vtanh.f32 %v6860_v49  ;;  %v6862_v28 = vpop.f32.mrb[127].mxu1 }
0x1499   :  { %v8423_v58 = vpop.eup %8422  ;;  %6959 = vst [vmem:[%s10659_s23 + $0xa0] sm:$0xff] %v8421_v51  ;;  %8434 = vtanh.f32 %v6862_v28 }
0x149a   :  { %v8425_v33 = vpop.eup %8424  ;;  %6960 = vst [vmem:[%s10659_s23 + $0xa8] sm:$0xff] %v8423_v58 }
0x149b   :  { %v8427_v24 = vpop.eup %8426  ;;  %6961 = vst [vmem:[%s10659_s23 + $0xb0] sm:$0xff] %v8425_v33 }
0x149c   :  { %6962 = vst [vmem:[%s10659_s23 + $0xb8] sm:$0xff] %v8427_v24 }
0x149d   :  { %v6866_v34 = vpop.f32.mrb[128].mxu1 }
0x149e   :  { %8436 = vtanh.f32 %v6866_v34  ;;  %v6868_v54 = vpop.f32.mrb[129].mxu1 }
0x149f   :  { %8438 = vtanh.f32 %v6868_v54  ;;  %v6870_v35 = vpop.f32.mrb[130].mxu1 }
0x14a0   :  { %v8429_v39 = vpop.eup %8428  ;;  %8440 = vtanh.f32 %v6870_v35  ;;  %v6872_v15 = vpop.f32.mrb[131].mxu1 }
0x14a1   :  { %v8431_v10 = vpop.eup %8430  ;;  %6963 = vst [vmem:[%s10659_s23 + $0xc0] sm:$0xff] %v8429_v39  ;;  %8442 = vtanh.f32 %v6872_v15 }
0x14a2   :  { %v8433_v3 = vpop.eup %8432  ;;  %6964 = vst [vmem:[%s10659_s23 + $0xc8] sm:$0xff] %v8431_v10 }
0x14a3   :  { %v8435_v4 = vpop.eup %8434  ;;  %6965 = vst [vmem:[%s10659_s23 + $0xd0] sm:$0xff] %v8433_v3 }
0x14a4   :  { %6966 = vst [vmem:[%s10659_s23 + $0xd8] sm:$0xff] %v8435_v4 }
0x14a8   :  { %v8437_v41 = vpop.eup %8436 }
0x14a9   :  { %v8439_v5 = vpop.eup %8438  ;;  %6967 = vst [vmem:[%s10659_s23 + $0xe0] sm:$0xff] %v8437_v41 }
0x14aa   :  { %v8441_v12 = vpop.eup %8440  ;;  %6968 = vst [vmem:[%s10659_s23 + $0xe8] sm:$0xff] %v8439_v5 }
0x14ab   :  { %v8443_v17 = vpop.eup %8442  ;;  %6969 = vst [vmem:[%s10659_s23 + $0xf0] sm:$0xff] %v8441_v12 }
0x14ac   :  { %6970 = vst [vmem:[%s10659_s23 + $0xf8] sm:$0xff] %v8443_v17 }
0x14ad   :  { %6975 = vsyncmov [#allocation5] }
0x14b0   :  { %s6976_s5 = vpop.sfrf %6975 }
0x14b1   :  { %p7469_p0 = scmp.ne.s32.totalorder %s6976_s5, 0 }
0x14b3   :  { %6980 = shalt.err (%p7469_p0)  }
0x14b4   :  { %6982 = vsyncmov [#allocation5 + $0x1] }
0x14b7   :  { %s6983_s17 = vpop.sfrf %6982 }
0x14b8   :  { %p7470_p1 = scmp.ne.s32.totalorder %s6983_s17, 0 }
0x14ba   :  { %6987 = shalt.err (%p7470_p1)  }
0x14bb   :  { %6989 = vsyncmov [#allocation5 + $0x2] }
0x14be   :  { %s6990_s12 = vpop.sfrf %6989 }
0x14bf   :  { %p7471_p2 = scmp.ne.s32.totalorder %s6990_s12, 0 }
0x14c1   :  { %6994 = shalt.err (%p7471_p2)  }

</bundles_post_ra>
